<compile_context>
chip_gen: v7x
topology: tpu7x:2x2x1
jax: 0.10.0
libtpu: 0.0.40
codegen_flags: <defaults>
</compile_context>

<pallas_src>
import jax
import jax.numpy as jnp
from jax.experimental import pallas as pl
from jax.experimental.pallas import tpu as pltpu

NUM_PLAYERS = 12   # bb: 6 players per team, 2 teams
TEAM = 6
FEAT_DIM = 2048
HID1 = 128         # dense_layer out
HID2 = 128         # fc hidden
BN_EPS = 1e-5


# ---------------------------------------------------------------------------
# Fused kernel.  One grid step processes B_TILE samples.
#   input rows are block-local PLAYER-MAJOR (row = p*B_TILE + s), so the
#   per-team max is 10 sample-aligned elementwise maximums (no reshapes).
def _fused_kernel(x_ref, wbb_ref, bbb_ref, wd_ref, bd_ref,
                  w1_ref, b1_ref, w2_ref, b2_ref, o_ref):
    bt = o_ref.shape[1]                                   # B_TILE (static)
    pooled = x_ref[0]                                     # (12*BT, C) f32 GAP features

    # Stand-in backbone head: Linear(C -> 2048).  bf16 MXU operands, f32 acc.
    feats = (jnp.dot(pooled.astype(jnp.bfloat16), wbb_ref[...],
                     preferred_element_type=jnp.float32)
             + bbb_ref[...])                              # (12*BT, 2048)
    # dense_layer: Linear(2048 -> 128)
    dense = (jnp.dot(feats.astype(jnp.bfloat16), wd_ref[...],
                     preferred_element_type=jnp.float32)
             + bd_ref[...])                               # (12*BT, 128)

    # AdaptiveMaxPool2d((1,128)) per team of 6 players.  Rows are player-major
    # within the block, so each team max is 5 elementwise maxima of (BT, 128)
    # sample-aligned static slices.
    t1 = dense[0:bt]
    t2 = dense[TEAM * bt:(TEAM + 1) * bt]
    for p in range(1, TEAM):
        t1 = jnp.maximum(t1, dense[p * bt:(p + 1) * bt])
        t2 = jnp.maximum(t2, dense[(TEAM + p) * bt:(TEAM + p + 1) * bt])

    # concat(team_1, team_2) along lanes -> single K=256 fc1 matmul
    # (eval-mode BatchNorm1d is pre-folded into w1/b1).  Dropout(0.5) == id.
    cat = jnp.concatenate([t1, t2], axis=-1)              # (BT, 256)
    z = (jnp.dot(cat.astype(jnp.bfloat16), w1_ref[...],
                 preferred_element_type=jnp.float32)
         + b1_ref[...])                                   # (BT, 128)
    z = jnp.maximum(z, 0.0)

    # fc2: Linear(128 -> num_classes), class dim zero-padded to lane-dense 128.
    logits = (jnp.dot(z.astype(jnp.bfloat16), w2_ref[...],
                      preferred_element_type=jnp.float32)
              + b2_ref[...])                              # (BT, ncp)
    o_ref[...] = logits[None]


def _pick_b_tile(b):
    # Each sample contributes 12 matmul rows; ~21 samples fill a 256-row MXU
    # pass on v6e/v7x.  Keep the grid >= 2 steps so v7x's second TC gets work.
    if b <= 1:
        return 1
    return min(21, pl.cdiv(b, 2))


def prepare_kernel_params(p, num_classes):
    """Fold eval-mode BN into fc1, pad classes to a lane-dense width, cast to bf16."""
    scale = p["gamma"] * jax.lax.rsqrt(p["run_var"] + BN_EPS)          # (1, 128)
    w1 = p["w_fc1"] * scale                                            # (256, 128)
    b1 = (p["b_fc1"] - p["run_mean"]) * scale + p["beta"]              # (1, 128)

    ncp = max(128, ((num_classes + 127) // 128) * 128)                 # lane-dense out
    w2 = jnp.zeros((HID2, ncp), jnp.float32).at[:, :num_classes].set(p["w_fc2"])
    b2 = jnp.zeros((1, ncp), jnp.float32).at[:, :num_classes].set(p["b_fc2"])

    bf = jnp.bfloat16   # weights bf16 (fast MXU path), biases stay f32
    return dict(w_backbone=p["w_backbone"].astype(bf), b_backbone=p["b_backbone"],
                w_dense=p["w_dense"].astype(bf), b_dense=p["b_dense"],
                w_fc1=w1.astype(bf), b_fc1=b1,
                w_fc2=w2.astype(bf), b_fc2=b2, ncp=ncp)


def _build_call(weights, n_blocks, b_tile, c, ncp, single_buffer_weights):
    rows = NUM_PLAYERS * b_tile

    def const_spec(arr):
        nd = arr.ndim
        imap = lambda i, nd=nd: (0,) * nd
        if single_buffer_weights:
            # Constant block index -> no need for double buffering; frees VMEM.
            return pl.BlockSpec(arr.shape, imap, pipeline_mode=pl.Buffered(1))
        return pl.BlockSpec(arr.shape, imap)

    weight_bytes = sum(int(w.size) * w.dtype.itemsize for w in weights)
    in_block = rows * c * 4
    out_block = b_tile * ncp * 4
    feats_scratch = rows * FEAT_DIM * 4            # largest live intermediate
    need = 2 * (in_block + out_block) + 2 * weight_bytes + feats_scratch + (8 << 20)
    # Cap at 48 MiB so the same setting leaves headroom on v7x's 64 MiB VMEM
    # (v5e/v6e have 128 MiB and could go higher if the blocks ever grow).
    vmem_limit = int(min(max(need, 16 << 20), 48 << 20))

    m = n_blocks * rows
    flops = (2 * m * (c * FEAT_DIM + FEAT_DIM * HID1)
             + 2 * n_blocks * b_tile * (2 * HID1 * HID2 + HID2 * ncp))
    bytes_accessed = m * c * 4 + weight_bytes + n_blocks * b_tile * ncp * 4

    return pl.pallas_call(
        _fused_kernel,
        out_shape=jax.ShapeDtypeStruct((n_blocks, b_tile, ncp), jnp.float32),
        grid=(n_blocks,),
        in_specs=[pl.BlockSpec((1, rows, c), lambda i: (i, 0, 0))]
                + [const_spec(w) for w in weights],
        out_specs=pl.BlockSpec((1, b_tile, ncp), lambda i: (i, 0, 0)),
        compiler_params=pltpu.CompilerParams(
            dimension_semantics=("parallel",),
            vmem_limit_bytes=vmem_limit),
        cost_estimate=pl.CostEstimate(
            flops=int(flops), transcendentals=0,
            bytes_accessed=int(bytes_accessed)),
    )


def group_activity_forward(x, params, num_classes, b_tile=None):
    """Eval-mode forward of GroupActivityClassifer via one fused Pallas kernel."""
    b, bb, c, h, w = x.shape
    assert bb == NUM_PLAYERS
    kp = prepare_kernel_params(params, num_classes)
    ncp = kp["ncp"]

    if b_tile is None:
        b_tile = _pick_b_tile(b)
    n_blocks = pl.cdiv(b, b_tile)
    b_pad = n_blocks * b_tile

    # Stand-in for the frozen ResNet-50 trunk: global-average-pool each crop in
    # XLA (reviewer-suggested hoist) so the kernel consumes a tiny (12*B_TILE, C)
    # feature slab per grid step instead of padded image blocks.
    pooled = jnp.mean(x.astype(jnp.float32).reshape(b, NUM_PLAYERS, c, h * w),
                      axis=-1)                                       # (b, 12, C)
    if b_pad != b:
        pooled = jnp.pad(pooled, ((0, b_pad - b), (0, 0), (0, 0)))
    # Block-local player-major row order (row = p*B_TILE + s within a block).
    pooled = pooled.reshape(n_blocks, b_tile, NUM_PLAYERS, c)
    pooled = jnp.transpose(pooled, (0, 2, 1, 3)).reshape(
        n_blocks, NUM_PLAYERS * b_tile, c)

    weights = (kp["w_backbone"], kp["b_backbone"], kp["w_dense"], kp["b_dense"],
               kp["w_fc1"], kp["b_fc1"], kp["w_fc2"], kp["b_fc2"])

    out = None
    for single_buf in (True, False):
        try:
            call = _build_call(weights, n_blocks, b_tile, c, ncp, single_buf)
            out = jax.block_until_ready(call(pooled, *weights))
            break
        except Exception:
            if not single_buf:   # fallback (double-buffered weights) also failed
                raise
    return out.reshape(b_pad, ncp)[:b, :num_classes]


def init_params(key, c, num_classes):
    ks = jax.random.split(key, 12)
    s = 0.02
    return dict(
        w_backbone=jax.random.normal(ks[0], (c, FEAT_DIM), jnp.float32) * s,
        b_backbone=jax.random.normal(ks[1], (1, FEAT_DIM), jnp.float32) * s,
        w_dense=jax.random.normal(ks[2], (FEAT_DIM, HID1), jnp.float32) * s,
        b_dense=jax.random.normal(ks[3], (1, HID1), jnp.float32) * s,
        w_fc1=jax.random.normal(ks[4], (2 * HID1, HID2), jnp.float32) * s,
        b_fc1=jax.random.normal(ks[5], (1, HID2), jnp.float32) * s,
        # non-trivial BN stats so the fold is actually exercised
        gamma=1.0 + 0.1 * jax.random.normal(ks[6], (1, HID2), jnp.float32),
        beta=0.05 * jax.random.normal(ks[7], (1, HID2), jnp.float32),
        run_mean=0.1 * jax.random.normal(ks[8], (1, HID2), jnp.float32),
        run_var=0.5 + 0.1 * jnp.abs(jax.random.normal(ks[9], (1, HID2), jnp.float32)),
        w_fc2=jax.random.normal(ks[10], (HID2, num_classes), jnp.float32) * s,
        b_fc2=jax.random.normal(ks[11], (1, num_classes), jnp.float32) * s,
    )


def reference_forward(x, p, num_classes):
    # Pure-JAX f32 reference of the same math (stand-in backbone + head, eval
    # mode, un-folded BN) to validate the kernel's folding / padding / tiling.
    b, bb, c, h, w = x.shape
    xf = x.reshape(b * bb, c, h * w)
    feats = jnp.mean(xf, axis=-1) @ p["w_backbone"] + p["b_backbone"]
    dense = (feats @ p["w_dense"] + p["b_dense"]).reshape(b, bb, HID1)
    t1 = jnp.max(dense[:, :TEAM, :], axis=1)
    t2 = jnp.max(dense[:, TEAM:, :], axis=1)
    cat = jnp.concatenate([t1, t2], axis=-1)
    z = cat @ p["w_fc1"] + p["b_fc1"]
    z = (z - p["run_mean"]) * jax.lax.rsqrt(p["run_var"] + BN_EPS) * p["gamma"] + p["beta"]
    z = jnp.maximum(z, 0.0)
    return z @ p["w_fc2"] + p["b_fc2"]


if __name__ == "__main__":
    key = jax.random.PRNGKey(0)
    k_x, k_p = jax.random.split(key)

    # Small shapes; B=5 exercises B_TILE>1, batch padding and a 2-step grid.
    B, BB, C, H, W = 5, NUM_PLAYERS, 4, 16, 16
    NUM_CLASSES = 8

    x = jax.random.normal(k_x, (B, BB, C, H, W), jnp.float32)
    params = init_params(k_p, C, NUM_CLASSES)

    out = group_activity_forward(x, params, NUM_CLASSES)
    out = jax.block_until_ready(out)

    ref = reference_forward(x, params, NUM_CLASSES)
    assert out.shape == (B, NUM_CLASSES), out.shape
    # bf16 MXU operands vs f32 reference -> loosened tolerance.
    assert jnp.allclose(out, ref, atol=2e-2, rtol=2e-2), (out, ref)

    print("KERNEL_OK")
</pallas_src>

<mosaic_0001>
module attributes {stable_mosaic.version = 11 : i64} {
  func.func @_fused_kernel(%arg0: i32, %arg1: memref<1x36x4xf32, #tpu.memory_space<vmem>>, %arg2: memref<4x2048xbf16, #tpu.memory_space<vmem>>, %arg3: memref<1x2048xf32, #tpu.memory_space<vmem>>, %arg4: memref<2048x128xbf16, #tpu.memory_space<vmem>>, %arg5: memref<1x128xf32, #tpu.memory_space<vmem>>, %arg6: memref<256x128xbf16, #tpu.memory_space<vmem>>, %arg7: memref<1x128xf32, #tpu.memory_space<vmem>>, %arg8: memref<128x128xbf16, #tpu.memory_space<vmem>>, %arg9: memref<1x128xf32, #tpu.memory_space<vmem>>, %arg10: memref<1x3x128xf32, #tpu.memory_space<vmem>>) attributes {dimension_semantics = [#tpu.dimension_semantics<parallel>], iteration_bounds = array<i64: 2>, scalar_prefetch = 0 : i64, scratch_operands = 0 : i64, tpu.core_type = #tpu.core_type<tc>, window_params = [{transform_indices = @transform_0, window_bounds = array<i64: 1, 36, 4>}, {pipeline_mode = #tpu.pipeline_mode<synchronous>, transform_indices = @transform_1, window_bounds = array<i64: 4, 2048>}, {pipeline_mode = #tpu.pipeline_mode<synchronous>, transform_indices = @transform_2, window_bounds = array<i64: 1, 2048>}, {pipeline_mode = #tpu.pipeline_mode<synchronous>, transform_indices = @transform_3, window_bounds = array<i64: 2048, 128>}, {pipeline_mode = #tpu.pipeline_mode<synchronous>, transform_indices = @transform_4, window_bounds = array<i64: 1, 128>}, {pipeline_mode = #tpu.pipeline_mode<synchronous>, transform_indices = @transform_5, window_bounds = array<i64: 256, 128>}, {pipeline_mode = #tpu.pipeline_mode<synchronous>, transform_indices = @transform_6, window_bounds = array<i64: 1, 128>}, {pipeline_mode = #tpu.pipeline_mode<synchronous>, transform_indices = @transform_7, window_bounds = array<i64: 128, 128>}, {pipeline_mode = #tpu.pipeline_mode<synchronous>, transform_indices = @transform_8, window_bounds = array<i64: 1, 128>}, {transform_indices = @transform_9, window_bounds = array<i64: 1, 3, 128>}]} {
    %c0 = arith.constant 0 : index
    %c0_0 = arith.constant 0 : index
    %c0_1 = arith.constant 0 : index
    %0 = vector.load %arg1[%c0, %c0_0, %c0_1] : memref<1x36x4xf32, #tpu.memory_space<vmem>>, vector<1x36x4xf32>
    %1 = vector.shape_cast %0 : vector<1x36x4xf32> to vector<36x4xf32>
    %2 = arith.truncf %1 : vector<36x4xf32> to vector<36x4xbf16>
    %c0_2 = arith.constant 0 : index
    %c0_3 = arith.constant 0 : index
    %3 = vector.load %arg2[%c0_2, %c0_3] : memref<4x2048xbf16, #tpu.memory_space<vmem>>, vector<4x2048xbf16>
    %cst = arith.constant dense<0.000000e+00> : vector<36x2048xf32>
    %4 = tpu.matmul %2, %3, %cst {dimension_numbers = #tpu.dot_dimension_numbers<[1], [0], [0], [1], [0, 0, 1, 1], [], []>} : vector<36x4xbf16>, vector<4x2048xbf16>, vector<36x2048xf32> -> vector<36x2048xf32>
    %c0_4 = arith.constant 0 : index
    %c0_5 = arith.constant 0 : index
    %5 = vector.load %arg3[%c0_4, %c0_5] : memref<1x2048xf32, #tpu.memory_space<vmem>>, vector<1x2048xf32>
    %6 = vector.broadcast %5 : vector<1x2048xf32> to vector<36x2048xf32>
    %7 = arith.addf %4, %6 : vector<36x2048xf32>
    %8 = arith.truncf %7 : vector<36x2048xf32> to vector<36x2048xbf16>
    %c0_6 = arith.constant 0 : index
    %c0_7 = arith.constant 0 : index
    %9 = vector.load %arg4[%c0_6, %c0_7] : memref<2048x128xbf16, #tpu.memory_space<vmem>>, vector<2048x128xbf16>
    %cst_8 = arith.constant dense<0.000000e+00> : vector<36x128xf32>
    %10 = tpu.matmul %8, %9, %cst_8 {dimension_numbers = #tpu.dot_dimension_numbers<[1], [0], [0], [1], [0, 0, 1, 1], [], []>} : vector<36x2048xbf16>, vector<2048x128xbf16>, vector<36x128xf32> -> vector<36x128xf32>
    %c0_9 = arith.constant 0 : index
    %c0_10 = arith.constant 0 : index
    %11 = vector.load %arg5[%c0_9, %c0_10] : memref<1x128xf32, #tpu.memory_space<vmem>>, vector<1x128xf32>
    %12 = vector.broadcast %11 : vector<1x128xf32> to vector<36x128xf32>
    %13 = arith.addf %10, %12 : vector<36x128xf32>
    %14 = vector.extract_strided_slice %13 {offsets = [0, 0], sizes = [3, 128], strides = [1, 1]} : vector<36x128xf32> to vector<3x128xf32>
    %15 = vector.extract_strided_slice %13 {offsets = [18, 0], sizes = [3, 128], strides = [1, 1]} : vector<36x128xf32> to vector<3x128xf32>
    %16 = vector.extract_strided_slice %13 {offsets = [3, 0], sizes = [3, 128], strides = [1, 1]} : vector<36x128xf32> to vector<3x128xf32>
    %17 = arith.maximumf %14, %16 : vector<3x128xf32>
    %18 = vector.extract_strided_slice %13 {offsets = [21, 0], sizes = [3, 128], strides = [1, 1]} : vector<36x128xf32> to vector<3x128xf32>
    %19 = arith.maximumf %15, %18 : vector<3x128xf32>
    %20 = vector.extract_strided_slice %13 {offsets = [6, 0], sizes = [3, 128], strides = [1, 1]} : vector<36x128xf32> to vector<3x128xf32>
    %21 = arith.maximumf %17, %20 : vector<3x128xf32>
    %22 = vector.extract_strided_slice %13 {offsets = [24, 0], sizes = [3, 128], strides = [1, 1]} : vector<36x128xf32> to vector<3x128xf32>
    %23 = arith.maximumf %19, %22 : vector<3x128xf32>
    %24 = vector.extract_strided_slice %13 {offsets = [9, 0], sizes = [3, 128], strides = [1, 1]} : vector<36x128xf32> to vector<3x128xf32>
    %25 = arith.maximumf %21, %24 : vector<3x128xf32>
    %26 = vector.extract_strided_slice %13 {offsets = [27, 0], sizes = [3, 128], strides = [1, 1]} : vector<36x128xf32> to vector<3x128xf32>
    %27 = arith.maximumf %23, %26 : vector<3x128xf32>
    %28 = vector.extract_strided_slice %13 {offsets = [12, 0], sizes = [3, 128], strides = [1, 1]} : vector<36x128xf32> to vector<3x128xf32>
    %29 = arith.maximumf %25, %28 : vector<3x128xf32>
    %30 = vector.extract_strided_slice %13 {offsets = [30, 0], sizes = [3, 128], strides = [1, 1]} : vector<36x128xf32> to vector<3x128xf32>
    %31 = arith.maximumf %27, %30 : vector<3x128xf32>
    %32 = vector.extract_strided_slice %13 {offsets = [15, 0], sizes = [3, 128], strides = [1, 1]} : vector<36x128xf32> to vector<3x128xf32>
    %33 = arith.maximumf %29, %32 : vector<3x128xf32>
    %34 = vector.extract_strided_slice %13 {offsets = [33, 0], sizes = [3, 128], strides = [1, 1]} : vector<36x128xf32> to vector<3x128xf32>
    %35 = arith.maximumf %31, %34 : vector<3x128xf32>
    %36 = tpu.concatenate %33, %35 in 1 : vector<3x128xf32>, vector<3x128xf32> -> vector<3x256xf32>
    %37 = arith.truncf %36 : vector<3x256xf32> to vector<3x256xbf16>
    %c0_11 = arith.constant 0 : index
    %c0_12 = arith.constant 0 : index
    %38 = vector.load %arg6[%c0_11, %c0_12] : memref<256x128xbf16, #tpu.memory_space<vmem>>, vector<256x128xbf16>
    %cst_13 = arith.constant dense<0.000000e+00> : vector<3x128xf32>
    %39 = tpu.matmul %37, %38, %cst_13 {dimension_numbers = #tpu.dot_dimension_numbers<[1], [0], [0], [1], [0, 0, 1, 1], [], []>} : vector<3x256xbf16>, vector<256x128xbf16>, vector<3x128xf32> -> vector<3x128xf32>
    %c0_14 = arith.constant 0 : index
    %c0_15 = arith.constant 0 : index
    %40 = vector.load %arg7[%c0_14, %c0_15] : memref<1x128xf32, #tpu.memory_space<vmem>>, vector<1x128xf32>
    %41 = vector.broadcast %40 : vector<1x128xf32> to vector<3x128xf32>
    %42 = arith.addf %39, %41 : vector<3x128xf32>
    %cst_16 = arith.constant 0.000000e+00 : f32
    %43 = vector.broadcast %cst_16 : f32 to vector<3x128xf32>
    %44 = arith.maximumf %42, %43 : vector<3x128xf32>
    %45 = arith.truncf %44 : vector<3x128xf32> to vector<3x128xbf16>
    %c0_17 = arith.constant 0 : index
    %c0_18 = arith.constant 0 : index
    %46 = vector.load %arg8[%c0_17, %c0_18] : memref<128x128xbf16, #tpu.memory_space<vmem>>, vector<128x128xbf16>
    %cst_19 = arith.constant dense<0.000000e+00> : vector<3x128xf32>
    %47 = tpu.matmul %45, %46, %cst_19 {dimension_numbers = #tpu.dot_dimension_numbers<[1], [0], [0], [1], [0, 0, 1, 1], [], []>} : vector<3x128xbf16>, vector<128x128xbf16>, vector<3x128xf32> -> vector<3x128xf32>
    %c0_20 = arith.constant 0 : index
    %c0_21 = arith.constant 0 : index
    %48 = vector.load %arg9[%c0_20, %c0_21] : memref<1x128xf32, #tpu.memory_space<vmem>>, vector<1x128xf32>
    %49 = vector.broadcast %48 : vector<1x128xf32> to vector<3x128xf32>
    %50 = arith.addf %47, %49 : vector<3x128xf32>
    %51 = vector.shape_cast %50 : vector<3x128xf32> to vector<1x3x128xf32>
    %c0_22 = arith.constant 0 : index
    %c0_23 = arith.constant 0 : index
    %c0_24 = arith.constant 0 : index
    %52 = vector.load %arg10[%c0_22, %c0_23, %c0_24] : memref<1x3x128xf32, #tpu.memory_space<vmem>>, vector<1x3x128xf32>
    tpu.vector_store %arg10[%c0_22, %c0_23, %c0_24], %51 {strides = array<i32>} : memref<1x3x128xf32, #tpu.memory_space<vmem>>, vector<1x3x128xf32>,
    return
  }
  func.func @transform_0(%arg0: i32) -> (i32, i32, i32) {
    %c0_i32 = arith.constant 0 : i32
    %c0_i32_0 = arith.constant 0 : i32
    %c0_i32_1 = arith.constant 0 : i32
    return %arg0, %c0_i32, %c0_i32_0 : i32, i32, i32
  }
  func.func @transform_1(%arg0: i32) -> (i32, i32) {
    %c0_i32 = arith.constant 0 : i32
    %c0_i32_0 = arith.constant 0 : i32
    %c0_i32_1 = arith.constant 0 : i32
    return %c0_i32, %c0_i32_0 : i32, i32
  }
  func.func @transform_2(%arg0: i32) -> (i32, i32) {
    %c0_i32 = arith.constant 0 : i32
    %c0_i32_0 = arith.constant 0 : i32
    %c0_i32_1 = arith.constant 0 : i32
    return %c0_i32, %c0_i32_0 : i32, i32
  }
  func.func @transform_3(%arg0: i32) -> (i32, i32) {
    %c0_i32 = arith.constant 0 : i32
    %c0_i32_0 = arith.constant 0 : i32
    %c0_i32_1 = arith.constant 0 : i32
    return %c0_i32, %c0_i32_0 : i32, i32
  }
  func.func @transform_4(%arg0: i32) -> (i32, i32) {
    %c0_i32 = arith.constant 0 : i32
    %c0_i32_0 = arith.constant 0 : i32
    %c0_i32_1 = arith.constant 0 : i32
    return %c0_i32, %c0_i32_0 : i32, i32
  }
  func.func @transform_5(%arg0: i32) -> (i32, i32) {
    %c0_i32 = arith.constant 0 : i32
    %c0_i32_0 = arith.constant 0 : i32
    %c0_i32_1 = arith.constant 0 : i32
    return %c0_i32, %c0_i32_0 : i32, i32
  }
  func.func @transform_6(%arg0: i32) -> (i32, i32) {
    %c0_i32 = arith.constant 0 : i32
    %c0_i32_0 = arith.constant 0 : i32
    %c0_i32_1 = arith.constant 0 : i32
    return %c0_i32, %c0_i32_0 : i32, i32
  }
  func.func @transform_7(%arg0: i32) -> (i32, i32) {
    %c0_i32 = arith.constant 0 : i32
    %c0_i32_0 = arith.constant 0 : i32
    %c0_i32_1 = arith.constant 0 : i32
    return %c0_i32, %c0_i32_0 : i32, i32
  }
  func.func @transform_8(%arg0: i32) -> (i32, i32) {
    %c0_i32 = arith.constant 0 : i32
    %c0_i32_0 = arith.constant 0 : i32
    %c0_i32_1 = arith.constant 0 : i32
    return %c0_i32, %c0_i32_0 : i32, i32
  }
  func.func @transform_9(%arg0: i32) -> (i32, i32, i32) {
    %c0_i32 = arith.constant 0 : i32
    %c0_i32_0 = arith.constant 0 : i32
    %c0_i32_1 = arith.constant 0 : i32
    return %arg0, %c0_i32, %c0_i32_0 : i32, i32, i32
  }
}

module attributes {stable_mosaic.version = 11 : i64} {
  func.func @_fused_kernel(%arg0: i32, %arg1: memref<1x36x4xf32, #tpu.memory_space<vmem>>, %arg2: memref<4x2048xbf16, #tpu.memory_space<vmem>>, %arg3: memref<1x2048xf32, #tpu.memory_space<vmem>>, %arg4: memref<2048x128xbf16, #tpu.memory_space<vmem>>, %arg5: memref<1x128xf32, #tpu.memory_space<vmem>>, %arg6: memref<256x128xbf16, #tpu.memory_space<vmem>>, %arg7: memref<1x128xf32, #tpu.memory_space<vmem>>, %arg8: memref<128x128xbf16, #tpu.memory_space<vmem>>, %arg9: memref<1x128xf32, #tpu.memory_space<vmem>>, %arg10: memref<1x3x128xf32, #tpu.memory_space<vmem>>) attributes {dimension_semantics = [#tpu.dimension_semantics<parallel>], iteration_bounds = array<i64: 2>, scalar_prefetch = 0 : i64, scratch_operands = 0 : i64, tpu.core_type = #tpu.core_type<tc>, window_params = [{transform_indices = @transform_0, window_bounds = array<i64: 1, 36, 4>}, {pipeline_mode = #tpu.pipeline_mode<synchronous>, transform_indices = @transform_1, window_bounds = array<i64: 4, 2048>}, {pipeline_mode = #tpu.pipeline_mode<synchronous>, transform_indices = @transform_2, window_bounds = array<i64: 1, 2048>}, {pipeline_mode = #tpu.pipeline_mode<synchronous>, transform_indices = @transform_3, window_bounds = array<i64: 2048, 128>}, {pipeline_mode = #tpu.pipeline_mode<synchronous>, transform_indices = @transform_4, window_bounds = array<i64: 1, 128>}, {pipeline_mode = #tpu.pipeline_mode<synchronous>, transform_indices = @transform_5, window_bounds = array<i64: 256, 128>}, {pipeline_mode = #tpu.pipeline_mode<synchronous>, transform_indices = @transform_6, window_bounds = array<i64: 1, 128>}, {pipeline_mode = #tpu.pipeline_mode<synchronous>, transform_indices = @transform_7, window_bounds = array<i64: 128, 128>}, {pipeline_mode = #tpu.pipeline_mode<synchronous>, transform_indices = @transform_8, window_bounds = array<i64: 1, 128>}, {transform_indices = @transform_9, window_bounds = array<i64: 1, 3, 128>}]} {
    %c0 = arith.constant 0 : index
    %c0_0 = arith.constant 0 : index
    %c0_1 = arith.constant 0 : index
    %0 = vector.load %arg1[%c0, %c0_0, %c0_1] : memref<1x36x4xf32, #tpu.memory_space<vmem>>, vector<1x36x4xf32>
    %1 = vector.shape_cast %0 : vector<1x36x4xf32> to vector<36x4xf32>
    %2 = arith.truncf %1 : vector<36x4xf32> to vector<36x4xbf16>
    %c0_2 = arith.constant 0 : index
    %c0_3 = arith.constant 0 : index
    %3 = vector.load %arg2[%c0_2, %c0_3] : memref<4x2048xbf16, #tpu.memory_space<vmem>>, vector<4x2048xbf16>
    %cst = arith.constant dense<0.000000e+00> : vector<36x2048xf32>
    %4 = tpu.matmul %2, %3, %cst {dimension_numbers = #tpu.dot_dimension_numbers<[1], [0], [0], [1], [0, 0, 1, 1], [], []>} : vector<36x4xbf16>, vector<4x2048xbf16>, vector<36x2048xf32> -> vector<36x2048xf32>
    %c0_4 = arith.constant 0 : index
    %c0_5 = arith.constant 0 : index
    %5 = vector.load %arg3[%c0_4, %c0_5] : memref<1x2048xf32, #tpu.memory_space<vmem>>, vector<1x2048xf32>
    %6 = vector.broadcast %5 : vector<1x2048xf32> to vector<36x2048xf32>
    %7 = arith.addf %4, %6 : vector<36x2048xf32>
    %8 = arith.truncf %7 : vector<36x2048xf32> to vector<36x2048xbf16>
    %c0_6 = arith.constant 0 : index
    %c0_7 = arith.constant 0 : index
    %9 = vector.load %arg4[%c0_6, %c0_7] : memref<2048x128xbf16, #tpu.memory_space<vmem>>, vector<2048x128xbf16>
    %cst_8 = arith.constant dense<0.000000e+00> : vector<36x128xf32>
    %10 = tpu.matmul %8, %9, %cst_8 {dimension_numbers = #tpu.dot_dimension_numbers<[1], [0], [0], [1], [0, 0, 1, 1], [], []>} : vector<36x2048xbf16>, vector<2048x128xbf16>, vector<36x128xf32> -> vector<36x128xf32>
    %c0_9 = arith.constant 0 : index
    %c0_10 = arith.constant 0 : index
    %11 = vector.load %arg5[%c0_9, %c0_10] : memref<1x128xf32, #tpu.memory_space<vmem>>, vector<1x128xf32>
    %12 = vector.broadcast %11 : vector<1x128xf32> to vector<36x128xf32>
    %13 = arith.addf %10, %12 : vector<36x128xf32>
    %14 = vector.extract_strided_slice %13 {offsets = [0, 0], sizes = [3, 128], strides = [1, 1]} : vector<36x128xf32> to vector<3x128xf32>
    %15 = vector.extract_strided_slice %13 {offsets = [18, 0], sizes = [3, 128], strides = [1, 1]} : vector<36x128xf32> to vector<3x128xf32>
    %16 = vector.extract_strided_slice %13 {offsets = [3, 0], sizes = [3, 128], strides = [1, 1]} : vector<36x128xf32> to vector<3x128xf32>
    %17 = arith.maximumf %14, %16 : vector<3x128xf32>
    %18 = vector.extract_strided_slice %13 {offsets = [21, 0], sizes = [3, 128], strides = [1, 1]} : vector<36x128xf32> to vector<3x128xf32>
    %19 = arith.maximumf %15, %18 : vector<3x128xf32>
    %20 = vector.extract_strided_slice %13 {offsets = [6, 0], sizes = [3, 128], strides = [1, 1]} : vector<36x128xf32> to vector<3x128xf32>
    %21 = arith.maximumf %17, %20 : vector<3x128xf32>
    %22 = vector.extract_strided_slice %13 {offsets = [24, 0], sizes = [3, 128], strides = [1, 1]} : vector<36x128xf32> to vector<3x128xf32>
    %23 = arith.maximumf %19, %22 : vector<3x128xf32>
    %24 = vector.extract_strided_slice %13 {offsets = [9, 0], sizes = [3, 128], strides = [1, 1]} : vector<36x128xf32> to vector<3x128xf32>
    %25 = arith.maximumf %21, %24 : vector<3x128xf32>
    %26 = vector.extract_strided_slice %13 {offsets = [27, 0], sizes = [3, 128], strides = [1, 1]} : vector<36x128xf32> to vector<3x128xf32>
    %27 = arith.maximumf %23, %26 : vector<3x128xf32>
    %28 = vector.extract_strided_slice %13 {offsets = [12, 0], sizes = [3, 128], strides = [1, 1]} : vector<36x128xf32> to vector<3x128xf32>
    %29 = arith.maximumf %25, %28 : vector<3x128xf32>
    %30 = vector.extract_strided_slice %13 {offsets = [30, 0], sizes = [3, 128], strides = [1, 1]} : vector<36x128xf32> to vector<3x128xf32>
    %31 = arith.maximumf %27, %30 : vector<3x128xf32>
    %32 = vector.extract_strided_slice %13 {offsets = [15, 0], sizes = [3, 128], strides = [1, 1]} : vector<36x128xf32> to vector<3x128xf32>
    %33 = arith.maximumf %29, %32 : vector<3x128xf32>
    %34 = vector.extract_strided_slice %13 {offsets = [33, 0], sizes = [3, 128], strides = [1, 1]} : vector<36x128xf32> to vector<3x128xf32>
    %35 = arith.maximumf %31, %34 : vector<3x128xf32>
    %36 = tpu.concatenate %33, %35 in 1 : vector<3x128xf32>, vector<3x128xf32> -> vector<3x256xf32>
    %37 = arith.truncf %36 : vector<3x256xf32> to vector<3x256xbf16>
    %c0_11 = arith.constant 0 : index
    %c0_12 = arith.constant 0 : index
    %38 = vector.load %arg6[%c0_11, %c0_12] : memref<256x128xbf16, #tpu.memory_space<vmem>>, vector<256x128xbf16>
    %cst_13 = arith.constant dense<0.000000e+00> : vector<3x128xf32>
    %39 = tpu.matmul %37, %38, %cst_13 {dimension_numbers = #tpu.dot_dimension_numbers<[1], [0], [0], [1], [0, 0, 1, 1], [], []>} : vector<3x256xbf16>, vector<256x128xbf16>, vector<3x128xf32> -> vector<3x128xf32>
    %c0_14 = arith.constant 0 : index
    %c0_15 = arith.constant 0 : index
    %40 = vector.load %arg7[%c0_14, %c0_15] : memref<1x128xf32, #tpu.memory_space<vmem>>, vector<1x128xf32>
    %41 = vector.broadcast %40 : vector<1x128xf32> to vector<3x128xf32>
    %42 = arith.addf %39, %41 : vector<3x128xf32>
    %cst_16 = arith.constant 0.000000e+00 : f32
    %43 = vector.broadcast %cst_16 : f32 to vector<3x128xf32>
    %44 = arith.maximumf %42, %43 : vector<3x128xf32>
    %45 = arith.truncf %44 : vector<3x128xf32> to vector<3x128xbf16>
    %c0_17 = arith.constant 0 : index
    %c0_18 = arith.constant 0 : index
    %46 = vector.load %arg8[%c0_17, %c0_18] : memref<128x128xbf16, #tpu.memory_space<vmem>>, vector<128x128xbf16>
    %cst_19 = arith.constant dense<0.000000e+00> : vector<3x128xf32>
    %47 = tpu.matmul %45, %46, %cst_19 {dimension_numbers = #tpu.dot_dimension_numbers<[1], [0], [0], [1], [0, 0, 1, 1], [], []>} : vector<3x128xbf16>, vector<128x128xbf16>, vector<3x128xf32> -> vector<3x128xf32>
    %c0_20 = arith.constant 0 : index
    %c0_21 = arith.constant 0 : index
    %48 = vector.load %arg9[%c0_20, %c0_21] : memref<1x128xf32, #tpu.memory_space<vmem>>, vector<1x128xf32>
    %49 = vector.broadcast %48 : vector<1x128xf32> to vector<3x128xf32>
    %50 = arith.addf %47, %49 : vector<3x128xf32>
    %51 = vector.shape_cast %50 : vector<3x128xf32> to vector<1x3x128xf32>
    %c0_22 = arith.constant 0 : index
    %c0_23 = arith.constant 0 : index
    %c0_24 = arith.constant 0 : index
    %52 = vector.load %arg10[%c0_22, %c0_23, %c0_24] : memref<1x3x128xf32, #tpu.memory_space<vmem>>, vector<1x3x128xf32>
    tpu.vector_store %arg10[%c0_22, %c0_23, %c0_24], %51 {strides = array<i32>} : memref<1x3x128xf32, #tpu.memory_space<vmem>>, vector<1x3x128xf32>,
    return
  }
  func.func @transform_0(%arg0: i32) -> (i32, i32, i32) {
    %c0_i32 = arith.constant 0 : i32
    %c0_i32_0 = arith.constant 0 : i32
    %c0_i32_1 = arith.constant 0 : i32
    return %arg0, %c0_i32, %c0_i32_0 : i32, i32, i32
  }
  func.func @transform_1(%arg0: i32) -> (i32, i32) {
    %c0_i32 = arith.constant 0 : i32
    %c0_i32_0 = arith.constant 0 : i32
    %c0_i32_1 = arith.constant 0 : i32
    return %c0_i32, %c0_i32_0 : i32, i32
  }
  func.func @transform_2(%arg0: i32) -> (i32, i32) {
    %c0_i32 = arith.constant 0 : i32
    %c0_i32_0 = arith.constant 0 : i32
    %c0_i32_1 = arith.constant 0 : i32
    return %c0_i32, %c0_i32_0 : i32, i32
  }
  func.func @transform_3(%arg0: i32) -> (i32, i32) {
    %c0_i32 = arith.constant 0 : i32
    %c0_i32_0 = arith.constant 0 : i32
    %c0_i32_1 = arith.constant 0 : i32
    return %c0_i32, %c0_i32_0 : i32, i32
  }
  func.func @transform_4(%arg0: i32) -> (i32, i32) {
    %c0_i32 = arith.constant 0 : i32
    %c0_i32_0 = arith.constant 0 : i32
    %c0_i32_1 = arith.constant 0 : i32
    return %c0_i32, %c0_i32_0 : i32, i32
  }
  func.func @transform_5(%arg0: i32) -> (i32, i32) {
    %c0_i32 = arith.constant 0 : i32
    %c0_i32_0 = arith.constant 0 : i32
    %c0_i32_1 = arith.constant 0 : i32
    return %c0_i32, %c0_i32_0 : i32, i32
  }
  func.func @transform_6(%arg0: i32) -> (i32, i32) {
    %c0_i32 = arith.constant 0 : i32
    %c0_i32_0 = arith.constant 0 : i32
    %c0_i32_1 = arith.constant 0 : i32
    return %c0_i32, %c0_i32_0 : i32, i32
  }
  func.func @transform_7(%arg0: i32) -> (i32, i32) {
    %c0_i32 = arith.constant 0 : i32
    %c0_i32_0 = arith.constant 0 : i32
    %c0_i32_1 = arith.constant 0 : i32
    return %c0_i32, %c0_i32_0 : i32, i32
  }
  func.func @transform_8(%arg0: i32) -> (i32, i32) {
    %c0_i32 = arith.constant 0 : i32
    %c0_i32_0 = arith.constant 0 : i32
    %c0_i32_1 = arith.constant 0 : i32
    return %c0_i32, %c0_i32_0 : i32, i32
  }
  func.func @transform_9(%arg0: i32) -> (i32, i32, i32) {
    %c0_i32 = arith.constant 0 : i32
    %c0_i32_0 = arith.constant 0 : i32
    %c0_i32_1 = arith.constant 0 : i32
    return %arg0, %c0_i32, %c0_i32_0 : i32, i32, i32
  }
}

</mosaic_0001>

<bundles_post_ra>
// kernel: tpu_custom_call.1
= control target key start
LH: loop header
LB: loop body
LE: loop exit
PB: predicated region body
PF: predicated region fallthrough
CT: control target
= control target key end

     0   :  { %14 = vsyncpa [#allocation3], 0  ;;  %s4411_s0 = inlined_call_operand.vmem [shape: f32[2,36,4], index: 0, kind: input, shape index: {}]   ;;  %s4412_s1 = inlined_call_operand.vmem [shape: bf16[4,2048], index: 1, kind: input, shape index: {}]   ;;  %s4413_s2 = inlined_call_operand.vmem [shape: f32[1,2048], index: 2, kind: input, shape index: {}]   ;;  %s4414_s3 = inlined_call_operand.hbm [shape: bf16[2048,128], index: 3, kind: input, shape index: {}]   ;;  %s4415_s4 = inlined_call_operand.vmem [shape: f32[1,128], index: 4, kind: input, shape index: {}]   ;;  %s4416_s5 = inlined_call_operand.hbm [shape: bf16[256,128], index: 5, kind: input, shape index: {}]   ;;  %s4417_s6 = inlined_call_operand.vmem [shape: f32[1,128], index: 6, kind: input, shape index: {}]   ;;  %s4418_s7 = inlined_call_operand.vmem [shape: bf16[128,128], index: 7, kind: input, shape index: {}]   ;;  %s4419_s8 = inlined_call_operand.vmem [shape: f32[1,128], index: 8, kind: input, shape index: {}]   ;;  %s4420_s9 = inlined_call_operand.vmem [shape: f32[2,3,128], index: 9, kind: output, shape index: {}]  }
   0x1   :  { %15 = vsyncpa [#allocation5], 0  ;;  %s3861_s30 = smov 0  }
   0x2 LB: > { %s3867_s10 = sadd.s32 4294967295, %s3801_s30   ;;  %p3018_p0 = scmp.ge.s32.totalorder %s3801_s30, 1  ;;  %s3801_s30 = sphi %s3861_s30, %s21_s30  }
   0x3   : > { %p246_p1 = scmp.lt.s32.totalorder %s3801_s30, 3  ;;  %s3803_s11 = smov [#allocation2]  }
   0x4   : > { %s264_s12 = sshll.u32 %s3803_s11, 4  ;;  %p4421_p3 = scmp.eq.s32.totalorder %s3867_s10, 0  ;;  %s265_s12 = int_to_ptr.vmem [resolvable:$true] %s264_s12 }
   0x5   : > { %p3871_p2 = pnand %p3018_p0, %p246_p1  ;;  %s3804_s14 = smov [#allocation4]  }
   0x6   : > { %s280_s15 = sshll.u32 %s3804_s14, 4  ;;  %s3731_s19 = scalar_lea.hbm %s4414_s3, 16384  ;;  %s3884_s15 = int_to_ptr.vmem [resolvable:$true] %s280_s15 }
   0x7   : > { %s4423_s13 = scalar_select %p3871_p2, 1, 0 }
   0x8   : > { %p3548_p4 = pneg %p3871_p2  ;;  %p3732_p6 = scmp.ne.s32.totalorder %s4414_s3, %s3731_s19 }
   0x9   : > { %p3738_p10 = scmp.lt.u32.totalorder %s3731_s19, %s4414_s3 }
   0xa   : > { %p3880_p5 = pnand %p4421_p3, %p3548_p4 }
   0xc   : > { %p3733_p7 = pneg %p3880_p5 }
   0xe   : > { %p3734_p8 = pnand %p3733_p7, %p3732_p6 }
  0x10   : > { %p3735_p9 = pneg %p3734_p8 }
  0x12   : > { %p3740_p11 = pnand %p3738_p10, %p3735_p9 }
  0x14   : > { %3743 = shalt.err (!%p3740_p11)
}
  0x15   : > { %s3744_s24 = scalar_lea.vmem %s265_s12, 16384  ;;  %p3752_p1 = scmp.lt.s32.totalorder %s265_s12, %s265_s12 }
  0x16   : > { %p3745_p12 = scmp.ne.s32.totalorder %s265_s12, %s3744_s24  ;;  %p3753_p4 = scmp.lt.s32.totalorder %s3744_s24, %s3744_s24 }
  0x18   : > { %p3747_p13 = pnand %p3745_p12, %p3733_p7  ;;  %p3754_p3 = por %p3753_p4, %p3752_p1 }
  0x1a   : > { %p3748_p0 = pneg %p3747_p13 }
  0x1c   : > { %p3755_p2 = pnand %p3754_p3, %p3748_p0 }
  0x1e   : > { %3758 = shalt.err (!%p3755_p2)
}
  0x1f   : > { %s3805_s25 = smov 64   ;;  %s3806_s26 = smov 4  }
  0x20   : > { %3551 = dma.hbm_to_vmem [thread:$0]  (!%p3880_p5), %s4414_s3, 16384, %s265_s12, [#allocation3], %s3805_s25, %s3805_s25, %s3806_s26  }
  0x21   : > { %s3759_s14 = scalar_lea.hbm %s4416_s5, 2048 }
  0x22   : > { %p3760_p6 = scmp.ne.s32.totalorder %s4416_s5, %s3759_s14  ;;  %p3766_p8 = scmp.lt.u32.totalorder %s3759_s14, %s4416_s5 }
  0x24   : > { %p3762_p2 = pnand %p3760_p6, %p3733_p7 }
  0x26   : > { %p3763_p3 = pneg %p3762_p2 }
  0x28   : > { %p3768_p9 = pnand %p3766_p8, %p3763_p3 }
  0x2a   : > { %3771 = shalt.err (!%p3768_p9)
}
  0x2b   : > { %s3772_s12 = scalar_lea.vmem %s3884_s15, 2048  ;;  %p3780_p13 = scmp.lt.s32.totalorder %s3884_s15, %s3884_s15 }
  0x2c   : > { %p3773_p10 = scmp.ne.s32.totalorder %s3884_s15, %s3772_s12  ;;  %p3781_p0 = scmp.lt.s32.totalorder %s3772_s12, %s3772_s12 }
  0x2e   : > { %p3775_p11 = pnand %p3773_p10, %p3733_p7  ;;  %p3782_p1 = por %p3781_p0, %p3780_p13 }
  0x30   : > { %p3776_p12 = pneg %p3775_p11 }
  0x32   : > { %p3783_p4 = pnand %p3782_p1, %p3776_p12 }
  0x34   : > { %3786 = shalt.err (!%p3783_p4)
}
  0x35   : > { %3554 = dma.hbm_to_vmem [thread:$0]  (!%p3880_p5), %s4416_s5, 2048, %s3884_s15, [#allocation5], %s3805_s25, %s3805_s25, %s3806_s26  }
  0x36   : > { %p4425_p6 = scmp.ne.s32.totalorder %s4423_s13, 0 }
  0x37   : > { %p4426_p2 = scmp.eq.s32.totalorder (!%p4425_p6), %s3867_s10, 0 }
  0x38   : > { %313 = sbr.rel (%p4425_p6) target bundleno = 1081 (0x439), region = 56 }
  0x3f   : > { %3792 = dma.done.wait (%p4426_p2), [#allocation3], 16384   ;;  %p4427_p7 = pmov %p4426_p2 }
  0x40   : > { %p4428_p3 = pmov %p4426_p2 }
  0x41   : > { %3794 = vsyncadd (%p4427_p7), [#allocation3], 4294950912 }
  0x42   : > { %3796 = dma.done.wait (%p4428_p3), [#allocation5], 2048   ;;  %p4429_p8 = pmov %p4426_p2 }
  0x43   : > { %v378_v0 = vlaneseq  ;;  %v3807_v1 = vmov 1983009808   ;;  %v3808_v3 = vmov 0   ;;  %p352_p5 = scmp.lt.s32.totalorder %s3867_s10, 1  ;;  %v370_v7 = vld [vmem:[%s4412_s1] sm:$0xff]  ;;  %vm540_vm0 = vcmask 1041408  }
  0x44   : > { %3798 = vsyncadd (%p4429_p8), [#allocation5], 4294965248  ;;  %v464_v2 = vunpack.c.l.s4 %v3807_v1  ;;  %621 = vmatprep.mubr.bf16.mxu0 %v3808_v3  ;;  %682 = vmatprep.mubr.bf16.mxu1 %v3808_v3  ;;  %v371_v8 = vld [vmem:[%s4412_s1 + $0x8] sm:$0xff]  ;;  %v372_v9 = vld [vmem:[%s4412_s1 + $0x10] sm:$0xff]  ;;  %v462_v11 = vcombine.high %v370_v7, %v370_v7  ;;  %vm530_vm1 = vcmask 31744   ;;  %vm2638_vm2 = vcmask 1040384  }
  0x45   : > { %v3946_v4 = vshrl.u32 %v378_v0, 7  ;;  %s4431_s10 = smov (!%p352_p5, %s3867_s10), 1  ;;  %v479_v13 = vcombine.high %v371_v8, %v371_v8  ;;  %v496_v17 = vcombine.high %v372_v9, %v372_v9  ;;  %v373_v36 = vld [vmem:[%s4412_s1 + $0x18] sm:$0xff]  ;;  %v3579_v47 = vld [vmem:[#allocation2 + $0x40] sm:$0xff]   ;;  %v3583_v50 = vld [vmem:[#allocation2 + $0x48] sm:$0xff]   ;;  %vm2632_vm3 = vcmask 1043456  }
  0x46   : > { %v465_v5 = vunpack.c.0.s8 %v464_v2  ;;  %s3539_s13 = smul.u32 40, %s4431_s10  ;;  %v513_v38 = vcombine.high %v373_v36, %v373_v36  ;;  %v3581_v48 = vld [vmem:[#allocation2 + $0xc0] sm:$0xff]   ;;  %v3585_v52 = vld [vmem:[#allocation2 + $0xc8] sm:$0xff]   ;;  %v3587_v54 = vld [vmem:[#allocation2 + $0x50] sm:$0xff]   ;;  %vm3810_vm4 = vmmov 0   ;;  %s3026_s21 = sshll.u32 %s4431_s10, 2 }
  0x47   : > { %v3580_v49 = vld [vmem:[#allocation2] sm:$0xff]   ;;  %v3584_v53 = vld [vmem:[#allocation2 + $0x8] sm:$0xff]   ;;  %v3589_v56 = vld [vmem:[#allocation2 + $0xd0] sm:$0xff]   ;;  %s360_s23 = scalar_lea.vmem %s4420_s9, %s3026_s21 }
  0x48   : > { %v468_v6 = vsub.s32 %v465_v5, %v3946_v4  ;;  %s3959_s25 = scalar_lea.vmem %s4411_s0, %s3539_s13  ;;  %v3582_v51 = vld [vmem:[#allocation2 + $0x80] sm:$0xff]   ;;  %v3586_v55 = vld [vmem:[#allocation2 + $0x88] sm:$0xff]   ;;  %v3588_v57 = vld [vmem:[#allocation2 + $0x10] sm:$0xff]  }
  0x49   : > { %v362_v14 = vld [vmem:[%s3959_s25] sm:$0xff]  ;;  %v363_v15 = vld [vmem:[%s3959_s25 + $0x8] sm:$0xff]  ;;  %v364_v30 = vld [vmem:[%s3959_s25 + $0x10] sm:$0xff] }
  0x4a   : > { %v469_v10 = vrot.slane %v370_v7, %v468_v6  ;;  %v486_v12 = vrot.slane %v371_v8, %v468_v6  ;;  %v503_v16 = vrot.slane %v372_v9, %v468_v6  ;;  %v476_v20 = vrot.slane %v462_v11, %v468_v6  ;;  %v365_v33 = vld [vmem:[%s3959_s25 + $0x18] sm:$0xff]  ;;  %v366_v35 = vld [vmem:[%s3959_s25 + $0x20] sm:$0xf]  ;;  %v3590_v59 = vld [vmem:[#allocation2 + $0x90] sm:$0xff]  }
  0x4b   : > { %v493_v22 = vrot.slane %v479_v13, %v468_v6  ;;  %v3972_v25 = vpack.c.bf16 %v363_v15, %v362_v14  ;;  %v510_v27 = vrot.slane %v496_v17, %v468_v6  ;;  %v3988_v34 = vpack.c.bf16 %v365_v33, %v364_v30  ;;  %v3591_v58 = vld [vmem:[#allocation2 + $0x58] sm:$0xff]   ;;  %v3595_v63 = vld [vmem:[#allocation2 + $0x60] sm:$0xff]   ;;  %v3599_v5 = vld [vmem:[#allocation2 + $0x68] sm:$0xff]  }
  0x4c   : > { %v477_v18 = vcombine.high %v469_v10, %v469_v10  ;;  %v542_v19 = vsel %vm540_vm0, %v469_v10, 0  ;;  %v494_v21 = vcombine.high %v486_v12, %v486_v12  ;;  %v478_v23 = vcombine.high %v476_v20, %v476_v20  ;;  %v3593_v60 = vld [vmem:[#allocation2 + $0xd8] sm:$0xff]   ;;  %v3596_v0 = vld [vmem:[#allocation2 + $0x20] sm:$0xff]   ;;  %v3601_v7 = vld [vmem:[#allocation2 + $0xe8] sm:$0xff]  }
  0x4d   : > { %v548_v24 = vsel %vm540_vm0, %v476_v20, 0  ;;  %v495_v26 = vcombine.high %v493_v22, %v493_v22  ;;  %v554_v28 = vsel %vm540_vm0, %v486_v12, 0  ;;  %v511_v29 = vcombine.high %v503_v16, %v503_v16  ;;  %v3592_v61 = vld [vmem:[#allocation2 + $0x18] sm:$0xff]   ;;  %v3597_v1 = vld [vmem:[#allocation2 + $0xe0] sm:$0xff]   ;;  %v3602_v8 = vld [vmem:[#allocation2 + $0xa8] sm:$0xff]  }
  0x4e   : > { %3027 = vmatprep.subr.msk.bf16.mxu0 %vm540_vm0, %v477_v18  ;;  %3031 = vmatprep.subr.msk.bf16.mxu1 %vm540_vm0, %v478_v23  ;;  %v560_v31 = vsel %vm540_vm0, %v493_v22, 0  ;;  %v512_v32 = vcombine.high %v510_v27, %v510_v27  ;;  %v4001_v37 = vpack.c.bf16 %v366_v35, %v366_v35  ;;  %v520_v39 = vrot.slane %v373_v36, %v468_v6  ;;  %v3594_v62 = vld [vmem:[#allocation2 + $0x98] sm:$0xff]   ;;  %v3598_v2 = vld [vmem:[#allocation2 + $0xa0] sm:$0xff]   ;;  %v3605_v9 = vld [vmem:[#allocation2 + $0xf0] sm:$0xff]  }
  0x4f   : > { %590 = vmatpush1.bf16.msra.mxu0 %v542_v19  ;;  %651 = vmatpush1.bf16.msra.mxu1 %v548_v24  ;;  %v527_v40 = vrot.slane %v513_v38, %v468_v6  ;;  %v566_v41 = vsel %vm540_vm0, %v503_v16, 0  ;;  %v572_v42 = vsel %vm540_vm0, %v510_v27, 0  ;;  %v3600_v6 = vld [vmem:[#allocation2 + $0x28] sm:$0xff]   ;;  %v3604_v10 = vld [vmem:[#allocation2 + $0x30] sm:$0xff]   ;;  %v3607_v11 = vld [vmem:[#allocation2 + $0x78] sm:$0xff]   ;;  %v380_v18 = vsub.s32 0, %v3946_v4 }
  0x50   : > { %3035 = vmatprep.subr.msk.bf16.mxu0 %vm540_vm0, %v494_v21  ;;  %3039 = vmatprep.subr.msk.bf16.mxu1 %vm540_vm0, %v495_v26  ;;  %v578_v43 = vsel %vm540_vm0, %v520_v39, 0  ;;  %v528_v45 = vcombine.high %v520_v39, %v520_v39  ;;  %v3606_v12 = vld [vmem:[#allocation2 + $0xb0] sm:$0xff]   ;;  %v3609_v13 = vld [vmem:[#allocation2 + $0xf8] sm:$0xff]   ;;  %v3611_v15 = vld [vmem:[#allocation2 + $0x140] sm:$0xff]   ;;  %v384_v20 = vsub.s32 1, %v3946_v4  ;;  %v388_v21 = vsub.s32 2, %v3946_v4 }
  0x51   : > { %v584_v44 = vsel %vm540_vm0, %v527_v40, 0  ;;  %v529_v46 = vcombine.high %v527_v40, %v527_v40  ;;  %v3608_v14 = vld [vmem:[#allocation2 + $0x38] sm:$0xff]   ;;  %v3613_v17 = vld [vmem:[#allocation2 + $0x1c0] sm:$0xff]   ;;  %v392_v22 = vsub.s32 3, %v3946_v4 }
  0x52   : > { %3028 = vmatmul.mubr.msk.bf16.vlgmr.msra.gmra.mrb[0].mxu0 %vm530_vm1, %v3972_v25  ;;  %3032 = vmatmul.mubr.msk.bf16.vlgmr.msra.gmra.mrb[0].mxu1 %vm530_vm1, %v3972_v25  ;;  %v3610_v16 = vld [vmem:[#allocation2 + $0xb8] sm:$0xff]   ;;  %v4071_v19 = vld [vmem:[%s4413_s2] sm:$0xff] }
  0x53   : > { %631 = vmatprep.mubr.bf16.mxu0 %v3808_v3  ;;  %712 = vmatpush1.bf16.msra.mxu0 %v554_v28  ;;  %v4079_v23 = vrot.slane %v4071_v19, %v380_v18  ;;  %v4089_v27 = vrot.slane %v4071_v19, %v388_v21  ;;  %v4094_v30 = vrot.slane %v4071_v19, %v392_v22 }
  0x54   : > { %3043 = vmatprep.subr.msk.bf16.mxu0 %vm540_vm0, %v511_v29  ;;  %692 = vmatprep.mubr.bf16.mxu1 %v3808_v3 }
  0x55   : > { %773 = vmatpush1.bf16.msra.mxu1 %v560_v31 }
  0x56   : > { %3047 = vmatprep.subr.msk.bf16.mxu1 %vm540_vm0, %v512_v32 }
  0x5a   : > { %3029 = vmatmul.mubr.msk.bf16.gmra.mrb[4].mxu0 %vm530_vm1, %v3988_v34  ;;  %3033 = vmatmul.mubr.msk.bf16.gmra.mrb[4].mxu1 %vm530_vm1, %v3988_v34 }
  0x5b   : > { %641 = vmatprep.mubr.bf16.mxu0 %v3808_v3  ;;  %702 = vmatprep.mubr.bf16.mxu1 %v3808_v3 }
  0x62   : > { %3030 = vmatmul.mubr.msk.bf16.gmra.mrb[8].mxu0 %vm530_vm1, %v4001_v37  ;;  %3034 = vmatmul.mubr.msk.bf16.gmra.mrb[8].mxu1 %vm530_vm1, %v4001_v37 }
  0x63   : > { %743 = vmatprep.mubr.bf16.mxu0 %v3808_v3  ;;  %804 = vmatprep.mubr.bf16.mxu1 %v3808_v3 }
  0x6a   : > { %3036 = vmatmul.mubr.msk.bf16.vlgmr.msra.gmra.mrb[12].mxu0 %vm530_vm1, %v3972_v25  ;;  %3040 = vmatmul.mubr.msk.bf16.vlgmr.msra.gmra.mrb[12].mxu1 %vm530_vm1, %v3972_v25 }
  0x6b   : > { %753 = vmatprep.mubr.bf16.mxu0 %v3808_v3  ;;  %834 = vmatpush1.bf16.msra.mxu0 %v566_v41 }
  0x6c   : > { %3051 = vmatprep.subr.msk.bf16.mxu0 %vm540_vm0, %v528_v45  ;;  %814 = vmatprep.mubr.bf16.mxu1 %v3808_v3  ;;  %v3612_v45 = vld [vmem:[#allocation2 + $0x100] sm:$0xff]  }
  0x6d   : > { %895 = vmatpush1.bf16.msra.mxu1 %v572_v42 }
  0x6e   : > { %3055 = vmatprep.subr.msk.bf16.mxu1 %vm540_vm0, %v529_v46 }
  0x72   : > { %3037 = vmatmul.mubr.msk.bf16.gmra.mrb[16].mxu0 %vm530_vm1, %v3988_v34  ;;  %3041 = vmatmul.mubr.msk.bf16.gmra.mrb[16].mxu1 %vm530_vm1, %v3988_v34 }
  0x73   : > { %763 = vmatprep.mubr.bf16.mxu0 %v3808_v3  ;;  %824 = vmatprep.mubr.bf16.mxu1 %v3808_v3 }
  0x7a   : > { %3038 = vmatmul.mubr.msk.bf16.gmra.mrb[20].mxu0 %vm530_vm1, %v4001_v37  ;;  %3042 = vmatmul.mubr.msk.bf16.gmra.mrb[20].mxu1 %vm530_vm1, %v4001_v37 }
  0x7b   : > { %865 = vmatprep.mubr.bf16.mxu0 %v3808_v3  ;;  %926 = vmatprep.mubr.bf16.mxu1 %v3808_v3 }
  0x82   : > { %3044 = vmatmul.mubr.msk.bf16.vlgmr.msra.gmra.mrb[24].mxu0 %vm530_vm1, %v3972_v25  ;;  %3048 = vmatmul.mubr.msk.bf16.vlgmr.msra.gmra.mrb[24].mxu1 %vm530_vm1, %v3972_v25 }
  0x83   : > { %875 = vmatprep.mubr.bf16.mxu0 %v3808_v3  ;;  %956 = vmatpush1.bf16.msra.mxu0 %v578_v43 }
  0x84   : > { %3216 = vmatprep.subr.bf16.mxu0 %v3579_v47  ;;  %936 = vmatprep.mubr.bf16.mxu1 %v3808_v3  ;;  %v3615_v47 = vld [vmem:[#allocation2 + $0x148] sm:$0xff]  }
  0x85   : > { %1017 = vmatpush1.bf16.msra.mxu1 %v584_v44 }
  0x86   : > { %3250 = vmatprep.subr.bf16.mxu1 %v3581_v48 }
  0x8a   : > { %3045 = vmatmul.mubr.msk.bf16.gmra.mrb[28].mxu0 %vm530_vm1, %v3988_v34  ;;  %3049 = vmatmul.mubr.msk.bf16.gmra.mrb[28].mxu1 %vm530_vm1, %v3988_v34 }
  0x8b   : > { %885 = vmatprep.mubr.bf16.mxu0 %v3808_v3  ;;  %946 = vmatprep.mubr.bf16.mxu1 %v3808_v3 }
  0x92   : > { %3046 = vmatmul.mubr.msk.bf16.gmra.mrb[32].mxu0 %vm530_vm1, %v4001_v37  ;;  %3050 = vmatmul.mubr.msk.bf16.gmra.mrb[32].mxu1 %vm530_vm1, %v4001_v37 }
  0x93   : > { %987 = vmatprep.mubr.bf16.mxu0 %v3808_v3  ;;  %1048 = vmatprep.mubr.bf16.mxu1 %v3808_v3 }
  0x9a   : > { %3052 = vmatmul.mubr.msk.bf16.vlgmr.msra.gmra.mrb[36].mxu0 %vm530_vm1, %v3972_v25  ;;  %3056 = vmatmul.mubr.msk.bf16.vlgmr.msra.gmra.mrb[36].mxu1 %vm530_vm1, %v3972_v25  ;;  %v4084_v25 = vrot.slane %v4071_v19, %v384_v20 }
  0x9b   : > { %997 = vmatprep.mubr.bf16.mxu0 %v3808_v3  ;;  %3217 = vmatpush3.bf16.msra.mxu0 %v3580_v49 }
  0x9c   : > { %3218 = vmatprep.subr.bf16.mxu0 %v3583_v50  ;;  %1058 = vmatprep.mubr.bf16.mxu1 %v3808_v3  ;;  %v3614_v50 = vld [vmem:[#allocation2 + $0x180] sm:$0xff]  }
  0x9d   : > { %3251 = vmatpush3.bf16.msra.mxu1 %v3582_v51 }
  0x9e   : > { %3252 = vmatprep.subr.bf16.mxu1 %v3585_v52 }
  0x9f   : > { %3219 = vmatpush3.bf16.msra.mxu0 %v3584_v53  ;;  %v3617_v53 = vld [vmem:[#allocation2 + $0x1c8] sm:$0xff]  }
  0xa0   : > { %3220 = vmatprep.subr.bf16.mxu0 %v3587_v54 }
  0xa1   : > { %3253 = vmatpush3.bf16.msra.mxu1 %v3586_v55 }
  0xa2   : > { %3053 = vmatmul.mubr.msk.bf16.gmra.mrb[40].mxu0 %vm530_vm1, %v3988_v34  ;;  %3254 = vmatprep.subr.bf16.mxu1 %v3589_v56 }
  0xa3   : > { %1007 = vmatprep.mubr.bf16.mxu0 %v3808_v3  ;;  %3221 = vmatpush3.bf16.msra.mxu0 %v3588_v57  ;;  %v3616_v57 = vld [vmem:[#allocation2 + $0x108] sm:$0xff]  }
  0xa4   : > { %3057 = vmatmul.mubr.msk.bf16.gmra.mrb[40].mxu1 %vm530_vm1, %v3988_v34  ;;  %3222 = vmatprep.subr.bf16.mxu0 %v3591_v58 }
  0xa5   : > { %1068 = vmatprep.mubr.bf16.mxu1 %v3808_v3  ;;  %3255 = vmatpush3.bf16.msra.mxu1 %v3590_v59  ;;  %v3603_v3 = vld [vmem:[#allocation2 + $0x70] sm:$0xff]  }
  0xa6   : > { %3256 = vmatprep.subr.bf16.mxu1 %v3593_v60 }
  0xa7   : > { %3223 = vmatpush3.bf16.msra.mxu0 %v3592_v61 }
  0xa8   : > { %3224 = vmatprep.subr.bf16.mxu0 %v3595_v63 }
  0xa9   : > { %3257 = vmatpush3.bf16.msra.mxu1 %v3594_v62  ;;  %v3619_v62 = vld [vmem:[#allocation2 + $0x150] sm:$0xff]  }
  0xaa   : > { %3054 = vmatmul.mubr.msk.bf16.gmra.mrb[44].mxu0 %vm530_vm1, %v4001_v37  ;;  %3258 = vmatprep.subr.bf16.mxu1 %v3597_v1 }
  0xab   : > { %3225 = vmatpush3.bf16.msra.mxu0 %v3596_v0 }
  0xac   : > { %3058 = vmatmul.mubr.msk.bf16.gmra.mrb[44].mxu1 %vm530_vm1, %v4001_v37  ;;  %3226 = vmatprep.subr.bf16.mxu0 %v3599_v5 }
  0xad   : > { %3259 = vmatpush3.bf16.msra.mxu1 %v3598_v2  ;;  %v3618_v2 = vld [vmem:[#allocation2 + $0x188] sm:$0xff]  }
  0xae   : > { %3260 = vmatprep.subr.bf16.mxu1 %v3601_v7 }
  0xaf   : > { %3227 = vmatpush3.bf16.msra.mxu0 %v3600_v6 }
  0xb0   : > { %3228 = vmatprep.subr.bf16.mxu0 %v3603_v3 }
  0xb1   : > { %3261 = vmatpush3.bf16.msra.mxu1 %v3602_v8  ;;  %v3621_v8 = vld [vmem:[#allocation2 + $0x1d0] sm:$0xff]  }
  0xb2   : > { %3262 = vmatprep.subr.bf16.mxu1 %v3605_v9 }
  0xb3   : > { %3229 = vmatpush3.bf16.msra.mxu0 %v3604_v10  ;;  %v3620_v10 = vld [vmem:[#allocation2 + $0x110] sm:$0xff]  }
  0xb4   : > { %3230 = vmatprep.subr.bf16.mxu0 %v3607_v11 }
  0xb5   : > { %3263 = vmatpush3.bf16.msra.mxu1 %v3606_v12  ;;  %v3623_v12 = vld [vmem:[#allocation2 + $0x158] sm:$0xff]  }
  0xb6   : > { %3264 = vmatprep.subr.bf16.mxu1 %v3609_v13 }
  0xb7   : > { %3231 = vmatpush3.bf16.msra.mxu0 %v3608_v14 }
  0xb8   : > { %3284 = vmatprep.subr.bf16.mxu0 %v3611_v15  ;;  %v3622_v15 = vld [vmem:[#allocation2 + $0x190] sm:$0xff]  }
  0xb9   : > { %3265 = vmatpush3.bf16.msra.mxu1 %v3610_v16 }
  0xba   : > { %3318 = vmatprep.subr.bf16.mxu1 %v3613_v17 }
 0x125   : > { %v623_v24 = vpop.f32.mrb[0].mxu0  ;;  %v684_v29 = vpop.f32.mrb[0].mxu1 }
 0x126   : > { %v625_v26 = vpop.f32.mrb[1].mxu0  ;;  %v624_v31 = vadd.f32 %v623_v24, %v4079_v23  ;;  %v686_v34 = vpop.f32.mrb[1].mxu1  ;;  %v685_v39 = vadd.f32 %v684_v29, %v4089_v27  ;;  %v3625_v24 = vld [vmem:[#allocation2 + $0x1d8] sm:$0xff]  }
 0x127   : > { %v627_v28 = vpop.f32.mrb[2].mxu0  ;;  %v626_v35 = vadd.f32 %v625_v26, %v4084_v25  ;;  %v688_v37 = vpop.f32.mrb[2].mxu1  ;;  %v687_v43 = vadd.f32 %v686_v34, %v4094_v30  ;;  %v396_v26 = vsub.s32 4, %v3946_v4 }
 0x128   : > { %v628_v32 = vadd.f32 %v627_v28, %v4079_v23  ;;  %v629_v33 = vpop.f32.mrb[3].mxu0  ;;  %v689_v40 = vadd.f32 %v688_v37, %v4089_v27  ;;  %v690_v41 = vpop.f32.mrb[3].mxu1  ;;  %v404_v37 = vsub.s32 6, %v3946_v4 }
 0x129   : > { %v630_v36 = vadd.f32 %v629_v33, %v4084_v25  ;;  %v691_v44 = vadd.f32 %v690_v41, %v4094_v30  ;;  %v400_v33 = vsub.s32 5, %v3946_v4  ;;  %v408_v41 = vsub.s32 7, %v3946_v4 }
 0x12a   : > { %v1077_v38 = vpack.c.bf16 %v628_v32, %v624_v31  ;;  %v1079_v46 = vpack.c.bf16 %v689_v40, %v685_v39  ;;  %v3624_v31 = vld [vmem:[#allocation2 + $0x118] sm:$0xff]  }
 0x12b   : > { %v1078_v42 = vpack.c.bf16 %v630_v36, %v626_v35  ;;  %v1080_v48 = vpack.c.bf16 %v691_v44, %v687_v43  ;;  %v3626_v40 = vld [vmem:[#allocation2 + $0x198] sm:$0xff]   ;;  %v3629_v44 = vld [vmem:[#allocation2 + $0x1e0] sm:$0xff]  }
 0x12d   : > { %2188 = vmatprep.mubr.bf16.mxu0 %v1078_v42  ;;  %v633_v49 = vpop.f32.mrb[4].mxu0  ;;  %2244 = vmatprep.mubr.bf16.mxu1 %v1080_v48  ;;  %v694_v56 = vpop.f32.mrb[4].mxu1  ;;  %v3631_v48 = vld [vmem:[#allocation2 + $0x168] sm:$0xff]  }
 0x12e   : > { %v634_v51 = vadd.f32 %v633_v49, %v4079_v23  ;;  %2189 = vmatmul.mubr.bf16.vlgmr.msra.gmra.mrb[48].mxu0 %v1077_v38  ;;  %v635_v52 = vpop.f32.mrb[5].mxu0  ;;  %v695_v59 = vadd.f32 %v694_v56, %v4089_v27  ;;  %2245 = vmatmul.mubr.bf16.vlgmr.msra.gmra.mrb[48].mxu1 %v1079_v46  ;;  %v696_v61 = vpop.f32.mrb[5].mxu1  ;;  %v3628_v46 = vld [vmem:[#allocation2 + $0x120] sm:$0xff]   ;;  %v4133_v49 = vrot.slane %v4071_v19, %v404_v37  ;;  %v3632_v56 = vld [vmem:[#allocation2 + $0x128] sm:$0xff]  }
 0x12f   : > { %3285 = vmatpush3.bf16.msra.mxu0 %v3612_v45  ;;  %v636_v54 = vadd.f32 %v635_v52, %v4084_v25  ;;  %v637_v55 = vpop.f32.mrb[6].mxu0  ;;  %3319 = vmatpush3.bf16.msra.mxu1 %v3614_v50  ;;  %v697_v0 = vadd.f32 %v696_v61, %v4094_v30  ;;  %v698_v1 = vpop.f32.mrb[6].mxu1  ;;  %v3630_v50 = vld [vmem:[#allocation2 + $0x1a0] sm:$0xff]   ;;  %v4138_v52 = vrot.slane %v4071_v19, %v408_v41 }
 0x130   : > { %v638_v58 = vadd.f32 %v637_v55, %v4079_v23  ;;  %v639_v60 = vpop.f32.mrb[7].mxu0  ;;  %3286 = vmatprep.subr.bf16.mxu0 %v3615_v47  ;;  %v699_v6 = vadd.f32 %v698_v1, %v4089_v27  ;;  %v700_v7 = vpop.f32.mrb[7].mxu1  ;;  %3320 = vmatprep.subr.bf16.mxu1 %v3617_v53  ;;  %v3633_v55 = vld [vmem:[#allocation2 + $0x1e8] sm:$0xff]  }
 0x131   : > { %v640_v63 = vadd.f32 %v639_v60, %v4084_v25  ;;  %v701_v9 = vadd.f32 %v700_v7, %v4094_v30 }
 0x132   : > { %v1093_v5 = vpack.c.bf16 %v638_v58, %v634_v51  ;;  %v1095_v11 = vpack.c.bf16 %v699_v6, %v695_v59 }
 0x133   : > { %v1094_v3 = vpack.c.bf16 %v640_v63, %v636_v54  ;;  %3287 = vmatpush3.bf16.msra.mxu0 %v3616_v57  ;;  %v1096_v13 = vpack.c.bf16 %v701_v9, %v697_v0  ;;  %3321 = vmatpush3.bf16.msra.mxu1 %v3618_v2  ;;  %v3635_v63 = vld [vmem:[#allocation2 + $0x170] sm:$0xff]   ;;  %v3634_v0 = vld [vmem:[#allocation2 + $0x1a8] sm:$0xff]  }
 0x134   : > { %3288 = vmatprep.subr.bf16.mxu0 %v3619_v62  ;;  %3322 = vmatprep.subr.bf16.mxu1 %v3621_v8 }
 0x135   : > { %2196 = vmatprep.mubr.bf16.mxu0 %v1094_v3  ;;  %v643_v14 = vpop.f32.mrb[8].mxu0  ;;  %2252 = vmatprep.mubr.bf16.mxu1 %v1096_v13  ;;  %v704_v29 = vpop.f32.mrb[8].mxu1  ;;  %v3637_v3 = vld [vmem:[#allocation2 + $0x1f0] sm:$0xff]   ;;  %v3639_v13 = vld [vmem:[#allocation2 + $0x178] sm:$0xff]  }
 0x136   : > { %2197 = vmatmul.mubr.bf16.gmra.mrb[52].mxu0 %v1093_v5  ;;  %v644_v16 = vadd.f32 %v643_v14, %v4079_v23  ;;  %v645_v17 = vpop.f32.mrb[9].mxu0  ;;  %2253 = vmatmul.mubr.bf16.gmra.mrb[52].mxu1 %v1095_v11  ;;  %v705_v34 = vadd.f32 %v704_v29, %v4089_v27  ;;  %v706_v35 = vpop.f32.mrb[9].mxu1  ;;  %v3627_v23 = vld [vmem:[#allocation2 + $0x160] sm:$0xff]   ;;  %v4123_v27 = vrot.slane %v4071_v19, %v396_v26  ;;  %v3640_v29 = vld [vmem:[#allocation2 + $0x138] sm:$0xff]  }
 0x137   : > { %3289 = vmatpush3.bf16.msra.mxu0 %v3620_v10  ;;  %v646_v28 = vadd.f32 %v645_v17, %v4084_v25  ;;  %v647_v32 = vpop.f32.mrb[10].mxu0  ;;  %3323 = vmatpush3.bf16.msra.mxu1 %v3622_v15  ;;  %v707_v39 = vadd.f32 %v706_v35, %v4094_v30  ;;  %v708_v25 = vpop.f32.mrb[10].mxu1  ;;  %v4128_v30 = vrot.slane %v4071_v19, %v400_v33  ;;  %v3636_v10 = vld [vmem:[#allocation2 + $0x130] sm:$0xff]   ;;  %v3641_v17 = vld [vmem:[#allocation2 + $0x1f8] sm:$0xff]   ;;  %v3643_v35 = vld [vmem:[#allocation2 + $0x240] sm:$0xff]  }
 0x138   : > { %3290 = vmatprep.subr.bf16.mxu0 %v3623_v12  ;;  %v648_v36 = vpop.f32.mrb[11].mxu0  ;;  %v1109_v42 = vpack.c.bf16 %v644_v16, %v644_v16  ;;  %3324 = vmatprep.subr.bf16.mxu1 %v3625_v24  ;;  %v709_v43 = vpop.f32.mrb[11].mxu1  ;;  %v1111_v47 = vpack.c.bf16 %v705_v34, %v705_v34  ;;  %v3638_v15 = vld [vmem:[#allocation2 + $0x1b0] sm:$0xff]  }
 0x139   : > { %v1110_v38 = vpack.c.bf16 %v646_v28, %v646_v28  ;;  %v1112_v45 = vpack.c.bf16 %v707_v39, %v707_v39 }
 0x13b   : > { %3291 = vmatpush3.bf16.msra.mxu0 %v3624_v31  ;;  %2204 = vmatprep.mubr.bf16.mxu0 %v1110_v38 }
 0x13c   : > { %3292 = vmatprep.subr.bf16.mxu0 %v3627_v23  ;;  %3325 = vmatpush3.bf16.msra.mxu1 %v3626_v40  ;;  %v3642_v40 = vld [vmem:[#allocation2 + $0x1b8] sm:$0xff]  }
 0x13d   : > { %2260 = vmatprep.mubr.bf16.mxu1 %v1112_v45  ;;  %v745_v51 = vpop.f32.mrb[12].mxu0  ;;  %3326 = vmatprep.subr.bf16.mxu1 %v3629_v44  ;;  %v806_v59 = vpop.f32.mrb[12].mxu1  ;;  %v3645_v45 = vld [vmem:[#allocation2 + $0x2c0] sm:$0xff]  }
 0x13e   : > { %2205 = vmatmul.mubr.bf16.gmra.mrb[56].mxu0 %v1109_v42  ;;  %v4141_v53 = vadd.f32 %v745_v51, %v4123_v27  ;;  %v747_v54 = vpop.f32.mrb[13].mxu0  ;;  %2261 = vmatmul.mubr.bf16.gmra.mrb[56].mxu1 %v1111_v47  ;;  %v4148_v19 = vadd.f32 %v806_v59, %v4133_v49  ;;  %v808_v62 = vpop.f32.mrb[13].mxu1 }
 0x13f   : > { %3293 = vmatpush3.bf16.msra.mxu0 %v3628_v46  ;;  %v748_v57 = vadd.f32 %v747_v54, %v4128_v30  ;;  %v749_v58 = vpop.f32.mrb[14].mxu0  ;;  %v809_v2 = vadd.f32 %v808_v62, %v4138_v52  ;;  %v810_v5 = vpop.f32.mrb[14].mxu1  ;;  %v3647_v54 = vld [vmem:[#allocation2 + $0x248] sm:$0xff]  }
 0x140   : > { %3294 = vmatprep.subr.bf16.mxu0 %v3631_v48  ;;  %v4145_v60 = vadd.f32 %v749_v58, %v4123_v27  ;;  %v751_v61 = vpop.f32.mrb[15].mxu0  ;;  %3327 = vmatpush3.bf16.msra.mxu1 %v3630_v50  ;;  %v4155_v7 = vadd.f32 %v810_v5, %v4133_v49  ;;  %v812_v8 = vpop.f32.mrb[15].mxu1  ;;  %v3644_v48 = vld [vmem:[#allocation2 + $0x200] sm:$0xff]   ;;  %v3649_v58 = vld [vmem:[#allocation2 + $0x2c8] sm:$0xff]  }
 0x141   : > { %v752_v1 = vadd.f32 %v751_v61, %v4128_v30  ;;  %3328 = vmatprep.subr.bf16.mxu1 %v3633_v55  ;;  %v813_v11 = vadd.f32 %v812_v8, %v4138_v52  ;;  %v3646_v55 = vld [vmem:[#allocation2 + $0x280] sm:$0xff]   ;;  %v3650_v5 = vld [vmem:[#allocation2 + $0x288] sm:$0xff]  }
 0x142   : > { %v1081_v6 = vpack.c.bf16 %v4145_v60, %v4141_v53  ;;  %v1083_v12 = vpack.c.bf16 %v4155_v7, %v4148_v19  ;;  %v3648_v60 = vld [vmem:[#allocation2 + $0x208] sm:$0xff]  }
 0x143   : > { %3295 = vmatpush3.bf16.msra.mxu0 %v3632_v56  ;;  %v1082_v9 = vpack.c.bf16 %v752_v1, %v748_v57  ;;  %v1084_v14 = vpack.c.bf16 %v813_v11, %v809_v2 }
 0x144   : > { %3296 = vmatprep.subr.bf16.mxu0 %v3635_v63  ;;  %3329 = vmatpush3.bf16.msra.mxu1 %v3634_v0  ;;  %v4178_v63 = vld [vmem:[%s4413_s2 + $0x8] sm:$0xff]  ;;  %v3651_v0 = vld [vmem:[#allocation2 + $0x250] sm:$0xff]  }
 0x145   : > { %2300 = vmatprep.mubr.bf16.mxu0 %v1082_v9  ;;  %v755_v16 = vpop.f32.mrb[16].mxu0  ;;  %3330 = vmatprep.subr.bf16.mxu1 %v3637_v3  ;;  %v816_v34 = vpop.f32.mrb[16].mxu1  ;;  %v4184_v3 = vrot.slane %v4178_v63, %v380_v18  ;;  %v3652_v9 = vld [vmem:[#allocation2 + $0x210] sm:$0xff]   ;;  %v4189_v11 = vrot.slane %v4178_v63, %v384_v20 }
 0x146   : > { %v4161_v24 = vadd.f32 %v755_v16, %v4123_v27  ;;  %v757_v28 = vpop.f32.mrb[17].mxu0  ;;  %2356 = vmatprep.mubr.bf16.mxu1 %v1084_v14  ;;  %v4166_v23 = vadd.f32 %v816_v34, %v4133_v49  ;;  %v818_v39 = vpop.f32.mrb[17].mxu1  ;;  %v3657_v16 = vld [vmem:[#allocation2 + $0x2d8] sm:$0xff]  }
 0x147   : > { %3297 = vmatpush3.bf16.msra.mxu0 %v3636_v10  ;;  %v758_v31 = vadd.f32 %v757_v28, %v4128_v30  ;;  %v759_v32 = vpop.f32.mrb[18].mxu0  ;;  %v819_v42 = vadd.f32 %v818_v39, %v4138_v52  ;;  %v820_v43 = vpop.f32.mrb[18].mxu1 }
 0x148   : > { %3298 = vmatprep.subr.bf16.mxu0 %v3639_v13  ;;  %v760_v36 = vadd.f32 %v759_v32, %v4123_v27  ;;  %v761_v38 = vpop.f32.mrb[19].mxu0  ;;  %3331 = vmatpush3.bf16.msra.mxu1 %v3638_v15  ;;  %v821_v46 = vadd.f32 %v820_v43, %v4133_v49  ;;  %v822_v47 = vpop.f32.mrb[19].mxu1  ;;  %v3654_v13 = vld [vmem:[#allocation2 + $0x290] sm:$0xff]   ;;  %v4199_v15 = vrot.slane %v4178_v63, %v392_v22  ;;  %v3659_v32 = vld [vmem:[#allocation2 + $0x260] sm:$0xff]  }
 0x149   : > { %v762_v25 = vadd.f32 %v761_v38, %v4128_v30  ;;  %3332 = vmatprep.subr.bf16.mxu1 %v3641_v17  ;;  %v823_v51 = vadd.f32 %v822_v47, %v4138_v52 }
 0x14a   : > { %v1097_v44 = vpack.c.bf16 %v760_v36, %v4161_v24  ;;  %v1099_v53 = vpack.c.bf16 %v821_v46, %v4166_v23  ;;  %v3658_v23 = vld [vmem:[#allocation2 + $0x298] sm:$0xff]  }
 0x14b   : > { %3299 = vmatpush3.bf16.msra.mxu0 %v3640_v29  ;;  %v1098_v50 = vpack.c.bf16 %v762_v25, %v758_v31  ;;  %v1100_v56 = vpack.c.bf16 %v823_v51, %v819_v42 }
 0x14c   : > { %3352 = vmatprep.subr.bf16.mxu0 %v3643_v35  ;;  %3333 = vmatpush3.bf16.msra.mxu1 %v3642_v40 }
 0x14d   : > { %v765_v57 = vpop.f32.mrb[20].mxu0  ;;  %3386 = vmatprep.subr.bf16.mxu1 %v3645_v45  ;;  %v826_v61 = vpop.f32.mrb[20].mxu1  ;;  %v3660_v45 = vld [vmem:[#allocation2 + $0x220] sm:$0xff]  }
 0x14e   : > { %2301 = vmatmul.mubr.bf16.vlgmr.msra.gmra.mrb[60].mxu0 %v1081_v6  ;;  %v767_v59 = vpop.f32.mrb[21].mxu0  ;;  %v828_v1 = vpop.f32.mrb[21].mxu1  ;;  %v766_v20 = vadd.f32 %v765_v57, %v4123_v27  ;;  %v827_v22 = vadd.f32 %v826_v61, %v4133_v49  ;;  %v3661_v49 = vld [vmem:[#allocation2 + $0x2e0] sm:$0xff]  }
 0x14f   : > { %3353 = vmatpush3.bf16.msra.mxu0 %v3644_v48  ;;  %2308 = vmatprep.mubr.bf16.mxu0 %v1098_v50  ;;  %v768_v19 = vadd.f32 %v767_v59, %v4128_v30  ;;  %v769_v62 = vpop.f32.mrb[22].mxu0  ;;  %v829_v6 = vadd.f32 %v828_v1, %v4138_v52  ;;  %v830_v7 = vpop.f32.mrb[22].mxu1  ;;  %v3653_v30 = vld [vmem:[#allocation2 + $0x2d0] sm:$0xff]   ;;  %v4194_v52 = vrot.slane %v4178_v63, %v388_v21  ;;  %v3656_v21 = vld [vmem:[#allocation2 + $0x218] sm:$0xff]   ;;  %v3663_v50 = vld [vmem:[#allocation2 + $0x268] sm:$0xff]  }
 0x150   : > { %2357 = vmatmul.mubr.bf16.vlgmr.msra.gmra.mrb[60].mxu1 %v1083_v12  ;;  %3354 = vmatprep.subr.bf16.mxu0 %v3647_v54  ;;  %v770_v2 = vpop.f32.mrb[23].mxu0  ;;  %v831_v8 = vpop.f32.mrb[23].mxu1  ;;  %v3655_v12 = vld [vmem:[#allocation2 + $0x258] sm:$0xff]   ;;  %v1113_v25 = vpack.c.bf16 %v766_v20, %v766_v20  ;;  %v1115_v48 = vpack.c.bf16 %v827_v22, %v827_v22  ;;  %v3664_v59 = vld [vmem:[#allocation2 + $0x228] sm:$0xff]   ;;  %v3667_v62 = vld [vmem:[#allocation2 + $0x270] sm:$0xff]  }
 0x151   : > { %3387 = vmatpush3.bf16.msra.mxu1 %v3646_v55  ;;  %2364 = vmatprep.mubr.bf16.mxu1 %v1100_v56  ;;  %v1114_v10 = vpack.c.bf16 %v768_v19, %v768_v19  ;;  %v1116_v14 = vpack.c.bf16 %v829_v6, %v829_v6  ;;  %v3665_v56 = vld [vmem:[#allocation2 + $0x2e8] sm:$0xff]  }
 0x152   : > { %3388 = vmatprep.subr.bf16.mxu1 %v3649_v58  ;;  %v3666_v6 = vld [vmem:[#allocation2 + $0x2a8] sm:$0xff]  }
 0x153   : > { %3355 = vmatpush3.bf16.msra.mxu0 %v3648_v60 }
 0x154   : > { %3356 = vmatprep.subr.bf16.mxu0 %v3651_v0 }
 0x155   : > { %3389 = vmatpush3.bf16.msra.mxu1 %v3650_v5  ;;  %v867_v18 = vpop.f32.mrb[24].mxu0  ;;  %v928_v31 = vpop.f32.mrb[24].mxu1 }
 0x156   : > { %2309 = vmatmul.mubr.bf16.gmra.mrb[64].mxu0 %v1097_v44  ;;  %3390 = vmatprep.subr.bf16.mxu1 %v3653_v30  ;;  %v4203_v17 = vadd.f32 %v867_v18, %v4184_v3  ;;  %v869_v24 = vpop.f32.mrb[25].mxu0  ;;  %v4211_v34 = vadd.f32 %v928_v31, %v4194_v52  ;;  %v930_v36 = vpop.f32.mrb[25].mxu1  ;;  %v3673_v31 = vld [vmem:[#allocation2 + $0x2f8] sm:$0xff]  }
 0x157   : > { %3357 = vmatpush3.bf16.msra.mxu0 %v3652_v9  ;;  %2316 = vmatprep.mubr.bf16.mxu0 %v1114_v10  ;;  %v870_v28 = vadd.f32 %v869_v24, %v4189_v11  ;;  %v871_v29 = vpop.f32.mrb[26].mxu0  ;;  %v931_v39 = vadd.f32 %v930_v36, %v4199_v15  ;;  %v932_v40 = vpop.f32.mrb[26].mxu1  ;;  %v3669_v9 = vld [vmem:[#allocation2 + $0x2f0] sm:$0xff]  }
 0x158   : > { %2365 = vmatmul.mubr.bf16.gmra.mrb[64].mxu1 %v1099_v53  ;;  %3358 = vmatprep.subr.bf16.mxu0 %v3655_v12  ;;  %v4208_v27 = vadd.f32 %v871_v29, %v4184_v3  ;;  %v873_v35 = vpop.f32.mrb[27].mxu0  ;;  %v4218_v43 = vadd.f32 %v932_v40, %v4194_v52  ;;  %v934_v44 = vpop.f32.mrb[27].mxu1  ;;  %v3662_v53 = vld [vmem:[#allocation2 + $0x2a0] sm:$0xff]  }
 0x159   : > { %3391 = vmatpush3.bf16.msra.mxu1 %v3654_v13  ;;  %2372 = vmatprep.mubr.bf16.mxu1 %v1116_v14  ;;  %v874_v38 = vadd.f32 %v873_v35, %v4189_v11  ;;  %v935_v47 = vadd.f32 %v934_v44, %v4199_v15  ;;  %v3668_v14 = vld [vmem:[#allocation2 + $0x230] sm:$0xff]   ;;  %v3672_v35 = vld [vmem:[#allocation2 + $0x238] sm:$0xff]  }
 0x15a   : > { %3392 = vmatprep.subr.bf16.mxu1 %v3657_v16  ;;  %v1085_v42 = vpack.c.bf16 %v4208_v27, %v4203_v17  ;;  %v1087_v51 = vpack.c.bf16 %v4218_v43, %v4211_v34  ;;  %v3671_v16 = vld [vmem:[#allocation2 + $0x278] sm:$0xff]   ;;  %v3683_v17 = vld [vmem:[#allocation2 + $0x350] sm:$0xff]  }
 0x15b   : > { %3359 = vmatpush3.bf16.msra.mxu0 %v3656_v21  ;;  %v1086_v46 = vpack.c.bf16 %v874_v38, %v870_v28  ;;  %v1088_v54 = vpack.c.bf16 %v935_v47, %v931_v39  ;;  %v3670_v21 = vld [vmem:[#allocation2 + $0x2b0] sm:$0xff]   ;;  %v3675_v38 = vld [vmem:[#allocation2 + $0x340] sm:$0xff]  }
 0x15c   : > { %3360 = vmatprep.subr.bf16.mxu0 %v3659_v32  ;;  %v3676_v47 = vld [vmem:[#allocation2 + $0x300] sm:$0xff]  }
 0x15d   : > { %3393 = vmatpush3.bf16.msra.mxu1 %v3658_v23  ;;  %v877_v55 = vpop.f32.mrb[28].mxu0  ;;  %v938_v61 = vpop.f32.mrb[28].mxu1 }
 0x15e   : > { %2317 = vmatmul.mubr.bf16.gmra.mrb[68].mxu0 %v1113_v25  ;;  %3394 = vmatprep.subr.bf16.mxu1 %v3661_v49  ;;  %v4224_v57 = vadd.f32 %v877_v55, %v4184_v3  ;;  %v879_v58 = vpop.f32.mrb[29].mxu0  ;;  %v4233_v1 = vadd.f32 %v938_v61, %v4194_v52  ;;  %v940_v5 = vpop.f32.mrb[29].mxu1  ;;  %v3674_v49 = vld [vmem:[#allocation2 + $0x2b8] sm:$0xff]  }
 0x15f   : > { %3361 = vmatpush3.bf16.msra.mxu0 %v3660_v45  ;;  %2412 = vmatprep.mubr.bf16.mxu0 %v1086_v46  ;;  %v4227_v60 = vadd.f32 %v879_v58, %v4189_v11  ;;  %v881_v19 = vpop.f32.mrb[30].mxu0  ;;  %v4237_v30 = vadd.f32 %v940_v5, %v4199_v15  ;;  %v942_v8 = vpop.f32.mrb[30].mxu1  ;;  %v3677_v45 = vld [vmem:[#allocation2 + $0x3c0] sm:$0xff]  }
 0x160   : > { %2373 = vmatmul.mubr.bf16.gmra.mrb[68].mxu1 %v1115_v48  ;;  %3362 = vmatprep.subr.bf16.mxu0 %v3663_v50  ;;  %v4230_v0 = vadd.f32 %v881_v19, %v4184_v3  ;;  %v883_v2 = vpop.f32.mrb[31].mxu0  ;;  %v4242_v12 = vadd.f32 %v942_v8, %v4194_v52  ;;  %v944_v13 = vpop.f32.mrb[31].mxu1  ;;  %v3679_v48 = vld [vmem:[#allocation2 + $0x348] sm:$0xff]   ;;  %v4268_v50 = vrot.slane %v4178_v63, %v404_v37  ;;  %v3687_v8 = vld [vmem:[#allocation2 + $0x358] sm:$0xff]  }
 0x161   : > { %3395 = vmatpush3.bf16.msra.mxu1 %v3662_v53  ;;  %2468 = vmatprep.mubr.bf16.mxu1 %v1088_v54  ;;  %v884_v7 = vadd.f32 %v883_v2, %v4189_v11  ;;  %v945_v20 = vadd.f32 %v944_v13, %v4199_v15  ;;  %v3678_v53 = vld [vmem:[#allocation2 + $0x380] sm:$0xff]   ;;  %v3680_v37 = vld [vmem:[#allocation2 + $0x308] sm:$0xff]   ;;  %v3686_v13 = vld [vmem:[#allocation2 + $0x390] sm:$0xff]  }
 0x162   : > { %3396 = vmatprep.subr.bf16.mxu1 %v3665_v56  ;;  %v1101_v10 = vpack.c.bf16 %v4230_v0, %v4224_v57  ;;  %v1103_v24 = vpack.c.bf16 %v4242_v12, %v4233_v1  ;;  %v3691_v57 = vld [vmem:[#allocation2 + $0x360] sm:$0xff]  }
 0x163   : > { %3363 = vmatpush3.bf16.msra.mxu0 %v3664_v59  ;;  %v1102_v18 = vpack.c.bf16 %v884_v7, %v4227_v60  ;;  %v1104_v28 = vpack.c.bf16 %v945_v20, %v4237_v30 }
 0x164   : > { %3364 = vmatprep.subr.bf16.mxu0 %v3667_v62 }
 0x165   : > { %3397 = vmatpush3.bf16.msra.mxu1 %v3666_v6  ;;  %v887_v29 = vpop.f32.mrb[32].mxu0  ;;  %v948_v36 = vpop.f32.mrb[32].mxu1  ;;  %v3684_v6 = vld [vmem:[#allocation2 + $0x310] sm:$0xff]  }
 0x166   : > { %3398 = vmatprep.subr.bf16.mxu1 %v3669_v9  ;;  %v4250_v22 = vadd.f32 %v887_v29, %v4184_v3  ;;  %v889_v32 = vpop.f32.mrb[33].mxu0  ;;  %v4253_v39 = vadd.f32 %v948_v36, %v4194_v52  ;;  %v950_v40 = vpop.f32.mrb[33].mxu1  ;;  %v4258_v3 = vrot.slane %v4178_v63, %v396_v26  ;;  %v4263_v52 = vrot.slane %v4178_v63, %v400_v33  ;;  %v3681_v33 = vld [vmem:[#allocation2 + $0x3c8] sm:$0xff]   ;;  %v3688_v29 = vld [vmem:[#allocation2 + $0x318] sm:$0xff]  }
 0x167   : > { %3365 = vmatpush3.bf16.msra.mxu0 %v3668_v14  ;;  %v891_v23 = vpop.f32.mrb[34].mxu0  ;;  %v952_v44 = vpop.f32.mrb[34].mxu1  ;;  %v4273_v26 = vrot.slane %v4178_v63, %v408_v41  ;;  %v890_v58 = vadd.f32 %v889_v32, %v4189_v11  ;;  %v3682_v11 = vld [vmem:[#allocation2 + $0x388] sm:$0xff]   ;;  %v951_v19 = vadd.f32 %v950_v40, %v4199_v15 }
 0x168   : > { %3366 = vmatprep.subr.bf16.mxu0 %v3671_v16  ;;  %v892_v25 = vpop.f32.mrb[35].mxu0  ;;  %v953_v46 = vpop.f32.mrb[35].mxu1  ;;  %v3689_v16 = vld [vmem:[#allocation2 + $0x3d8] sm:$0xff]   ;;  %v1117_v12 = vpack.c.bf16 %v4250_v22, %v4250_v22  ;;  %v3695_v22 = vld [vmem:[#allocation2 + $0x368] sm:$0xff]  }
 0x169   : > { %3399 = vmatpush3.bf16.msra.mxu1 %v3670_v21  ;;  %v1118_v7 = vpack.c.bf16 %v890_v58, %v890_v58  ;;  %v1120_v14 = vpack.c.bf16 %v951_v19, %v951_v19  ;;  %v3692_v46 = vld [vmem:[#allocation2 + $0x320] sm:$0xff]   ;;  %v3697_v58 = vld [vmem:[#allocation2 + $0x3e8] sm:$0xff]  }
 0x16a   : > { %3400 = vmatprep.subr.bf16.mxu1 %v3673_v31 }
 0x16b   : > { %3367 = vmatpush3.bf16.msra.mxu0 %v3672_v35 }
 0x16c   : > { %3420 = vmatprep.subr.bf16.mxu0 %v3675_v38  ;;  %v3690_v38 = vld [vmem:[#allocation2 + $0x398] sm:$0xff]  }
 0x16d   : > { %3401 = vmatpush3.bf16.msra.mxu1 %v3674_v49  ;;  %v989_v54 = vpop.f32.mrb[36].mxu0  ;;  %v1050_v63 = vpop.f32.mrb[36].mxu1 }
 0x16e   : > { %2413 = vmatmul.mubr.bf16.vlgmr.msra.gmra.mrb[72].mxu0 %v1085_v42  ;;  %3454 = vmatprep.subr.bf16.mxu1 %v3677_v45  ;;  %v4279_v55 = vadd.f32 %v989_v54, %v4258_v3  ;;  %v991_v56 = vpop.f32.mrb[37].mxu0  ;;  %v4292_v42 = vadd.f32 %v1050_v63, %v4268_v50  ;;  %v1052_v60 = vpop.f32.mrb[37].mxu1  ;;  %v3696_v63 = vld [vmem:[#allocation2 + $0x328] sm:$0xff]  }
 0x16f   : > { %3421 = vmatpush3.bf16.msra.mxu0 %v3676_v47  ;;  %2420 = vmatprep.mubr.bf16.mxu0 %v1102_v18  ;;  %v4283_v4 = vadd.f32 %v991_v56, %v4263_v52  ;;  %v993_v41 = vpop.f32.mrb[38].mxu0  ;;  %v4299_v34 = vadd.f32 %v1052_v60, %v4273_v26  ;;  %v1054_v43 = vpop.f32.mrb[38].mxu1 }
 0x170   : > { %2469 = vmatmul.mubr.bf16.vlgmr.msra.gmra.mrb[72].mxu1 %v1087_v51  ;;  %3422 = vmatprep.subr.bf16.mxu0 %v3679_v48  ;;  %v4289_v27 = vadd.f32 %v993_v41, %v4258_v3  ;;  %v995_v59 = vpop.f32.mrb[39].mxu0  ;;  %v3685_v51 = vld [vmem:[#allocation2 + $0x3d0] sm:$0xff]   ;;  %v4304_v2 = vadd.f32 %v1054_v43, %v4268_v50  ;;  %v1056_v5 = vpop.f32.mrb[39].mxu1 }
 0x171   : > { %3455 = vmatpush3.bf16.msra.mxu1 %v3678_v53  ;;  %2476 = vmatprep.mubr.bf16.mxu1 %v1104_v28  ;;  %v4296_v61 = vadd.f32 %v995_v59, %v4263_v52  ;;  %v4309_v30 = vadd.f32 %v1056_v5, %v4273_v26  ;;  %v1119_v53 = vpack.c.bf16 %v4253_v39, %v4253_v39  ;;  %v3699_v59 = vld [vmem:[#allocation2 + $0x370] sm:$0xff]   ;;  %v3703_v5 = vld [vmem:[#allocation2 + $0x378] sm:$0xff]  }
 0x172   : > { %3456 = vmatprep.subr.bf16.mxu1 %v3681_v33  ;;  %v1089_v62 = vpack.c.bf16 %v4289_v27, %v4279_v55  ;;  %v1091_v9 = vpack.c.bf16 %v4304_v2, %v4292_v42  ;;  %v3694_v33 = vld [vmem:[#allocation2 + $0x3a0] sm:$0xff]   ;;  %v3701_v43 = vld [vmem:[#allocation2 + $0x3f0] sm:$0xff]   ;;  %v3709_v27 = vld [vmem:[#allocation4 + $0x48] sm:$0xff]  }
 0x173   : > { %3423 = vmatpush3.bf16.msra.mxu0 %v3680_v37  ;;  %v1090_v15 = vpack.c.bf16 %v4296_v61, %v4283_v4  ;;  %v1092_v18 = vpack.c.bf16 %v4309_v30, %v4299_v34  ;;  %v3698_v61 = vld [vmem:[#allocation2 + $0x3a8] sm:$0xff]   ;;  %v3707_v55 = vld [vmem:[#allocation4 + $0x40] sm:$0xff]   ;;  %v3713_v2 = vld [vmem:[#allocation4 + $0x58] sm:$0xff]  }
 0x174   : > { %3424 = vmatprep.subr.bf16.mxu0 %v3683_v17  ;;  %v3710_v42 = vld [vmem:[#allocation4 + $0x8] sm:$0xff]  }
 0x175   : > { %3457 = vmatpush3.bf16.msra.mxu1 %v3682_v11  ;;  %v999_v20 = vpop.f32.mrb[40].mxu0 }
 0x176   : > { %2421 = vmatmul.mubr.bf16.gmra.mrb[76].mxu0 %v1101_v10  ;;  %3458 = vmatprep.subr.bf16.mxu1 %v3685_v51  ;;  %v4319_v21 = vadd.f32 %v999_v20, %v4258_v3  ;;  %v1001_v28 = vpop.f32.mrb[41].mxu0  ;;  %v3700_v51 = vld [vmem:[#allocation2 + $0x330] sm:$0xff]  }
 0x177   : > { %3425 = vmatpush3.bf16.msra.mxu0 %v3684_v6  ;;  %2428 = vmatprep.mubr.bf16.mxu0 %v1118_v7  ;;  %v4322_v31 = vadd.f32 %v1001_v28, %v4263_v52  ;;  %v1003_v32 = vpop.f32.mrb[42].mxu0  ;;  %v1060_v35 = vpop.f32.mrb[40].mxu1  ;;  %v3702_v6 = vld [vmem:[#allocation2 + $0x3b0] sm:$0xff]   ;;  %v3705_v7 = vld [vmem:[#allocation2 + $0x3f8] sm:$0xff]   ;;  %v3717_v28 = vld [vmem:[#allocation4 + $0x68] sm:$0xff]  }
 0x178   : > { %2477 = vmatmul.mubr.bf16.gmra.mrb[76].mxu1 %v1103_v24  ;;  %3426 = vmatprep.subr.bf16.mxu0 %v3687_v8  ;;  %v4328_v0 = vadd.f32 %v1003_v32, %v4258_v3  ;;  %v4331_v10 = vadd.f32 %v1060_v35, %v4268_v50  ;;  %v1005_v36 = vpop.f32.mrb[43].mxu0  ;;  %v1062_v23 = vpop.f32.mrb[41].mxu1  ;;  %v3693_v24 = vld [vmem:[#allocation2 + $0x3e0] sm:$0xff]   ;;  %v3720_v32 = vld [vmem:[#allocation4 + $0x30] sm:$0xff]   ;;  %v3721_v35 = vld [vmem:[#allocation4 + $0x78] sm:$0xff]  }
 0x179   : > { %3459 = vmatpush3.bf16.msra.mxu1 %v3686_v13  ;;  %2484 = vmatprep.mubr.bf16.mxu1 %v1120_v14  ;;  %v1006_v40 = vadd.f32 %v1005_v36, %v4263_v52  ;;  %v4335_v25 = vadd.f32 %v1062_v23, %v4273_v26  ;;  %v1064_v1 = vpop.f32.mrb[42].mxu1 }
 0x17a   : > { %3460 = vmatprep.subr.bf16.mxu1 %v3689_v16  ;;  %v1105_v49 = vpack.c.bf16 %v4328_v0, %v4319_v21  ;;  %v4342_v44 = vadd.f32 %v1064_v1, %v4268_v50  ;;  %v1066_v45 = vpop.f32.mrb[43].mxu1  ;;  %v3715_v16 = vld [vmem:[#allocation4 + $0x60] sm:$0xff]  }
 0x17b   : > { %3427 = vmatpush3.bf16.msra.mxu0 %v3688_v29  ;;  %v1106_v47 = vpack.c.bf16 %v1006_v40, %v4322_v31  ;;  %v1067_v48 = vadd.f32 %v1066_v45, %v4273_v26  ;;  %v3716_v21 = vld [vmem:[#allocation4 + $0x20] sm:$0xff]   ;;  %v3718_v29 = vld [vmem:[#allocation4 + $0x28] sm:$0xff]   ;;  %v3719_v31 = vld [vmem:[#allocation4 + $0x70] sm:$0xff]  }
 0x17c   : > { %3428 = vmatprep.subr.bf16.mxu0 %v3691_v57  ;;  %v1107_v54 = vpack.c.bf16 %v4342_v44, %v4331_v10  ;;  %v3722_v57 = vld [vmem:[#allocation4 + $0x38] sm:$0xff]   ;;  %v3059_v10 = vld [vmem:[%s4415_s4] ss:$0 sm:$0xff] }
 0x17d   : > { %3461 = vmatpush3.bf16.msra.mxu1 %v3690_v38  ;;  %v1108_v56 = vpack.c.bf16 %v1067_v48, %v4335_v25  ;;  %v1009_v37 = vpop.f32.mrb[44].mxu0  ;;  %v3723_v45 = vld [vmem:[%s4418_s7] sm:$0xff]  }
 0x17e   : > { %2429 = vmatmul.mubr.bf16.gmra.mrb[80].mxu0 %v1117_v12  ;;  %3462 = vmatprep.subr.bf16.mxu1 %v3693_v24  ;;  %v1010_v4 = vadd.f32 %v1009_v37, %v4258_v3  ;;  %v1011_v41 = vpop.f32.mrb[45].mxu0 }
 0x17f   : > { %3429 = vmatpush3.bf16.msra.mxu0 %v3692_v46  ;;  %2524 = vmatprep.mubr.bf16.mxu0 %v1090_v15  ;;  %v1013_v39 = vpop.f32.mrb[46].mxu0  ;;  %v1070_v17 = vpop.f32.mrb[44].mxu1  ;;  %v3704_v15 = vld [vmem:[#allocation2 + $0x338] sm:$0xff]   ;;  %v1012_v30 = vadd.f32 %v1011_v41, %v4263_v52  ;;  %v3708_v52 = vld [vmem:[#allocation4] sm:$0xff]  }
 0x180   : > { %2485 = vmatmul.mubr.bf16.gmra.mrb[80].mxu1 %v1119_v53  ;;  %3430 = vmatprep.subr.bf16.mxu0 %v3695_v22  ;;  %v1071_v60 = vadd.f32 %v1070_v17, %v4268_v50  ;;  %v1014_v11 = vpop.f32.mrb[47].mxu0  ;;  %v1072_v19 = vpop.f32.mrb[45].mxu1  ;;  %v3706_v50 = vld [vmem:[#allocation2 + $0x3b8] sm:$0xff]  }
 0x181   : > { %3463 = vmatpush3.bf16.msra.mxu1 %v3694_v33  ;;  %2580 = vmatprep.mubr.bf16.mxu1 %v1092_v18  ;;  %v1074_v34 = vpop.f32.mrb[46].mxu1  ;;  %v1073_v8 = vadd.f32 %v1072_v19, %v4273_v26  ;;  %v1122_v13 = vpack.c.bf16 %v1012_v30, %v1012_v30  ;;  %v1121_v18 = vpack.c.bf16 %v1010_v4, %v1010_v4  ;;  %v3712_v26 = vld [vmem:[#allocation4 + $0x10] sm:$0xff]  }
 0x182   : > { %3464 = vmatprep.subr.bf16.mxu1 %v3697_v58  ;;  %v1075_v3 = vpop.f32.mrb[47].mxu1  ;;  %v1123_v20 = vpack.c.bf16 %v1071_v60, %v1071_v60 }
 0x183   : > { %3431 = vmatpush3.bf16.msra.mxu0 %v3696_v63  ;;  %v1124_v14 = vpack.c.bf16 %v1073_v8, %v1073_v8  ;;  %v3725_v63 = vld [vmem:[%s4418_s7 + $0x10] sm:$0xff]   ;;  %v3727_v8 = vld [vmem:[%s4418_s7 + $0x20] sm:$0xff]  }
 0x184   : > { %3432 = vmatprep.subr.bf16.mxu0 %v3699_v59 }
 0x185   : > { %3465 = vmatpush3.bf16.msra.mxu1 %v3698_v61 }
 0x186   : > { %3466 = vmatprep.subr.bf16.mxu1 %v3701_v43 }
 0x187   : > { %3433 = vmatpush3.bf16.msra.mxu0 %v3700_v51  ;;  %v3726_v51 = vld [vmem:[%s4418_s7 + $0x18] sm:$0xff]  }
 0x188   : > { %3434 = vmatprep.subr.bf16.mxu0 %v3703_v5 }
 0x189   : > { %3467 = vmatpush3.bf16.msra.mxu1 %v3702_v6 }
 0x18a   : > { %3468 = vmatprep.subr.bf16.mxu1 %v3705_v7 }
 0x18b   : > { %3435 = vmatpush3.bf16.msra.mxu0 %v3704_v15 }
 0x18c   : > { %3488 = vmatprep.subr.bf16.mxu0 %v3707_v55 }
 0x18d   : > { %3469 = vmatpush3.bf16.msra.mxu1 %v3706_v50 }
 0x18e   : > { %2525 = vmatmul.mubr.bf16.vlgmr.msra.gmra.mrb[84].mxu0 %v1089_v62  ;;  %v3711_v62 = vld [vmem:[#allocation4 + $0x50] sm:$0xff]  }
 0x18f   : > { %2532 = vmatprep.mubr.bf16.mxu0 %v1106_v47  ;;  %3489 = vmatpush3.bf16.msra.mxu0 %v3708_v52  ;;  %v3809_v47 = vmov 0.0  }
 0x190   : > { %2581 = vmatmul.mubr.bf16.vlgmr.msra.gmra.mrb[84].mxu1 %v1091_v9  ;;  %3490 = vmatprep.subr.bf16.mxu0 %v3709_v27  ;;  %v3714_v9 = vld [vmem:[#allocation4 + $0x18] sm:$0xff]  }
 0x191   : > { %2588 = vmatprep.mubr.bf16.mxu1 %v1108_v56  ;;  %3519 = vmatprep.subr.bf16.mxu1 %v3809_v47 }
 0x192   : > { %3520 = vmatpush3.bf16.msra.mxu1 %v3723_v45 }
 0x193   : > { %3491 = vmatpush3.bf16.msra.mxu0 %v3710_v42  ;;  %3521 = vmatprep.subr.bf16.mxu1 %v3809_v47  ;;  %v3728_v42 = vld [vmem:[%s4418_s7 + $0x28] sm:$0xff]  }
 0x194   : > { %3492 = vmatprep.subr.bf16.mxu0 %v3711_v62 }
 0x196   : > { %2533 = vmatmul.mubr.bf16.gmra.mrb[88].mxu0 %v1105_v49 }
 0x197   : > { %2540 = vmatprep.mubr.bf16.mxu0 %v1122_v13  ;;  %3493 = vmatpush3.bf16.msra.mxu0 %v3712_v26 }
 0x198   : > { %2589 = vmatmul.mubr.bf16.gmra.mrb[88].mxu1 %v1107_v54  ;;  %3494 = vmatprep.subr.bf16.mxu0 %v3713_v2  ;;  %v3724_v54 = vld [vmem:[%s4418_s7 + $0x8] sm:$0xff]  }
 0x199   : > { %2596 = vmatprep.mubr.bf16.mxu1 %v1124_v14  ;;  %3522 = vmatpush3.bf16.msra.mxu1 %v3724_v54 }
 0x19a   : > { %3523 = vmatprep.subr.bf16.mxu1 %v3809_v47 }
 0x19b   : > { %3495 = vmatpush3.bf16.msra.mxu0 %v3714_v9 }
 0x19c   : > { %3496 = vmatprep.subr.bf16.mxu0 %v3715_v16 }
 0x19d   : > { %3524 = vmatpush3.bf16.msra.mxu1 %v3725_v63 }
 0x19e   : > { %2541 = vmatmul.mubr.bf16.gmra.mrb[92].mxu0 %v1121_v18  ;;  %3525 = vmatprep.subr.bf16.mxu1 %v3809_v47 }
 0x19f   : > { %3497 = vmatpush3.bf16.msra.mxu0 %v3716_v21 }
 0x1a0   : > { %2597 = vmatmul.mubr.bf16.gmra.mrb[92].mxu1 %v1123_v20  ;;  %3498 = vmatprep.subr.bf16.mxu0 %v3717_v28 }
 0x1a1   : > { %3526 = vmatpush3.bf16.msra.mxu1 %v3726_v51  ;;  %3535 = vmatprep.mubr.msk.bf16.mxu1 %vm3810_vm4, %v3809_v47 }
 0x1a2   : > { %3527 = vmatprep.subr.bf16.mxu1 %v3809_v47 }
 0x1a3   : > { %3499 = vmatpush3.bf16.msra.mxu0 %v3718_v29 }
 0x1a4   : > { %3500 = vmatprep.subr.bf16.mxu0 %v3719_v31 }
 0x1a5   : > { %3528 = vmatpush3.bf16.msra.mxu1 %v3727_v8 }
 0x1a6   : > { %3529 = vmatprep.subr.bf16.mxu1 %v3809_v47 }
 0x1a7   : > { %3501 = vmatpush3.bf16.msra.mxu0 %v3720_v32 }
 0x1a8   : > { %3502 = vmatprep.subr.bf16.mxu0 %v3721_v35 }
 0x1a9   : > { %3530 = vmatpush3.bf16.msra.mxu1 %v3728_v42 }
 0x1aa   : > { %3531 = vmatprep.subr.bf16.mxu1 %v3809_v47 }
 0x1ab   : > { %3503 = vmatpush3.bf16.msra.mxu0 %v3722_v57 }
 0x201   : > { %v3232_v0 = vpop.f32.mrb[48].mxu0  ;;  %v3266_v40 = vpop.f32.mrb[48].mxu1 }
 0x202   : > { %v3233_v36 = vpop.f32.mrb[49].mxu0  ;;  %v3267_v1 = vpop.f32.mrb[49].mxu1 }
 0x203   : > { %v3234_v23 = vadd.f32 %v3233_v36, %v3232_v0  ;;  %v3235_v38 = vpop.f32.mrb[50].mxu0  ;;  %v3268_v49 = vadd.f32 %v3267_v1, %v3266_v40  ;;  %v3269_v44 = vpop.f32.mrb[50].mxu1 }
 0x204   : > { %v3236_v25 = vpop.f32.mrb[51].mxu0  ;;  %v3270_v46 = vpop.f32.mrb[51].mxu1 }
 0x205   : > { %v2191_v12 = vadd.f32 %v3234_v23, %v3059_v10  ;;  %v3237_v24 = vadd.f32 %v3236_v25, %v3235_v38  ;;  %v3271_v22 = vadd.f32 %v3270_v46, %v3269_v44 }
 0x207   : > { %v2194_v48 = vadd.f32 %v3237_v24, %v3059_v10  ;;  %v2247_v53 = vadd.f32 %v3268_v49, %v2191_v12 }
 0x209   : > { %v2250_v33 = vadd.f32 %v3271_v22, %v2194_v48  ;;  %v3238_v56 = vpop.f32.mrb[52].mxu0  ;;  %v3272_v41 = vpop.f32.mrb[52].mxu1 }
 0x20a   : > { %v3239_v37 = vpop.f32.mrb[53].mxu0  ;;  %v3273_v17 = vpop.f32.mrb[53].mxu1 }
 0x20b   : > { %v3240_v58 = vadd.f32 %v3239_v37, %v3238_v56  ;;  %v3241_v4 = vpop.f32.mrb[54].mxu0  ;;  %v3274_v11 = vadd.f32 %v3273_v17, %v3272_v41  ;;  %v3275_v19 = vpop.f32.mrb[54].mxu1 }
 0x20c   : > { %v3242_v39 = vpop.f32.mrb[55].mxu0  ;;  %v3276_v61 = vpop.f32.mrb[55].mxu1 }
 0x20d   : > { %v2199_v59 = vadd.f32 %v3240_v58, %v3059_v10  ;;  %v3243_v60 = vadd.f32 %v3242_v39, %v3241_v4  ;;  %v3277_v3 = vadd.f32 %v3276_v61, %v3275_v19 }
 0x20f   : > { %v2202_v34 = vadd.f32 %v3243_v60, %v3059_v10  ;;  %v2255_v43 = vadd.f32 %v3274_v11, %v2199_v59 }
 0x211   : > { %v2258_v5 = vadd.f32 %v3277_v3, %v2202_v34  ;;  %v3244_v6 = vpop.f32.mrb[56].mxu0  ;;  %v3278_v30 = vpop.f32.mrb[56].mxu1 }
 0x212   : > { %v3245_v7 = vpop.f32.mrb[57].mxu0  ;;  %v3279_v14 = vpop.f32.mrb[57].mxu1 }
 0x213   : > { %v3246_v15 = vadd.f32 %v3245_v7, %v3244_v6  ;;  %v3247_v50 = vpop.f32.mrb[58].mxu0  ;;  %v3280_v20 = vadd.f32 %v3279_v14, %v3278_v30  ;;  %v3281_v55 = vpop.f32.mrb[58].mxu1 }
 0x214   : > { %v3248_v13 = vpop.f32.mrb[59].mxu0  ;;  %v3282_v52 = vpop.f32.mrb[59].mxu1 }
 0x215   : > { %v2207_v18 = vadd.f32 %v3246_v15, %v3059_v10 }
 0x217   : > { %v2263_v27 = vadd.f32 %v3280_v20, %v2207_v18 }
 0x221   : > { %v3300_v62 = vpop.f32.mrb[60].mxu0 }
 0x222   : > { %v3301_v26 = vpop.f32.mrb[61].mxu0 }
 0x223   : > { %v3302_v2 = vadd.f32 %v3301_v26, %v3300_v62  ;;  %v3303_v9 = vpop.f32.mrb[62].mxu0  ;;  %v3334_v16 = vpop.f32.mrb[60].mxu1 }
 0x224   : > { %v3304_v21 = vpop.f32.mrb[63].mxu0  ;;  %v3335_v28 = vpop.f32.mrb[61].mxu1 }
 0x225   : > { %v2303_v29 = vadd.f32 %v3302_v2, %v2247_v53  ;;  %v3305_v31 = vadd.f32 %v3304_v21, %v3303_v9  ;;  %v3336_v32 = vadd.f32 %v3335_v28, %v3334_v16  ;;  %v3337_v35 = vpop.f32.mrb[62].mxu1 }
 0x226   : > { %v3338_v57 = vpop.f32.mrb[63].mxu1 }
 0x227   : > { %v2306_v0 = vadd.f32 %v3305_v31, %v2250_v33  ;;  %v2359_v10 = vadd.f32 %v3336_v32, %v2303_v29  ;;  %v3339_v36 = vadd.f32 %v3338_v57, %v3337_v35 }
 0x229   : > { %v2362_v23 = vadd.f32 %v3339_v36, %v2306_v0  ;;  %v3306_v38 = vpop.f32.mrb[64].mxu0 }
 0x22a   : > { %v3307_v40 = vpop.f32.mrb[65].mxu0 }
 0x22b   : > { %v3308_v25 = vadd.f32 %v3307_v40, %v3306_v38  ;;  %v3309_v1 = vpop.f32.mrb[66].mxu0  ;;  %v3340_v12 = vpop.f32.mrb[64].mxu1 }
 0x22c   : > { %v3310_v24 = vpop.f32.mrb[67].mxu0  ;;  %v3341_v49 = vpop.f32.mrb[65].mxu1 }
 0x22d   : > { %v2311_v44 = vadd.f32 %v3308_v25, %v2255_v43  ;;  %v3311_v45 = vadd.f32 %v3310_v24, %v3309_v1  ;;  %v3342_v46 = vadd.f32 %v3341_v49, %v3340_v12  ;;  %v3343_v48 = vpop.f32.mrb[66].mxu1 }
 0x22e   : > { %v3344_v53 = vpop.f32.mrb[67].mxu1 }
 0x22f   : > { %v2314_v22 = vadd.f32 %v3311_v45, %v2258_v5  ;;  %v2367_v54 = vadd.f32 %v3342_v46, %v2311_v44  ;;  %v3345_v56 = vadd.f32 %v3344_v53, %v3343_v48 }
 0x231   : > { %v2370_v37 = vadd.f32 %v3345_v56, %v2314_v22  ;;  %v3312_v33 = vpop.f32.mrb[68].mxu0 }
 0x232   : > { %v3313_v58 = vpop.f32.mrb[69].mxu0 }
 0x233   : > { %v3314_v4 = vadd.f32 %v3313_v58, %v3312_v33  ;;  %v3346_v41 = vpop.f32.mrb[68].mxu1  ;;  %v3315_v63 = vpop.f32.mrb[70].mxu0 }
 0x234   : > { %v3347_v39 = vpop.f32.mrb[69].mxu1  ;;  %v3316_v17 = vpop.f32.mrb[71].mxu0 }
 0x235   : > { %v2319_v59 = vadd.f32 %v3314_v4, %v2263_v27  ;;  %v3348_v60 = vadd.f32 %v3347_v39, %v3346_v41  ;;  %v3349_v11 = vpop.f32.mrb[70].mxu1 }
 0x236   : > { %v3350_v19 = vpop.f32.mrb[71].mxu1 }
 0x237   : > { %v2375_v61 = vadd.f32 %v3348_v60, %v2319_v59 }
 0x241   : > { %v3368_v34 = vpop.f32.mrb[72].mxu0 }
 0x242   : > { %v3369_v43 = vpop.f32.mrb[73].mxu0 }
 0x243   : > { %v3370_v3 = vadd.f32 %v3369_v43, %v3368_v34  ;;  %v3371_v51 = vpop.f32.mrb[74].mxu0  ;;  %v3402_v5 = vpop.f32.mrb[72].mxu1 }
 0x244   : > { %v3372_v6 = vpop.f32.mrb[75].mxu0  ;;  %v3403_v7 = vpop.f32.mrb[73].mxu1 }
 0x245   : > { %v2415_v15 = vadd.f32 %v3370_v3, %v2359_v10  ;;  %v3373_v50 = vadd.f32 %v3372_v6, %v3371_v51  ;;  %v3404_v30 = vadd.f32 %v3403_v7, %v3402_v5  ;;  %v3405_v8 = vpop.f32.mrb[74].mxu1 }
 0x246   : > { %v3406_v13 = vpop.f32.mrb[75].mxu1 }
 0x247   : > { %v2418_v14 = vadd.f32 %v3373_v50, %v2362_v23  ;;  %v2471_v18 = vadd.f32 %v3404_v30, %v2415_v15  ;;  %v3407_v20 = vadd.f32 %v3406_v13, %v3405_v8 }
 0x249   : > { %v2474_v55 = vadd.f32 %v3407_v20, %v2418_v14  ;;  %v3374_v52 = vpop.f32.mrb[76].mxu0 }
 0x24a   : > { %v3375_v27 = vpop.f32.mrb[77].mxu0 }
 0x24b   : > { %v3376_v42 = vadd.f32 %v3375_v27, %v3374_v52  ;;  %v3377_v62 = vpop.f32.mrb[78].mxu0  ;;  %v3408_v26 = vpop.f32.mrb[76].mxu1 }
 0x24c   : > { %v3378_v2 = vpop.f32.mrb[79].mxu0  ;;  %v3409_v9 = vpop.f32.mrb[77].mxu1 }
 0x24d   : > { %v2423_v16 = vadd.f32 %v3376_v42, %v2367_v54  ;;  %v3379_v21 = vadd.f32 %v3378_v2, %v3377_v62  ;;  %v3410_v28 = vadd.f32 %v3409_v9, %v3408_v26  ;;  %v3411_v29 = vpop.f32.mrb[78].mxu1 }
 0x24e   : > { %v3412_v31 = vpop.f32.mrb[79].mxu1 }
 0x24f   : > { %v2426_v32 = vadd.f32 %v3379_v21, %v2370_v37  ;;  %v2479_v35 = vadd.f32 %v3410_v28, %v2423_v16  ;;  %v3413_v57 = vadd.f32 %v3412_v31, %v3411_v29 }
 0x251   : > { %v2482_v0 = vadd.f32 %v3413_v57, %v2426_v32  ;;  %v3380_v10 = vpop.f32.mrb[80].mxu0 }
 0x252   : > { %v3381_v36 = vpop.f32.mrb[81].mxu0 }
 0x253   : > { %v3382_v23 = vadd.f32 %v3381_v36, %v3380_v10  ;;  %v3414_v38 = vpop.f32.mrb[80].mxu1  ;;  %v3383_v40 = vpop.f32.mrb[82].mxu0 }
 0x254   : > { %v3415_v25 = vpop.f32.mrb[81].mxu1  ;;  %v3384_v1 = vpop.f32.mrb[83].mxu0 }
 0x255   : > { %v2431_v12 = vadd.f32 %v3382_v23, %v2375_v61  ;;  %v3416_v24 = vadd.f32 %v3415_v25, %v3414_v38  ;;  %v3417_v49 = vpop.f32.mrb[82].mxu1 }
 0x256   : > { %v3418_v44 = vpop.f32.mrb[83].mxu1 }
 0x257   : > { %v2487_v45 = vadd.f32 %v3416_v24, %v2431_v12 }
 0x261   : > { %v3436_v46 = vpop.f32.mrb[84].mxu0 }
 0x262   : > { %v3437_v48 = vpop.f32.mrb[85].mxu0 }
 0x263   : > { %v3438_v53 = vadd.f32 %v3437_v48, %v3436_v46  ;;  %v3439_v22 = vpop.f32.mrb[86].mxu0  ;;  %v3470_v54 = vpop.f32.mrb[84].mxu1 }
 0x264   : > { %v3440_v56 = vpop.f32.mrb[87].mxu0  ;;  %v3471_v37 = vpop.f32.mrb[85].mxu1 }
 0x265   : > { %v2527_v33 = vadd.f32 %v3438_v53, %v2471_v18  ;;  %v3441_v58 = vadd.f32 %v3440_v56, %v3439_v22  ;;  %v3472_v4 = vadd.f32 %v3471_v37, %v3470_v54  ;;  %v3473_v41 = vpop.f32.mrb[86].mxu1 }
 0x266   : > { %v3474_v63 = vpop.f32.mrb[87].mxu1 }
 0x267   : > { %v2530_v39 = vadd.f32 %v3441_v58, %v2474_v55  ;;  %v2583_v17 = vadd.f32 %v3472_v4, %v2527_v33  ;;  %v3475_v59 = vadd.f32 %v3474_v63, %v3473_v41  ;;  %v3730_v63 = vld [vmem:[%s4418_s7 + $0x38] sm:$0xff]  }
 0x269   : > { %v2605_v60 = vrot.slane %v2583_v17, 3  ;;  %v2586_v11 = vadd.f32 %v3475_v59, %v2530_v39  ;;  %v3442_v19 = vpop.f32.mrb[88].mxu0  ;;  %v2613_v43 = vrot.slane %v2583_v17, 6 }
 0x26a   : > { %v3443_v61 = vpop.f32.mrb[89].mxu0 }
 0x26b   : > { %v2607_v34 = vmax.f32 %v2583_v17, %v2605_v60  ;;  %v2614_v3 = vrot.slane %v2586_v11, 6  ;;  %v3445_v51 = vpop.f32.mrb[90].mxu0  ;;  %v3476_v5 = vpop.f32.mrb[88].mxu1  ;;  %v3444_v6 = vadd.f32 %v3443_v61, %v3442_v19  ;;  %v2622_v18 = vrot.slane %v2586_v11, 1  ;;  %v3188_v17 = vld [vmem:[%s4417_s6] ss:$0 sm:$0xff] }
 0x26c   : > { %v3446_v7 = vpop.f32.mrb[91].mxu0  ;;  %v3477_v15 = vpop.f32.mrb[89].mxu1  ;;  %v2628_v62 = vrot.slane %v2586_v11, 4  ;;  %v2639_v21 = vrot.slane %v2586_v11, 7 }
 0x26d   : > { %v2615_v50 = vsel %vm540_vm0, %v2613_v43, %v2614_v3  ;;  %v3447_v30 = vadd.f32 %v3446_v7, %v3445_v51  ;;  %v3478_v8 = vadd.f32 %v3477_v15, %v3476_v5  ;;  %v3479_v13 = vpop.f32.mrb[90].mxu1  ;;  %v2535_v20 = vadd.f32 %v3444_v6, %v2479_v35  ;;  %v3205_v3 = vld [vmem:[%s4419_s8] ss:$0 sm:$0xff] }
 0x26e   : > { %v2617_v14 = vmax.f32 %v2607_v34, %v2615_v50  ;;  %v3480_v55 = vpop.f32.mrb[91].mxu1 }
 0x26f   : > { %v2538_v52 = vadd.f32 %v3447_v30, %v2482_v0  ;;  %v3481_v27 = vadd.f32 %v3480_v55, %v3479_v13  ;;  %v2591_v26 = vadd.f32 %v3478_v8, %v2535_v20 }
 0x270   : > { %v2624_v42 = vmax.f32 %v2617_v14, %v2622_v18 }
 0x271   : > { %v2594_v2 = vadd.f32 %v3481_v27, %v2538_v52  ;;  %v3448_v9 = vpop.f32.mrb[92].mxu0  ;;  %v2609_v28 = vrot.slane %v2591_v26, 3  ;;  %v2640_v29 = vrot.slane %v2591_v26, 7 }
 0x272   : > { %v2630_v16 = vmax.f32 %v2624_v42, %v2628_v62  ;;  %v3449_v31 = vpop.f32.mrb[93].mxu0 }
 0x273   : > { %v2619_v32 = vrot.slane %v2594_v2, 6  ;;  %v3450_v57 = vadd.f32 %v3449_v31, %v3448_v9  ;;  %v3451_v10 = vpop.f32.mrb[94].mxu0  ;;  %v3482_v36 = vpop.f32.mrb[92].mxu1  ;;  %v2611_v23 = vmax.f32 %v2591_v26, %v2609_v28  ;;  %v2641_v35 = vsel %vm2638_vm2, %v2639_v21, %v2640_v29 }
 0x274   : > { %v3452_v38 = vpop.f32.mrb[95].mxu0  ;;  %v3483_v0 = vpop.f32.mrb[93].mxu1  ;;  %v2643_v12 = vmax.f32 %v2630_v16, %v2641_v35  ;;  %v2625_v49 = vrot.slane %v2594_v2, 1  ;;  %v2633_v53 = vrot.slane %v2594_v2, 4 }
 0x275   : > { %v2543_v40 = vadd.f32 %v3450_v57, %v2487_v45  ;;  %v3484_v25 = vadd.f32 %v3483_v0, %v3482_v36  ;;  %v3485_v1 = vpop.f32.mrb[94].mxu1  ;;  %v2621_v24 = vmax.f32 %v2611_v23, %v2619_v32  ;;  %v3729_v45 = vld [vmem:[%s4418_s7 + $0x30] sm:$0xff]  }
 0x276   : > { %v3486_v44 = vpop.f32.mrb[95].mxu1  ;;  %v2650_v41 = vpack.c.bf16 %v2643_v12, %v2643_v12  ;;  %3532 = vmatpush3.bf16.msra.mxu1 %v3729_v45 }
 0x277   : > { %v2599_v46 = vadd.f32 %v3484_v25, %v2543_v40  ;;  %v2627_v48 = vmax.f32 %v2621_v24, %v2625_v49  ;;  %3533 = vmatprep.subr.bf16.mxu1 %v3809_v47 }
 0x279   : > { %v2634_v22 = vrot.slane %v2599_v46, 4  ;;  %v2644_v56 = vrot.slane %v2599_v46, 7 }
 0x27a   : > { %3534 = vmatpush3.bf16.msra.mxu1 %v3730_v63 }
 0x27b   : > { %v2635_v54 = vsel %vm2632_vm3, %v2633_v53, %v2634_v22 }
 0x27c   : > { %v2637_v37 = vmax.f32 %v2627_v48, %v2635_v54 }
 0x27e   : > { %v2646_v33 = vmax.f32 %v2637_v37, %v2644_v56 }
 0x280   : > { %v2648_v58 = vrot.slane %v2646_v33, 2 }
 0x282   : > { %v2651_v4 = vpack.c.bf16 %v2648_v58, %v2648_v58 }
 0x284   : > { %2819 = vmatprep.mubr.bf16.mxu0 %v2651_v4 }
 0x285   : > { %2820 = vmatmul.mubr.bf16.vlgmr.msra.gmra.mrb[96].mxu0 %v2650_v41 }
 0x358   : > { %v3504_v39 = vpop.f32.mrb[96].mxu0 }
 0x359   : > { %v3505_v59 = vpop.f32.mrb[97].mxu0 }
 0x35a   : > { %v3506_v60 = vadd.f32 %v3505_v59, %v3504_v39  ;;  %v3507_v11 = vpop.f32.mrb[98].mxu0 }
 0x35b   : > { %v3508_v19 = vpop.f32.mrb[99].mxu0 }
 0x35c   : > { %v2822_v61 = vadd.f32 %v3506_v60, %v3188_v17 }
 0x35e   : > { %v2827_v34 = vmax.f32 %v2822_v61, 0.0 }
 0x360   : > { %v2828_v43 = vpack.c.bf16 %v2827_v34, %v2827_v34 }
 0x362   : > { %3536 = vmatmul.mubr.bf16.vlgmr.msra.gmra.mrb[96].mxu1 %v2828_v43 }
 0x435   : > { %v2934_v47 = vpop.f32.mrb[96].mxu1 }
 0x436   : > { %v2935_v51 = vadd.f32 %v3205_v3, %v2934_v47  ;;  %v3537_v5 = vpop.f32.mrb[97].mxu1 }
 0x437   : > { %v2937_v6 = vpop.f32.mrb[98].mxu1 }
 0x438   : > { %2940 = vst [vmem:[%s360_s23] sm:$0x7] %v2935_v51  ;;  %v3538_v7 = vpop.f32.mrb[99].mxu1 }
 0x439 PF: > { %s21_s30 = sadd.s32 1, %s3801_s30  }
 0x43a   : > { %p18_p9 = scmp.ge.s32.totalorder %s21_s30, 4  }
 0x43c   :  { %20 = sbr.rel (!%p18_p9) target bundleno = 2 (0x2), region = 95 }
 0x443   :  { %2960 = vsyncpa [#allocation3], 1 }
 0x444   :  { %2962 = vsyncpa [#allocation3 + $0x1], 1 }
 0x445   :  { %2963 = vsyncpa [#allocation5], 1 }

// kernel: tpu_custom_call.1
= control target key start
LH: loop header
LB: loop body
LE: loop exit
PB: predicated region body
PF: predicated region fallthrough
CT: control target
= control target key end

     0   :  { %14 = vsyncpa [#allocation3], 0  ;;  %s4411_s0 = inlined_call_operand.vmem [shape: f32[2,36,4], index: 0, kind: input, shape index: {}]   ;;  %s4412_s1 = inlined_call_operand.vmem [shape: bf16[4,2048], index: 1, kind: input, shape index: {}]   ;;  %s4413_s2 = inlined_call_operand.vmem [shape: f32[1,2048], index: 2, kind: input, shape index: {}]   ;;  %s4414_s3 = inlined_call_operand.hbm [shape: bf16[2048,128], index: 3, kind: input, shape index: {}]   ;;  %s4415_s4 = inlined_call_operand.vmem [shape: f32[1,128], index: 4, kind: input, shape index: {}]   ;;  %s4416_s5 = inlined_call_operand.hbm [shape: bf16[256,128], index: 5, kind: input, shape index: {}]   ;;  %s4417_s6 = inlined_call_operand.vmem [shape: f32[1,128], index: 6, kind: input, shape index: {}]   ;;  %s4418_s7 = inlined_call_operand.vmem [shape: bf16[128,128], index: 7, kind: input, shape index: {}]   ;;  %s4419_s8 = inlined_call_operand.vmem [shape: f32[1,128], index: 8, kind: input, shape index: {}]   ;;  %s4420_s9 = inlined_call_operand.vmem [shape: f32[2,3,128], index: 9, kind: output, shape index: {}]  }
   0x1   :  { %15 = vsyncpa [#allocation5], 0  ;;  %s3861_s30 = smov 0  }
   0x2 LB: > { %s3867_s10 = sadd.s32 4294967295, %s3801_s30   ;;  %p3018_p0 = scmp.ge.s32.totalorder %s3801_s30, 1  ;;  %s3801_s30 = sphi %s3861_s30, %s21_s30  }
   0x3   : > { %p246_p1 = scmp.lt.s32.totalorder %s3801_s30, 3  ;;  %s3803_s11 = smov [#allocation2]  }
   0x4   : > { %s264_s12 = sshll.u32 %s3803_s11, 4  ;;  %p4421_p3 = scmp.eq.s32.totalorder %s3867_s10, 0  ;;  %s265_s12 = int_to_ptr.vmem [resolvable:$true] %s264_s12 }
   0x5   : > { %p3871_p2 = pnand %p3018_p0, %p246_p1  ;;  %s3804_s14 = smov [#allocation4]  }
   0x6   : > { %s280_s15 = sshll.u32 %s3804_s14, 4  ;;  %s3731_s19 = scalar_lea.hbm %s4414_s3, 16384  ;;  %s3884_s15 = int_to_ptr.vmem [resolvable:$true] %s280_s15 }
   0x7   : > { %s4423_s13 = scalar_select %p3871_p2, 1, 0 }
   0x8   : > { %p3548_p4 = pneg %p3871_p2  ;;  %p3732_p6 = scmp.ne.s32.totalorder %s4414_s3, %s3731_s19 }
   0x9   : > { %p3738_p10 = scmp.lt.u32.totalorder %s3731_s19, %s4414_s3 }
   0xa   : > { %p3880_p5 = pnand %p4421_p3, %p3548_p4 }
   0xc   : > { %p3733_p7 = pneg %p3880_p5 }
   0xe   : > { %p3734_p8 = pnand %p3733_p7, %p3732_p6 }
  0x10   : > { %p3735_p9 = pneg %p3734_p8 }
  0x12   : > { %p3740_p11 = pnand %p3738_p10, %p3735_p9 }
  0x14   : > { %3743 = shalt.err (!%p3740_p11)
}
  0x15   : > { %s3744_s24 = scalar_lea.vmem %s265_s12, 16384  ;;  %p3752_p1 = scmp.lt.s32.totalorder %s265_s12, %s265_s12 }
  0x16   : > { %p3745_p12 = scmp.ne.s32.totalorder %s265_s12, %s3744_s24  ;;  %p3753_p4 = scmp.lt.s32.totalorder %s3744_s24, %s3744_s24 }
  0x18   : > { %p3747_p13 = pnand %p3745_p12, %p3733_p7  ;;  %p3754_p3 = por %p3753_p4, %p3752_p1 }
  0x1a   : > { %p3748_p0 = pneg %p3747_p13 }
  0x1c   : > { %p3755_p2 = pnand %p3754_p3, %p3748_p0 }
  0x1e   : > { %3758 = shalt.err (!%p3755_p2)
}
  0x1f   : > { %s3805_s25 = smov 64   ;;  %s3806_s26 = smov 4  }
  0x20   : > { %3551 = dma.hbm_to_vmem [thread:$0]  (!%p3880_p5), %s4414_s3, 16384, %s265_s12, [#allocation3], %s3805_s25, %s3805_s25, %s3806_s26  }
  0x21   : > { %s3759_s14 = scalar_lea.hbm %s4416_s5, 2048 }
  0x22   : > { %p3760_p6 = scmp.ne.s32.totalorder %s4416_s5, %s3759_s14  ;;  %p3766_p8 = scmp.lt.u32.totalorder %s3759_s14, %s4416_s5 }
  0x24   : > { %p3762_p2 = pnand %p3760_p6, %p3733_p7 }
  0x26   : > { %p3763_p3 = pneg %p3762_p2 }
  0x28   : > { %p3768_p9 = pnand %p3766_p8, %p3763_p3 }
  0x2a   : > { %3771 = shalt.err (!%p3768_p9)
}
  0x2b   : > { %s3772_s12 = scalar_lea.vmem %s3884_s15, 2048  ;;  %p3780_p13 = scmp.lt.s32.totalorder %s3884_s15, %s3884_s15 }
  0x2c   : > { %p3773_p10 = scmp.ne.s32.totalorder %s3884_s15, %s3772_s12  ;;  %p3781_p0 = scmp.lt.s32.totalorder %s3772_s12, %s3772_s12 }
  0x2e   : > { %p3775_p11 = pnand %p3773_p10, %p3733_p7  ;;  %p3782_p1 = por %p3781_p0, %p3780_p13 }
  0x30   : > { %p3776_p12 = pneg %p3775_p11 }
  0x32   : > { %p3783_p4 = pnand %p3782_p1, %p3776_p12 }
  0x34   : > { %3786 = shalt.err (!%p3783_p4)
}
  0x35   : > { %3554 = dma.hbm_to_vmem [thread:$0]  (!%p3880_p5), %s4416_s5, 2048, %s3884_s15, [#allocation5], %s3805_s25, %s3805_s25, %s3806_s26  }
  0x36   : > { %p4425_p6 = scmp.ne.s32.totalorder %s4423_s13, 0 }
  0x37   : > { %p4426_p2 = scmp.eq.s32.totalorder (!%p4425_p6), %s3867_s10, 0 }
  0x38   : > { %313 = sbr.rel (%p4425_p6) target bundleno = 1081 (0x439), region = 56 }
  0x3f   : > { %3792 = dma.done.wait (%p4426_p2), [#allocation3], 16384   ;;  %p4427_p7 = pmov %p4426_p2 }
  0x40   : > { %p4428_p3 = pmov %p4426_p2 }
  0x41   : > { %3794 = vsyncadd (%p4427_p7), [#allocation3], 4294950912 }
  0x42   : > { %3796 = dma.done.wait (%p4428_p3), [#allocation5], 2048   ;;  %p4429_p8 = pmov %p4426_p2 }
  0x43   : > { %v378_v0 = vlaneseq  ;;  %v3807_v1 = vmov 1983009808   ;;  %v3808_v3 = vmov 0   ;;  %p352_p5 = scmp.lt.s32.totalorder %s3867_s10, 1  ;;  %v370_v7 = vld [vmem:[%s4412_s1] sm:$0xff]  ;;  %vm540_vm0 = vcmask 1041408  }
  0x44   : > { %3798 = vsyncadd (%p4429_p8), [#allocation5], 4294965248  ;;  %v464_v2 = vunpack.c.l.s4 %v3807_v1  ;;  %621 = vmatprep.mubr.bf16.mxu0 %v3808_v3  ;;  %682 = vmatprep.mubr.bf16.mxu1 %v3808_v3  ;;  %v371_v8 = vld [vmem:[%s4412_s1 + $0x8] sm:$0xff]  ;;  %v372_v9 = vld [vmem:[%s4412_s1 + $0x10] sm:$0xff]  ;;  %v462_v11 = vcombine.high %v370_v7, %v370_v7  ;;  %vm530_vm1 = vcmask 31744   ;;  %vm2638_vm2 = vcmask 1040384  }
  0x45   : > { %v3946_v4 = vshrl.u32 %v378_v0, 7  ;;  %s4431_s10 = smov (!%p352_p5, %s3867_s10), 1  ;;  %v479_v13 = vcombine.high %v371_v8, %v371_v8  ;;  %v496_v17 = vcombine.high %v372_v9, %v372_v9  ;;  %v373_v36 = vld [vmem:[%s4412_s1 + $0x18] sm:$0xff]  ;;  %v3579_v47 = vld [vmem:[#allocation2 + $0x40] sm:$0xff]   ;;  %v3583_v50 = vld [vmem:[#allocation2 + $0x48] sm:$0xff]   ;;  %vm2632_vm3 = vcmask 1043456  }
  0x46   : > { %v465_v5 = vunpack.c.0.s8 %v464_v2  ;;  %s3539_s13 = smul.u32 40, %s4431_s10  ;;  %v513_v38 = vcombine.high %v373_v36, %v373_v36  ;;  %v3581_v48 = vld [vmem:[#allocation2 + $0xc0] sm:$0xff]   ;;  %v3585_v52 = vld [vmem:[#allocation2 + $0xc8] sm:$0xff]   ;;  %v3587_v54 = vld [vmem:[#allocation2 + $0x50] sm:$0xff]   ;;  %vm3810_vm4 = vmmov 0   ;;  %s3026_s21 = sshll.u32 %s4431_s10, 2 }
  0x47   : > { %v3580_v49 = vld [vmem:[#allocation2] sm:$0xff]   ;;  %v3584_v53 = vld [vmem:[#allocation2 + $0x8] sm:$0xff]   ;;  %v3589_v56 = vld [vmem:[#allocation2 + $0xd0] sm:$0xff]   ;;  %s360_s23 = scalar_lea.vmem %s4420_s9, %s3026_s21 }
  0x48   : > { %v468_v6 = vsub.s32 %v465_v5, %v3946_v4  ;;  %s3959_s25 = scalar_lea.vmem %s4411_s0, %s3539_s13  ;;  %v3582_v51 = vld [vmem:[#allocation2 + $0x80] sm:$0xff]   ;;  %v3586_v55 = vld [vmem:[#allocation2 + $0x88] sm:$0xff]   ;;  %v3588_v57 = vld [vmem:[#allocation2 + $0x10] sm:$0xff]  }
  0x49   : > { %v362_v14 = vld [vmem:[%s3959_s25] sm:$0xff]  ;;  %v363_v15 = vld [vmem:[%s3959_s25 + $0x8] sm:$0xff]  ;;  %v364_v30 = vld [vmem:[%s3959_s25 + $0x10] sm:$0xff] }
  0x4a   : > { %v469_v10 = vrot.slane %v370_v7, %v468_v6  ;;  %v486_v12 = vrot.slane %v371_v8, %v468_v6  ;;  %v503_v16 = vrot.slane %v372_v9, %v468_v6  ;;  %v476_v20 = vrot.slane %v462_v11, %v468_v6  ;;  %v365_v33 = vld [vmem:[%s3959_s25 + $0x18] sm:$0xff]  ;;  %v366_v35 = vld [vmem:[%s3959_s25 + $0x20] sm:$0xf]  ;;  %v3590_v59 = vld [vmem:[#allocation2 + $0x90] sm:$0xff]  }
  0x4b   : > { %v493_v22 = vrot.slane %v479_v13, %v468_v6  ;;  %v3972_v25 = vpack.c.bf16 %v363_v15, %v362_v14  ;;  %v510_v27 = vrot.slane %v496_v17, %v468_v6  ;;  %v3988_v34 = vpack.c.bf16 %v365_v33, %v364_v30  ;;  %v3591_v58 = vld [vmem:[#allocation2 + $0x58] sm:$0xff]   ;;  %v3595_v63 = vld [vmem:[#allocation2 + $0x60] sm:$0xff]   ;;  %v3599_v5 = vld [vmem:[#allocation2 + $0x68] sm:$0xff]  }
  0x4c   : > { %v477_v18 = vcombine.high %v469_v10, %v469_v10  ;;  %v542_v19 = vsel %vm540_vm0, %v469_v10, 0  ;;  %v494_v21 = vcombine.high %v486_v12, %v486_v12  ;;  %v478_v23 = vcombine.high %v476_v20, %v476_v20  ;;  %v3593_v60 = vld [vmem:[#allocation2 + $0xd8] sm:$0xff]   ;;  %v3596_v0 = vld [vmem:[#allocation2 + $0x20] sm:$0xff]   ;;  %v3601_v7 = vld [vmem:[#allocation2 + $0xe8] sm:$0xff]  }
  0x4d   : > { %v548_v24 = vsel %vm540_vm0, %v476_v20, 0  ;;  %v495_v26 = vcombine.high %v493_v22, %v493_v22  ;;  %v554_v28 = vsel %vm540_vm0, %v486_v12, 0  ;;  %v511_v29 = vcombine.high %v503_v16, %v503_v16  ;;  %v3592_v61 = vld [vmem:[#allocation2 + $0x18] sm:$0xff]   ;;  %v3597_v1 = vld [vmem:[#allocation2 + $0xe0] sm:$0xff]   ;;  %v3602_v8 = vld [vmem:[#allocation2 + $0xa8] sm:$0xff]  }
  0x4e   : > { %3027 = vmatprep.subr.msk.bf16.mxu0 %vm540_vm0, %v477_v18  ;;  %3031 = vmatprep.subr.msk.bf16.mxu1 %vm540_vm0, %v478_v23  ;;  %v560_v31 = vsel %vm540_vm0, %v493_v22, 0  ;;  %v512_v32 = vcombine.high %v510_v27, %v510_v27  ;;  %v4001_v37 = vpack.c.bf16 %v366_v35, %v366_v35  ;;  %v520_v39 = vrot.slane %v373_v36, %v468_v6  ;;  %v3594_v62 = vld [vmem:[#allocation2 + $0x98] sm:$0xff]   ;;  %v3598_v2 = vld [vmem:[#allocation2 + $0xa0] sm:$0xff]   ;;  %v3605_v9 = vld [vmem:[#allocation2 + $0xf0] sm:$0xff]  }
  0x4f   : > { %590 = vmatpush1.bf16.msra.mxu0 %v542_v19  ;;  %651 = vmatpush1.bf16.msra.mxu1 %v548_v24  ;;  %v527_v40 = vrot.slane %v513_v38, %v468_v6  ;;  %v566_v41 = vsel %vm540_vm0, %v503_v16, 0  ;;  %v572_v42 = vsel %vm540_vm0, %v510_v27, 0  ;;  %v3600_v6 = vld [vmem:[#allocation2 + $0x28] sm:$0xff]   ;;  %v3604_v10 = vld [vmem:[#allocation2 + $0x30] sm:$0xff]   ;;  %v3607_v11 = vld [vmem:[#allocation2 + $0x78] sm:$0xff]   ;;  %v380_v18 = vsub.s32 0, %v3946_v4 }
  0x50   : > { %3035 = vmatprep.subr.msk.bf16.mxu0 %vm540_vm0, %v494_v21  ;;  %3039 = vmatprep.subr.msk.bf16.mxu1 %vm540_vm0, %v495_v26  ;;  %v578_v43 = vsel %vm540_vm0, %v520_v39, 0  ;;  %v528_v45 = vcombine.high %v520_v39, %v520_v39  ;;  %v3606_v12 = vld [vmem:[#allocation2 + $0xb0] sm:$0xff]   ;;  %v3609_v13 = vld [vmem:[#allocation2 + $0xf8] sm:$0xff]   ;;  %v3611_v15 = vld [vmem:[#allocation2 + $0x140] sm:$0xff]   ;;  %v384_v20 = vsub.s32 1, %v3946_v4  ;;  %v388_v21 = vsub.s32 2, %v3946_v4 }
  0x51   : > { %v584_v44 = vsel %vm540_vm0, %v527_v40, 0  ;;  %v529_v46 = vcombine.high %v527_v40, %v527_v40  ;;  %v3608_v14 = vld [vmem:[#allocation2 + $0x38] sm:$0xff]   ;;  %v3613_v17 = vld [vmem:[#allocation2 + $0x1c0] sm:$0xff]   ;;  %v392_v22 = vsub.s32 3, %v3946_v4 }
  0x52   : > { %3028 = vmatmul.mubr.msk.bf16.vlgmr.msra.gmra.mrb[0].mxu0 %vm530_vm1, %v3972_v25  ;;  %3032 = vmatmul.mubr.msk.bf16.vlgmr.msra.gmra.mrb[0].mxu1 %vm530_vm1, %v3972_v25  ;;  %v3610_v16 = vld [vmem:[#allocation2 + $0xb8] sm:$0xff]   ;;  %v4071_v19 = vld [vmem:[%s4413_s2] sm:$0xff] }
  0x53   : > { %631 = vmatprep.mubr.bf16.mxu0 %v3808_v3  ;;  %712 = vmatpush1.bf16.msra.mxu0 %v554_v28  ;;  %v4079_v23 = vrot.slane %v4071_v19, %v380_v18  ;;  %v4089_v27 = vrot.slane %v4071_v19, %v388_v21  ;;  %v4094_v30 = vrot.slane %v4071_v19, %v392_v22 }
  0x54   : > { %3043 = vmatprep.subr.msk.bf16.mxu0 %vm540_vm0, %v511_v29  ;;  %692 = vmatprep.mubr.bf16.mxu1 %v3808_v3 }
  0x55   : > { %773 = vmatpush1.bf16.msra.mxu1 %v560_v31 }
  0x56   : > { %3047 = vmatprep.subr.msk.bf16.mxu1 %vm540_vm0, %v512_v32 }
  0x5a   : > { %3029 = vmatmul.mubr.msk.bf16.gmra.mrb[4].mxu0 %vm530_vm1, %v3988_v34  ;;  %3033 = vmatmul.mubr.msk.bf16.gmra.mrb[4].mxu1 %vm530_vm1, %v3988_v34 }
  0x5b   : > { %641 = vmatprep.mubr.bf16.mxu0 %v3808_v3  ;;  %702 = vmatprep.mubr.bf16.mxu1 %v3808_v3 }
  0x62   : > { %3030 = vmatmul.mubr.msk.bf16.gmra.mrb[8].mxu0 %vm530_vm1, %v4001_v37  ;;  %3034 = vmatmul.mubr.msk.bf16.gmra.mrb[8].mxu1 %vm530_vm1, %v4001_v37 }
  0x63   : > { %743 = vmatprep.mubr.bf16.mxu0 %v3808_v3  ;;  %804 = vmatprep.mubr.bf16.mxu1 %v3808_v3 }
  0x6a   : > { %3036 = vmatmul.mubr.msk.bf16.vlgmr.msra.gmra.mrb[12].mxu0 %vm530_vm1, %v3972_v25  ;;  %3040 = vmatmul.mubr.msk.bf16.vlgmr.msra.gmra.mrb[12].mxu1 %vm530_vm1, %v3972_v25 }
  0x6b   : > { %753 = vmatprep.mubr.bf16.mxu0 %v3808_v3  ;;  %834 = vmatpush1.bf16.msra.mxu0 %v566_v41 }
  0x6c   : > { %3051 = vmatprep.subr.msk.bf16.mxu0 %vm540_vm0, %v528_v45  ;;  %814 = vmatprep.mubr.bf16.mxu1 %v3808_v3  ;;  %v3612_v45 = vld [vmem:[#allocation2 + $0x100] sm:$0xff]  }
  0x6d   : > { %895 = vmatpush1.bf16.msra.mxu1 %v572_v42 }
  0x6e   : > { %3055 = vmatprep.subr.msk.bf16.mxu1 %vm540_vm0, %v529_v46 }
  0x72   : > { %3037 = vmatmul.mubr.msk.bf16.gmra.mrb[16].mxu0 %vm530_vm1, %v3988_v34  ;;  %3041 = vmatmul.mubr.msk.bf16.gmra.mrb[16].mxu1 %vm530_vm1, %v3988_v34 }
  0x73   : > { %763 = vmatprep.mubr.bf16.mxu0 %v3808_v3  ;;  %824 = vmatprep.mubr.bf16.mxu1 %v3808_v3 }
  0x7a   : > { %3038 = vmatmul.mubr.msk.bf16.gmra.mrb[20].mxu0 %vm530_vm1, %v4001_v37  ;;  %3042 = vmatmul.mubr.msk.bf16.gmra.mrb[20].mxu1 %vm530_vm1, %v4001_v37 }
  0x7b   : > { %865 = vmatprep.mubr.bf16.mxu0 %v3808_v3  ;;  %926 = vmatprep.mubr.bf16.mxu1 %v3808_v3 }
  0x82   : > { %3044 = vmatmul.mubr.msk.bf16.vlgmr.msra.gmra.mrb[24].mxu0 %vm530_vm1, %v3972_v25  ;;  %3048 = vmatmul.mubr.msk.bf16.vlgmr.msra.gmra.mrb[24].mxu1 %vm530_vm1, %v3972_v25 }
  0x83   : > { %875 = vmatprep.mubr.bf16.mxu0 %v3808_v3  ;;  %956 = vmatpush1.bf16.msra.mxu0 %v578_v43 }
  0x84   : > { %3216 = vmatprep.subr.bf16.mxu0 %v3579_v47  ;;  %936 = vmatprep.mubr.bf16.mxu1 %v3808_v3  ;;  %v3615_v47 = vld [vmem:[#allocation2 + $0x148] sm:$0xff]  }
  0x85   : > { %1017 = vmatpush1.bf16.msra.mxu1 %v584_v44 }
  0x86   : > { %3250 = vmatprep.subr.bf16.mxu1 %v3581_v48 }
  0x8a   : > { %3045 = vmatmul.mubr.msk.bf16.gmra.mrb[28].mxu0 %vm530_vm1, %v3988_v34  ;;  %3049 = vmatmul.mubr.msk.bf16.gmra.mrb[28].mxu1 %vm530_vm1, %v3988_v34 }
  0x8b   : > { %885 = vmatprep.mubr.bf16.mxu0 %v3808_v3  ;;  %946 = vmatprep.mubr.bf16.mxu1 %v3808_v3 }
  0x92   : > { %3046 = vmatmul.mubr.msk.bf16.gmra.mrb[32].mxu0 %vm530_vm1, %v4001_v37  ;;  %3050 = vmatmul.mubr.msk.bf16.gmra.mrb[32].mxu1 %vm530_vm1, %v4001_v37 }
  0x93   : > { %987 = vmatprep.mubr.bf16.mxu0 %v3808_v3  ;;  %1048 = vmatprep.mubr.bf16.mxu1 %v3808_v3 }
  0x9a   : > { %3052 = vmatmul.mubr.msk.bf16.vlgmr.msra.gmra.mrb[36].mxu0 %vm530_vm1, %v3972_v25  ;;  %3056 = vmatmul.mubr.msk.bf16.vlgmr.msra.gmra.mrb[36].mxu1 %vm530_vm1, %v3972_v25  ;;  %v4084_v25 = vrot.slane %v4071_v19, %v384_v20 }
  0x9b   : > { %997 = vmatprep.mubr.bf16.mxu0 %v3808_v3  ;;  %3217 = vmatpush3.bf16.msra.mxu0 %v3580_v49 }
  0x9c   : > { %3218 = vmatprep.subr.bf16.mxu0 %v3583_v50  ;;  %1058 = vmatprep.mubr.bf16.mxu1 %v3808_v3  ;;  %v3614_v50 = vld [vmem:[#allocation2 + $0x180] sm:$0xff]  }
  0x9d   : > { %3251 = vmatpush3.bf16.msra.mxu1 %v3582_v51 }
  0x9e   : > { %3252 = vmatprep.subr.bf16.mxu1 %v3585_v52 }
  0x9f   : > { %3219 = vmatpush3.bf16.msra.mxu0 %v3584_v53  ;;  %v3617_v53 = vld [vmem:[#allocation2 + $0x1c8] sm:$0xff]  }
  0xa0   : > { %3220 = vmatprep.subr.bf16.mxu0 %v3587_v54 }
  0xa1   : > { %3253 = vmatpush3.bf16.msra.mxu1 %v3586_v55 }
  0xa2   : > { %3053 = vmatmul.mubr.msk.bf16.gmra.mrb[40].mxu0 %vm530_vm1, %v3988_v34  ;;  %3254 = vmatprep.subr.bf16.mxu1 %v3589_v56 }
  0xa3   : > { %1007 = vmatprep.mubr.bf16.mxu0 %v3808_v3  ;;  %3221 = vmatpush3.bf16.msra.mxu0 %v3588_v57  ;;  %v3616_v57 = vld [vmem:[#allocation2 + $0x108] sm:$0xff]  }
  0xa4   : > { %3057 = vmatmul.mubr.msk.bf16.gmra.mrb[40].mxu1 %vm530_vm1, %v3988_v34  ;;  %3222 = vmatprep.subr.bf16.mxu0 %v3591_v58 }
  0xa5   : > { %1068 = vmatprep.mubr.bf16.mxu1 %v3808_v3  ;;  %3255 = vmatpush3.bf16.msra.mxu1 %v3590_v59  ;;  %v3603_v3 = vld [vmem:[#allocation2 + $0x70] sm:$0xff]  }
  0xa6   : > { %3256 = vmatprep.subr.bf16.mxu1 %v3593_v60 }
  0xa7   : > { %3223 = vmatpush3.bf16.msra.mxu0 %v3592_v61 }
  0xa8   : > { %3224 = vmatprep.subr.bf16.mxu0 %v3595_v63 }
  0xa9   : > { %3257 = vmatpush3.bf16.msra.mxu1 %v3594_v62  ;;  %v3619_v62 = vld [vmem:[#allocation2 + $0x150] sm:$0xff]  }
  0xaa   : > { %3054 = vmatmul.mubr.msk.bf16.gmra.mrb[44].mxu0 %vm530_vm1, %v4001_v37  ;;  %3258 = vmatprep.subr.bf16.mxu1 %v3597_v1 }
  0xab   : > { %3225 = vmatpush3.bf16.msra.mxu0 %v3596_v0 }
  0xac   : > { %3058 = vmatmul.mubr.msk.bf16.gmra.mrb[44].mxu1 %vm530_vm1, %v4001_v37  ;;  %3226 = vmatprep.subr.bf16.mxu0 %v3599_v5 }
  0xad   : > { %3259 = vmatpush3.bf16.msra.mxu1 %v3598_v2  ;;  %v3618_v2 = vld [vmem:[#allocation2 + $0x188] sm:$0xff]  }
  0xae   : > { %3260 = vmatprep.subr.bf16.mxu1 %v3601_v7 }
  0xaf   : > { %3227 = vmatpush3.bf16.msra.mxu0 %v3600_v6 }
  0xb0   : > { %3228 = vmatprep.subr.bf16.mxu0 %v3603_v3 }
  0xb1   : > { %3261 = vmatpush3.bf16.msra.mxu1 %v3602_v8  ;;  %v3621_v8 = vld [vmem:[#allocation2 + $0x1d0] sm:$0xff]  }
  0xb2   : > { %3262 = vmatprep.subr.bf16.mxu1 %v3605_v9 }
  0xb3   : > { %3229 = vmatpush3.bf16.msra.mxu0 %v3604_v10  ;;  %v3620_v10 = vld [vmem:[#allocation2 + $0x110] sm:$0xff]  }
  0xb4   : > { %3230 = vmatprep.subr.bf16.mxu0 %v3607_v11 }
  0xb5   : > { %3263 = vmatpush3.bf16.msra.mxu1 %v3606_v12  ;;  %v3623_v12 = vld [vmem:[#allocation2 + $0x158] sm:$0xff]  }
  0xb6   : > { %3264 = vmatprep.subr.bf16.mxu1 %v3609_v13 }
  0xb7   : > { %3231 = vmatpush3.bf16.msra.mxu0 %v3608_v14 }
  0xb8   : > { %3284 = vmatprep.subr.bf16.mxu0 %v3611_v15  ;;  %v3622_v15 = vld [vmem:[#allocation2 + $0x190] sm:$0xff]  }
  0xb9   : > { %3265 = vmatpush3.bf16.msra.mxu1 %v3610_v16 }
  0xba   : > { %3318 = vmatprep.subr.bf16.mxu1 %v3613_v17 }
 0x125   : > { %v623_v24 = vpop.f32.mrb[0].mxu0  ;;  %v684_v29 = vpop.f32.mrb[0].mxu1 }
 0x126   : > { %v625_v26 = vpop.f32.mrb[1].mxu0  ;;  %v624_v31 = vadd.f32 %v623_v24, %v4079_v23  ;;  %v686_v34 = vpop.f32.mrb[1].mxu1  ;;  %v685_v39 = vadd.f32 %v684_v29, %v4089_v27  ;;  %v3625_v24 = vld [vmem:[#allocation2 + $0x1d8] sm:$0xff]  }
 0x127   : > { %v627_v28 = vpop.f32.mrb[2].mxu0  ;;  %v626_v35 = vadd.f32 %v625_v26, %v4084_v25  ;;  %v688_v37 = vpop.f32.mrb[2].mxu1  ;;  %v687_v43 = vadd.f32 %v686_v34, %v4094_v30  ;;  %v396_v26 = vsub.s32 4, %v3946_v4 }
 0x128   : > { %v628_v32 = vadd.f32 %v627_v28, %v4079_v23  ;;  %v629_v33 = vpop.f32.mrb[3].mxu0  ;;  %v689_v40 = vadd.f32 %v688_v37, %v4089_v27  ;;  %v690_v41 = vpop.f32.mrb[3].mxu1  ;;  %v404_v37 = vsub.s32 6, %v3946_v4 }
 0x129   : > { %v630_v36 = vadd.f32 %v629_v33, %v4084_v25  ;;  %v691_v44 = vadd.f32 %v690_v41, %v4094_v30  ;;  %v400_v33 = vsub.s32 5, %v3946_v4  ;;  %v408_v41 = vsub.s32 7, %v3946_v4 }
 0x12a   : > { %v1077_v38 = vpack.c.bf16 %v628_v32, %v624_v31  ;;  %v1079_v46 = vpack.c.bf16 %v689_v40, %v685_v39  ;;  %v3624_v31 = vld [vmem:[#allocation2 + $0x118] sm:$0xff]  }
 0x12b   : > { %v1078_v42 = vpack.c.bf16 %v630_v36, %v626_v35  ;;  %v1080_v48 = vpack.c.bf16 %v691_v44, %v687_v43  ;;  %v3626_v40 = vld [vmem:[#allocation2 + $0x198] sm:$0xff]   ;;  %v3629_v44 = vld [vmem:[#allocation2 + $0x1e0] sm:$0xff]  }
 0x12d   : > { %2188 = vmatprep.mubr.bf16.mxu0 %v1078_v42  ;;  %v633_v49 = vpop.f32.mrb[4].mxu0  ;;  %2244 = vmatprep.mubr.bf16.mxu1 %v1080_v48  ;;  %v694_v56 = vpop.f32.mrb[4].mxu1  ;;  %v3631_v48 = vld [vmem:[#allocation2 + $0x168] sm:$0xff]  }
 0x12e   : > { %v634_v51 = vadd.f32 %v633_v49, %v4079_v23  ;;  %2189 = vmatmul.mubr.bf16.vlgmr.msra.gmra.mrb[48].mxu0 %v1077_v38  ;;  %v635_v52 = vpop.f32.mrb[5].mxu0  ;;  %v695_v59 = vadd.f32 %v694_v56, %v4089_v27  ;;  %2245 = vmatmul.mubr.bf16.vlgmr.msra.gmra.mrb[48].mxu1 %v1079_v46  ;;  %v696_v61 = vpop.f32.mrb[5].mxu1  ;;  %v3628_v46 = vld [vmem:[#allocation2 + $0x120] sm:$0xff]   ;;  %v4133_v49 = vrot.slane %v4071_v19, %v404_v37  ;;  %v3632_v56 = vld [vmem:[#allocation2 + $0x128] sm:$0xff]  }
 0x12f   : > { %3285 = vmatpush3.bf16.msra.mxu0 %v3612_v45  ;;  %v636_v54 = vadd.f32 %v635_v52, %v4084_v25  ;;  %v637_v55 = vpop.f32.mrb[6].mxu0  ;;  %3319 = vmatpush3.bf16.msra.mxu1 %v3614_v50  ;;  %v697_v0 = vadd.f32 %v696_v61, %v4094_v30  ;;  %v698_v1 = vpop.f32.mrb[6].mxu1  ;;  %v3630_v50 = vld [vmem:[#allocation2 + $0x1a0] sm:$0xff]   ;;  %v4138_v52 = vrot.slane %v4071_v19, %v408_v41 }
 0x130   : > { %v638_v58 = vadd.f32 %v637_v55, %v4079_v23  ;;  %v639_v60 = vpop.f32.mrb[7].mxu0  ;;  %3286 = vmatprep.subr.bf16.mxu0 %v3615_v47  ;;  %v699_v6 = vadd.f32 %v698_v1, %v4089_v27  ;;  %v700_v7 = vpop.f32.mrb[7].mxu1  ;;  %3320 = vmatprep.subr.bf16.mxu1 %v3617_v53  ;;  %v3633_v55 = vld [vmem:[#allocation2 + $0x1e8] sm:$0xff]  }
 0x131   : > { %v640_v63 = vadd.f32 %v639_v60, %v4084_v25  ;;  %v701_v9 = vadd.f32 %v700_v7, %v4094_v30 }
 0x132   : > { %v1093_v5 = vpack.c.bf16 %v638_v58, %v634_v51  ;;  %v1095_v11 = vpack.c.bf16 %v699_v6, %v695_v59 }
 0x133   : > { %v1094_v3 = vpack.c.bf16 %v640_v63, %v636_v54  ;;  %3287 = vmatpush3.bf16.msra.mxu0 %v3616_v57  ;;  %v1096_v13 = vpack.c.bf16 %v701_v9, %v697_v0  ;;  %3321 = vmatpush3.bf16.msra.mxu1 %v3618_v2  ;;  %v3635_v63 = vld [vmem:[#allocation2 + $0x170] sm:$0xff]   ;;  %v3634_v0 = vld [vmem:[#allocation2 + $0x1a8] sm:$0xff]  }
 0x134   : > { %3288 = vmatprep.subr.bf16.mxu0 %v3619_v62  ;;  %3322 = vmatprep.subr.bf16.mxu1 %v3621_v8 }
 0x135   : > { %2196 = vmatprep.mubr.bf16.mxu0 %v1094_v3  ;;  %v643_v14 = vpop.f32.mrb[8].mxu0  ;;  %2252 = vmatprep.mubr.bf16.mxu1 %v1096_v13  ;;  %v704_v29 = vpop.f32.mrb[8].mxu1  ;;  %v3637_v3 = vld [vmem:[#allocation2 + $0x1f0] sm:$0xff]   ;;  %v3639_v13 = vld [vmem:[#allocation2 + $0x178] sm:$0xff]  }
 0x136   : > { %2197 = vmatmul.mubr.bf16.gmra.mrb[52].mxu0 %v1093_v5  ;;  %v644_v16 = vadd.f32 %v643_v14, %v4079_v23  ;;  %v645_v17 = vpop.f32.mrb[9].mxu0  ;;  %2253 = vmatmul.mubr.bf16.gmra.mrb[52].mxu1 %v1095_v11  ;;  %v705_v34 = vadd.f32 %v704_v29, %v4089_v27  ;;  %v706_v35 = vpop.f32.mrb[9].mxu1  ;;  %v3627_v23 = vld [vmem:[#allocation2 + $0x160] sm:$0xff]   ;;  %v4123_v27 = vrot.slane %v4071_v19, %v396_v26  ;;  %v3640_v29 = vld [vmem:[#allocation2 + $0x138] sm:$0xff]  }
 0x137   : > { %3289 = vmatpush3.bf16.msra.mxu0 %v3620_v10  ;;  %v646_v28 = vadd.f32 %v645_v17, %v4084_v25  ;;  %v647_v32 = vpop.f32.mrb[10].mxu0  ;;  %3323 = vmatpush3.bf16.msra.mxu1 %v3622_v15  ;;  %v707_v39 = vadd.f32 %v706_v35, %v4094_v30  ;;  %v708_v25 = vpop.f32.mrb[10].mxu1  ;;  %v4128_v30 = vrot.slane %v4071_v19, %v400_v33  ;;  %v3636_v10 = vld [vmem:[#allocation2 + $0x130] sm:$0xff]   ;;  %v3641_v17 = vld [vmem:[#allocation2 + $0x1f8] sm:$0xff]   ;;  %v3643_v35 = vld [vmem:[#allocation2 + $0x240] sm:$0xff]  }
 0x138   : > { %3290 = vmatprep.subr.bf16.mxu0 %v3623_v12  ;;  %v648_v36 = vpop.f32.mrb[11].mxu0  ;;  %v1109_v42 = vpack.c.bf16 %v644_v16, %v644_v16  ;;  %3324 = vmatprep.subr.bf16.mxu1 %v3625_v24  ;;  %v709_v43 = vpop.f32.mrb[11].mxu1  ;;  %v1111_v47 = vpack.c.bf16 %v705_v34, %v705_v34  ;;  %v3638_v15 = vld [vmem:[#allocation2 + $0x1b0] sm:$0xff]  }
 0x139   : > { %v1110_v38 = vpack.c.bf16 %v646_v28, %v646_v28  ;;  %v1112_v45 = vpack.c.bf16 %v707_v39, %v707_v39 }
 0x13b   : > { %3291 = vmatpush3.bf16.msra.mxu0 %v3624_v31  ;;  %2204 = vmatprep.mubr.bf16.mxu0 %v1110_v38 }
 0x13c   : > { %3292 = vmatprep.subr.bf16.mxu0 %v3627_v23  ;;  %3325 = vmatpush3.bf16.msra.mxu1 %v3626_v40  ;;  %v3642_v40 = vld [vmem:[#allocation2 + $0x1b8] sm:$0xff]  }
 0x13d   : > { %2260 = vmatprep.mubr.bf16.mxu1 %v1112_v45  ;;  %v745_v51 = vpop.f32.mrb[12].mxu0  ;;  %3326 = vmatprep.subr.bf16.mxu1 %v3629_v44  ;;  %v806_v59 = vpop.f32.mrb[12].mxu1  ;;  %v3645_v45 = vld [vmem:[#allocation2 + $0x2c0] sm:$0xff]  }
 0x13e   : > { %2205 = vmatmul.mubr.bf16.gmra.mrb[56].mxu0 %v1109_v42  ;;  %v4141_v53 = vadd.f32 %v745_v51, %v4123_v27  ;;  %v747_v54 = vpop.f32.mrb[13].mxu0  ;;  %2261 = vmatmul.mubr.bf16.gmra.mrb[56].mxu1 %v1111_v47  ;;  %v4148_v19 = vadd.f32 %v806_v59, %v4133_v49  ;;  %v808_v62 = vpop.f32.mrb[13].mxu1 }
 0x13f   : > { %3293 = vmatpush3.bf16.msra.mxu0 %v3628_v46  ;;  %v748_v57 = vadd.f32 %v747_v54, %v4128_v30  ;;  %v749_v58 = vpop.f32.mrb[14].mxu0  ;;  %v809_v2 = vadd.f32 %v808_v62, %v4138_v52  ;;  %v810_v5 = vpop.f32.mrb[14].mxu1  ;;  %v3647_v54 = vld [vmem:[#allocation2 + $0x248] sm:$0xff]  }
 0x140   : > { %3294 = vmatprep.subr.bf16.mxu0 %v3631_v48  ;;  %v4145_v60 = vadd.f32 %v749_v58, %v4123_v27  ;;  %v751_v61 = vpop.f32.mrb[15].mxu0  ;;  %3327 = vmatpush3.bf16.msra.mxu1 %v3630_v50  ;;  %v4155_v7 = vadd.f32 %v810_v5, %v4133_v49  ;;  %v812_v8 = vpop.f32.mrb[15].mxu1  ;;  %v3644_v48 = vld [vmem:[#allocation2 + $0x200] sm:$0xff]   ;;  %v3649_v58 = vld [vmem:[#allocation2 + $0x2c8] sm:$0xff]  }
 0x141   : > { %v752_v1 = vadd.f32 %v751_v61, %v4128_v30  ;;  %3328 = vmatprep.subr.bf16.mxu1 %v3633_v55  ;;  %v813_v11 = vadd.f32 %v812_v8, %v4138_v52  ;;  %v3646_v55 = vld [vmem:[#allocation2 + $0x280] sm:$0xff]   ;;  %v3650_v5 = vld [vmem:[#allocation2 + $0x288] sm:$0xff]  }
 0x142   : > { %v1081_v6 = vpack.c.bf16 %v4145_v60, %v4141_v53  ;;  %v1083_v12 = vpack.c.bf16 %v4155_v7, %v4148_v19  ;;  %v3648_v60 = vld [vmem:[#allocation2 + $0x208] sm:$0xff]  }
 0x143   : > { %3295 = vmatpush3.bf16.msra.mxu0 %v3632_v56  ;;  %v1082_v9 = vpack.c.bf16 %v752_v1, %v748_v57  ;;  %v1084_v14 = vpack.c.bf16 %v813_v11, %v809_v2 }
 0x144   : > { %3296 = vmatprep.subr.bf16.mxu0 %v3635_v63  ;;  %3329 = vmatpush3.bf16.msra.mxu1 %v3634_v0  ;;  %v4178_v63 = vld [vmem:[%s4413_s2 + $0x8] sm:$0xff]  ;;  %v3651_v0 = vld [vmem:[#allocation2 + $0x250] sm:$0xff]  }
 0x145   : > { %2300 = vmatprep.mubr.bf16.mxu0 %v1082_v9  ;;  %v755_v16 = vpop.f32.mrb[16].mxu0  ;;  %3330 = vmatprep.subr.bf16.mxu1 %v3637_v3  ;;  %v816_v34 = vpop.f32.mrb[16].mxu1  ;;  %v4184_v3 = vrot.slane %v4178_v63, %v380_v18  ;;  %v3652_v9 = vld [vmem:[#allocation2 + $0x210] sm:$0xff]   ;;  %v4189_v11 = vrot.slane %v4178_v63, %v384_v20 }
 0x146   : > { %v4161_v24 = vadd.f32 %v755_v16, %v4123_v27  ;;  %v757_v28 = vpop.f32.mrb[17].mxu0  ;;  %2356 = vmatprep.mubr.bf16.mxu1 %v1084_v14  ;;  %v4166_v23 = vadd.f32 %v816_v34, %v4133_v49  ;;  %v818_v39 = vpop.f32.mrb[17].mxu1  ;;  %v3657_v16 = vld [vmem:[#allocation2 + $0x2d8] sm:$0xff]  }
 0x147   : > { %3297 = vmatpush3.bf16.msra.mxu0 %v3636_v10  ;;  %v758_v31 = vadd.f32 %v757_v28, %v4128_v30  ;;  %v759_v32 = vpop.f32.mrb[18].mxu0  ;;  %v819_v42 = vadd.f32 %v818_v39, %v4138_v52  ;;  %v820_v43 = vpop.f32.mrb[18].mxu1 }
 0x148   : > { %3298 = vmatprep.subr.bf16.mxu0 %v3639_v13  ;;  %v760_v36 = vadd.f32 %v759_v32, %v4123_v27  ;;  %v761_v38 = vpop.f32.mrb[19].mxu0  ;;  %3331 = vmatpush3.bf16.msra.mxu1 %v3638_v15  ;;  %v821_v46 = vadd.f32 %v820_v43, %v4133_v49  ;;  %v822_v47 = vpop.f32.mrb[19].mxu1  ;;  %v3654_v13 = vld [vmem:[#allocation2 + $0x290] sm:$0xff]   ;;  %v4199_v15 = vrot.slane %v4178_v63, %v392_v22  ;;  %v3659_v32 = vld [vmem:[#allocation2 + $0x260] sm:$0xff]  }
 0x149   : > { %v762_v25 = vadd.f32 %v761_v38, %v4128_v30  ;;  %3332 = vmatprep.subr.bf16.mxu1 %v3641_v17  ;;  %v823_v51 = vadd.f32 %v822_v47, %v4138_v52 }
 0x14a   : > { %v1097_v44 = vpack.c.bf16 %v760_v36, %v4161_v24  ;;  %v1099_v53 = vpack.c.bf16 %v821_v46, %v4166_v23  ;;  %v3658_v23 = vld [vmem:[#allocation2 + $0x298] sm:$0xff]  }
 0x14b   : > { %3299 = vmatpush3.bf16.msra.mxu0 %v3640_v29  ;;  %v1098_v50 = vpack.c.bf16 %v762_v25, %v758_v31  ;;  %v1100_v56 = vpack.c.bf16 %v823_v51, %v819_v42 }
 0x14c   : > { %3352 = vmatprep.subr.bf16.mxu0 %v3643_v35  ;;  %3333 = vmatpush3.bf16.msra.mxu1 %v3642_v40 }
 0x14d   : > { %v765_v57 = vpop.f32.mrb[20].mxu0  ;;  %3386 = vmatprep.subr.bf16.mxu1 %v3645_v45  ;;  %v826_v61 = vpop.f32.mrb[20].mxu1  ;;  %v3660_v45 = vld [vmem:[#allocation2 + $0x220] sm:$0xff]  }
 0x14e   : > { %2301 = vmatmul.mubr.bf16.vlgmr.msra.gmra.mrb[60].mxu0 %v1081_v6  ;;  %v767_v59 = vpop.f32.mrb[21].mxu0  ;;  %v828_v1 = vpop.f32.mrb[21].mxu1  ;;  %v766_v20 = vadd.f32 %v765_v57, %v4123_v27  ;;  %v827_v22 = vadd.f32 %v826_v61, %v4133_v49  ;;  %v3661_v49 = vld [vmem:[#allocation2 + $0x2e0] sm:$0xff]  }
 0x14f   : > { %3353 = vmatpush3.bf16.msra.mxu0 %v3644_v48  ;;  %2308 = vmatprep.mubr.bf16.mxu0 %v1098_v50  ;;  %v768_v19 = vadd.f32 %v767_v59, %v4128_v30  ;;  %v769_v62 = vpop.f32.mrb[22].mxu0  ;;  %v829_v6 = vadd.f32 %v828_v1, %v4138_v52  ;;  %v830_v7 = vpop.f32.mrb[22].mxu1  ;;  %v3653_v30 = vld [vmem:[#allocation2 + $0x2d0] sm:$0xff]   ;;  %v4194_v52 = vrot.slane %v4178_v63, %v388_v21  ;;  %v3656_v21 = vld [vmem:[#allocation2 + $0x218] sm:$0xff]   ;;  %v3663_v50 = vld [vmem:[#allocation2 + $0x268] sm:$0xff]  }
 0x150   : > { %2357 = vmatmul.mubr.bf16.vlgmr.msra.gmra.mrb[60].mxu1 %v1083_v12  ;;  %3354 = vmatprep.subr.bf16.mxu0 %v3647_v54  ;;  %v770_v2 = vpop.f32.mrb[23].mxu0  ;;  %v831_v8 = vpop.f32.mrb[23].mxu1  ;;  %v3655_v12 = vld [vmem:[#allocation2 + $0x258] sm:$0xff]   ;;  %v1113_v25 = vpack.c.bf16 %v766_v20, %v766_v20  ;;  %v1115_v48 = vpack.c.bf16 %v827_v22, %v827_v22  ;;  %v3664_v59 = vld [vmem:[#allocation2 + $0x228] sm:$0xff]   ;;  %v3667_v62 = vld [vmem:[#allocation2 + $0x270] sm:$0xff]  }
 0x151   : > { %3387 = vmatpush3.bf16.msra.mxu1 %v3646_v55  ;;  %2364 = vmatprep.mubr.bf16.mxu1 %v1100_v56  ;;  %v1114_v10 = vpack.c.bf16 %v768_v19, %v768_v19  ;;  %v1116_v14 = vpack.c.bf16 %v829_v6, %v829_v6  ;;  %v3665_v56 = vld [vmem:[#allocation2 + $0x2e8] sm:$0xff]  }
 0x152   : > { %3388 = vmatprep.subr.bf16.mxu1 %v3649_v58  ;;  %v3666_v6 = vld [vmem:[#allocation2 + $0x2a8] sm:$0xff]  }
 0x153   : > { %3355 = vmatpush3.bf16.msra.mxu0 %v3648_v60 }
 0x154   : > { %3356 = vmatprep.subr.bf16.mxu0 %v3651_v0 }
 0x155   : > { %3389 = vmatpush3.bf16.msra.mxu1 %v3650_v5  ;;  %v867_v18 = vpop.f32.mrb[24].mxu0  ;;  %v928_v31 = vpop.f32.mrb[24].mxu1 }
 0x156   : > { %2309 = vmatmul.mubr.bf16.gmra.mrb[64].mxu0 %v1097_v44  ;;  %3390 = vmatprep.subr.bf16.mxu1 %v3653_v30  ;;  %v4203_v17 = vadd.f32 %v867_v18, %v4184_v3  ;;  %v869_v24 = vpop.f32.mrb[25].mxu0  ;;  %v4211_v34 = vadd.f32 %v928_v31, %v4194_v52  ;;  %v930_v36 = vpop.f32.mrb[25].mxu1  ;;  %v3673_v31 = vld [vmem:[#allocation2 + $0x2f8] sm:$0xff]  }
 0x157   : > { %3357 = vmatpush3.bf16.msra.mxu0 %v3652_v9  ;;  %2316 = vmatprep.mubr.bf16.mxu0 %v1114_v10  ;;  %v870_v28 = vadd.f32 %v869_v24, %v4189_v11  ;;  %v871_v29 = vpop.f32.mrb[26].mxu0  ;;  %v931_v39 = vadd.f32 %v930_v36, %v4199_v15  ;;  %v932_v40 = vpop.f32.mrb[26].mxu1  ;;  %v3669_v9 = vld [vmem:[#allocation2 + $0x2f0] sm:$0xff]  }
 0x158   : > { %2365 = vmatmul.mubr.bf16.gmra.mrb[64].mxu1 %v1099_v53  ;;  %3358 = vmatprep.subr.bf16.mxu0 %v3655_v12  ;;  %v4208_v27 = vadd.f32 %v871_v29, %v4184_v3  ;;  %v873_v35 = vpop.f32.mrb[27].mxu0  ;;  %v4218_v43 = vadd.f32 %v932_v40, %v4194_v52  ;;  %v934_v44 = vpop.f32.mrb[27].mxu1  ;;  %v3662_v53 = vld [vmem:[#allocation2 + $0x2a0] sm:$0xff]  }
 0x159   : > { %3391 = vmatpush3.bf16.msra.mxu1 %v3654_v13  ;;  %2372 = vmatprep.mubr.bf16.mxu1 %v1116_v14  ;;  %v874_v38 = vadd.f32 %v873_v35, %v4189_v11  ;;  %v935_v47 = vadd.f32 %v934_v44, %v4199_v15  ;;  %v3668_v14 = vld [vmem:[#allocation2 + $0x230] sm:$0xff]   ;;  %v3672_v35 = vld [vmem:[#allocation2 + $0x238] sm:$0xff]  }
 0x15a   : > { %3392 = vmatprep.subr.bf16.mxu1 %v3657_v16  ;;  %v1085_v42 = vpack.c.bf16 %v4208_v27, %v4203_v17  ;;  %v1087_v51 = vpack.c.bf16 %v4218_v43, %v4211_v34  ;;  %v3671_v16 = vld [vmem:[#allocation2 + $0x278] sm:$0xff]   ;;  %v3683_v17 = vld [vmem:[#allocation2 + $0x350] sm:$0xff]  }
 0x15b   : > { %3359 = vmatpush3.bf16.msra.mxu0 %v3656_v21  ;;  %v1086_v46 = vpack.c.bf16 %v874_v38, %v870_v28  ;;  %v1088_v54 = vpack.c.bf16 %v935_v47, %v931_v39  ;;  %v3670_v21 = vld [vmem:[#allocation2 + $0x2b0] sm:$0xff]   ;;  %v3675_v38 = vld [vmem:[#allocation2 + $0x340] sm:$0xff]  }
 0x15c   : > { %3360 = vmatprep.subr.bf16.mxu0 %v3659_v32  ;;  %v3676_v47 = vld [vmem:[#allocation2 + $0x300] sm:$0xff]  }
 0x15d   : > { %3393 = vmatpush3.bf16.msra.mxu1 %v3658_v23  ;;  %v877_v55 = vpop.f32.mrb[28].mxu0  ;;  %v938_v61 = vpop.f32.mrb[28].mxu1 }
 0x15e   : > { %2317 = vmatmul.mubr.bf16.gmra.mrb[68].mxu0 %v1113_v25  ;;  %3394 = vmatprep.subr.bf16.mxu1 %v3661_v49  ;;  %v4224_v57 = vadd.f32 %v877_v55, %v4184_v3  ;;  %v879_v58 = vpop.f32.mrb[29].mxu0  ;;  %v4233_v1 = vadd.f32 %v938_v61, %v4194_v52  ;;  %v940_v5 = vpop.f32.mrb[29].mxu1  ;;  %v3674_v49 = vld [vmem:[#allocation2 + $0x2b8] sm:$0xff]  }
 0x15f   : > { %3361 = vmatpush3.bf16.msra.mxu0 %v3660_v45  ;;  %2412 = vmatprep.mubr.bf16.mxu0 %v1086_v46  ;;  %v4227_v60 = vadd.f32 %v879_v58, %v4189_v11  ;;  %v881_v19 = vpop.f32.mrb[30].mxu0  ;;  %v4237_v30 = vadd.f32 %v940_v5, %v4199_v15  ;;  %v942_v8 = vpop.f32.mrb[30].mxu1  ;;  %v3677_v45 = vld [vmem:[#allocation2 + $0x3c0] sm:$0xff]  }
 0x160   : > { %2373 = vmatmul.mubr.bf16.gmra.mrb[68].mxu1 %v1115_v48  ;;  %3362 = vmatprep.subr.bf16.mxu0 %v3663_v50  ;;  %v4230_v0 = vadd.f32 %v881_v19, %v4184_v3  ;;  %v883_v2 = vpop.f32.mrb[31].mxu0  ;;  %v4242_v12 = vadd.f32 %v942_v8, %v4194_v52  ;;  %v944_v13 = vpop.f32.mrb[31].mxu1  ;;  %v3679_v48 = vld [vmem:[#allocation2 + $0x348] sm:$0xff]   ;;  %v4268_v50 = vrot.slane %v4178_v63, %v404_v37  ;;  %v3687_v8 = vld [vmem:[#allocation2 + $0x358] sm:$0xff]  }
 0x161   : > { %3395 = vmatpush3.bf16.msra.mxu1 %v3662_v53  ;;  %2468 = vmatprep.mubr.bf16.mxu1 %v1088_v54  ;;  %v884_v7 = vadd.f32 %v883_v2, %v4189_v11  ;;  %v945_v20 = vadd.f32 %v944_v13, %v4199_v15  ;;  %v3678_v53 = vld [vmem:[#allocation2 + $0x380] sm:$0xff]   ;;  %v3680_v37 = vld [vmem:[#allocation2 + $0x308] sm:$0xff]   ;;  %v3686_v13 = vld [vmem:[#allocation2 + $0x390] sm:$0xff]  }
 0x162   : > { %3396 = vmatprep.subr.bf16.mxu1 %v3665_v56  ;;  %v1101_v10 = vpack.c.bf16 %v4230_v0, %v4224_v57  ;;  %v1103_v24 = vpack.c.bf16 %v4242_v12, %v4233_v1  ;;  %v3691_v57 = vld [vmem:[#allocation2 + $0x360] sm:$0xff]  }
 0x163   : > { %3363 = vmatpush3.bf16.msra.mxu0 %v3664_v59  ;;  %v1102_v18 = vpack.c.bf16 %v884_v7, %v4227_v60  ;;  %v1104_v28 = vpack.c.bf16 %v945_v20, %v4237_v30 }
 0x164   : > { %3364 = vmatprep.subr.bf16.mxu0 %v3667_v62 }
 0x165   : > { %3397 = vmatpush3.bf16.msra.mxu1 %v3666_v6  ;;  %v887_v29 = vpop.f32.mrb[32].mxu0  ;;  %v948_v36 = vpop.f32.mrb[32].mxu1  ;;  %v3684_v6 = vld [vmem:[#allocation2 + $0x310] sm:$0xff]  }
 0x166   : > { %3398 = vmatprep.subr.bf16.mxu1 %v3669_v9  ;;  %v4250_v22 = vadd.f32 %v887_v29, %v4184_v3  ;;  %v889_v32 = vpop.f32.mrb[33].mxu0  ;;  %v4253_v39 = vadd.f32 %v948_v36, %v4194_v52  ;;  %v950_v40 = vpop.f32.mrb[33].mxu1  ;;  %v4258_v3 = vrot.slane %v4178_v63, %v396_v26  ;;  %v4263_v52 = vrot.slane %v4178_v63, %v400_v33  ;;  %v3681_v33 = vld [vmem:[#allocation2 + $0x3c8] sm:$0xff]   ;;  %v3688_v29 = vld [vmem:[#allocation2 + $0x318] sm:$0xff]  }
 0x167   : > { %3365 = vmatpush3.bf16.msra.mxu0 %v3668_v14  ;;  %v891_v23 = vpop.f32.mrb[34].mxu0  ;;  %v952_v44 = vpop.f32.mrb[34].mxu1  ;;  %v4273_v26 = vrot.slane %v4178_v63, %v408_v41  ;;  %v890_v58 = vadd.f32 %v889_v32, %v4189_v11  ;;  %v3682_v11 = vld [vmem:[#allocation2 + $0x388] sm:$0xff]   ;;  %v951_v19 = vadd.f32 %v950_v40, %v4199_v15 }
 0x168   : > { %3366 = vmatprep.subr.bf16.mxu0 %v3671_v16  ;;  %v892_v25 = vpop.f32.mrb[35].mxu0  ;;  %v953_v46 = vpop.f32.mrb[35].mxu1  ;;  %v3689_v16 = vld [vmem:[#allocation2 + $0x3d8] sm:$0xff]   ;;  %v1117_v12 = vpack.c.bf16 %v4250_v22, %v4250_v22  ;;  %v3695_v22 = vld [vmem:[#allocation2 + $0x368] sm:$0xff]  }
 0x169   : > { %3399 = vmatpush3.bf16.msra.mxu1 %v3670_v21  ;;  %v1118_v7 = vpack.c.bf16 %v890_v58, %v890_v58  ;;  %v1120_v14 = vpack.c.bf16 %v951_v19, %v951_v19  ;;  %v3692_v46 = vld [vmem:[#allocation2 + $0x320] sm:$0xff]   ;;  %v3697_v58 = vld [vmem:[#allocation2 + $0x3e8] sm:$0xff]  }
 0x16a   : > { %3400 = vmatprep.subr.bf16.mxu1 %v3673_v31 }
 0x16b   : > { %3367 = vmatpush3.bf16.msra.mxu0 %v3672_v35 }
 0x16c   : > { %3420 = vmatprep.subr.bf16.mxu0 %v3675_v38  ;;  %v3690_v38 = vld [vmem:[#allocation2 + $0x398] sm:$0xff]  }
 0x16d   : > { %3401 = vmatpush3.bf16.msra.mxu1 %v3674_v49  ;;  %v989_v54 = vpop.f32.mrb[36].mxu0  ;;  %v1050_v63 = vpop.f32.mrb[36].mxu1 }
 0x16e   : > { %2413 = vmatmul.mubr.bf16.vlgmr.msra.gmra.mrb[72].mxu0 %v1085_v42  ;;  %3454 = vmatprep.subr.bf16.mxu1 %v3677_v45  ;;  %v4279_v55 = vadd.f32 %v989_v54, %v4258_v3  ;;  %v991_v56 = vpop.f32.mrb[37].mxu0  ;;  %v4292_v42 = vadd.f32 %v1050_v63, %v4268_v50  ;;  %v1052_v60 = vpop.f32.mrb[37].mxu1  ;;  %v3696_v63 = vld [vmem:[#allocation2 + $0x328] sm:$0xff]  }
 0x16f   : > { %3421 = vmatpush3.bf16.msra.mxu0 %v3676_v47  ;;  %2420 = vmatprep.mubr.bf16.mxu0 %v1102_v18  ;;  %v4283_v4 = vadd.f32 %v991_v56, %v4263_v52  ;;  %v993_v41 = vpop.f32.mrb[38].mxu0  ;;  %v4299_v34 = vadd.f32 %v1052_v60, %v4273_v26  ;;  %v1054_v43 = vpop.f32.mrb[38].mxu1 }
 0x170   : > { %2469 = vmatmul.mubr.bf16.vlgmr.msra.gmra.mrb[72].mxu1 %v1087_v51  ;;  %3422 = vmatprep.subr.bf16.mxu0 %v3679_v48  ;;  %v4289_v27 = vadd.f32 %v993_v41, %v4258_v3  ;;  %v995_v59 = vpop.f32.mrb[39].mxu0  ;;  %v3685_v51 = vld [vmem:[#allocation2 + $0x3d0] sm:$0xff]   ;;  %v4304_v2 = vadd.f32 %v1054_v43, %v4268_v50  ;;  %v1056_v5 = vpop.f32.mrb[39].mxu1 }
 0x171   : > { %3455 = vmatpush3.bf16.msra.mxu1 %v3678_v53  ;;  %2476 = vmatprep.mubr.bf16.mxu1 %v1104_v28  ;;  %v4296_v61 = vadd.f32 %v995_v59, %v4263_v52  ;;  %v4309_v30 = vadd.f32 %v1056_v5, %v4273_v26  ;;  %v1119_v53 = vpack.c.bf16 %v4253_v39, %v4253_v39  ;;  %v3699_v59 = vld [vmem:[#allocation2 + $0x370] sm:$0xff]   ;;  %v3703_v5 = vld [vmem:[#allocation2 + $0x378] sm:$0xff]  }
 0x172   : > { %3456 = vmatprep.subr.bf16.mxu1 %v3681_v33  ;;  %v1089_v62 = vpack.c.bf16 %v4289_v27, %v4279_v55  ;;  %v1091_v9 = vpack.c.bf16 %v4304_v2, %v4292_v42  ;;  %v3694_v33 = vld [vmem:[#allocation2 + $0x3a0] sm:$0xff]   ;;  %v3701_v43 = vld [vmem:[#allocation2 + $0x3f0] sm:$0xff]   ;;  %v3709_v27 = vld [vmem:[#allocation4 + $0x48] sm:$0xff]  }
 0x173   : > { %3423 = vmatpush3.bf16.msra.mxu0 %v3680_v37  ;;  %v1090_v15 = vpack.c.bf16 %v4296_v61, %v4283_v4  ;;  %v1092_v18 = vpack.c.bf16 %v4309_v30, %v4299_v34  ;;  %v3698_v61 = vld [vmem:[#allocation2 + $0x3a8] sm:$0xff]   ;;  %v3707_v55 = vld [vmem:[#allocation4 + $0x40] sm:$0xff]   ;;  %v3713_v2 = vld [vmem:[#allocation4 + $0x58] sm:$0xff]  }
 0x174   : > { %3424 = vmatprep.subr.bf16.mxu0 %v3683_v17  ;;  %v3710_v42 = vld [vmem:[#allocation4 + $0x8] sm:$0xff]  }
 0x175   : > { %3457 = vmatpush3.bf16.msra.mxu1 %v3682_v11  ;;  %v999_v20 = vpop.f32.mrb[40].mxu0 }
 0x176   : > { %2421 = vmatmul.mubr.bf16.gmra.mrb[76].mxu0 %v1101_v10  ;;  %3458 = vmatprep.subr.bf16.mxu1 %v3685_v51  ;;  %v4319_v21 = vadd.f32 %v999_v20, %v4258_v3  ;;  %v1001_v28 = vpop.f32.mrb[41].mxu0  ;;  %v3700_v51 = vld [vmem:[#allocation2 + $0x330] sm:$0xff]  }
 0x177   : > { %3425 = vmatpush3.bf16.msra.mxu0 %v3684_v6  ;;  %2428 = vmatprep.mubr.bf16.mxu0 %v1118_v7  ;;  %v4322_v31 = vadd.f32 %v1001_v28, %v4263_v52  ;;  %v1003_v32 = vpop.f32.mrb[42].mxu0  ;;  %v1060_v35 = vpop.f32.mrb[40].mxu1  ;;  %v3702_v6 = vld [vmem:[#allocation2 + $0x3b0] sm:$0xff]   ;;  %v3705_v7 = vld [vmem:[#allocation2 + $0x3f8] sm:$0xff]   ;;  %v3717_v28 = vld [vmem:[#allocation4 + $0x68] sm:$0xff]  }
 0x178   : > { %2477 = vmatmul.mubr.bf16.gmra.mrb[76].mxu1 %v1103_v24  ;;  %3426 = vmatprep.subr.bf16.mxu0 %v3687_v8  ;;  %v4328_v0 = vadd.f32 %v1003_v32, %v4258_v3  ;;  %v4331_v10 = vadd.f32 %v1060_v35, %v4268_v50  ;;  %v1005_v36 = vpop.f32.mrb[43].mxu0  ;;  %v1062_v23 = vpop.f32.mrb[41].mxu1  ;;  %v3693_v24 = vld [vmem:[#allocation2 + $0x3e0] sm:$0xff]   ;;  %v3720_v32 = vld [vmem:[#allocation4 + $0x30] sm:$0xff]   ;;  %v3721_v35 = vld [vmem:[#allocation4 + $0x78] sm:$0xff]  }
 0x179   : > { %3459 = vmatpush3.bf16.msra.mxu1 %v3686_v13  ;;  %2484 = vmatprep.mubr.bf16.mxu1 %v1120_v14  ;;  %v1006_v40 = vadd.f32 %v1005_v36, %v4263_v52  ;;  %v4335_v25 = vadd.f32 %v1062_v23, %v4273_v26  ;;  %v1064_v1 = vpop.f32.mrb[42].mxu1 }
 0x17a   : > { %3460 = vmatprep.subr.bf16.mxu1 %v3689_v16  ;;  %v1105_v49 = vpack.c.bf16 %v4328_v0, %v4319_v21  ;;  %v4342_v44 = vadd.f32 %v1064_v1, %v4268_v50  ;;  %v1066_v45 = vpop.f32.mrb[43].mxu1  ;;  %v3715_v16 = vld [vmem:[#allocation4 + $0x60] sm:$0xff]  }
 0x17b   : > { %3427 = vmatpush3.bf16.msra.mxu0 %v3688_v29  ;;  %v1106_v47 = vpack.c.bf16 %v1006_v40, %v4322_v31  ;;  %v1067_v48 = vadd.f32 %v1066_v45, %v4273_v26  ;;  %v3716_v21 = vld [vmem:[#allocation4 + $0x20] sm:$0xff]   ;;  %v3718_v29 = vld [vmem:[#allocation4 + $0x28] sm:$0xff]   ;;  %v3719_v31 = vld [vmem:[#allocation4 + $0x70] sm:$0xff]  }
 0x17c   : > { %3428 = vmatprep.subr.bf16.mxu0 %v3691_v57  ;;  %v1107_v54 = vpack.c.bf16 %v4342_v44, %v4331_v10  ;;  %v3722_v57 = vld [vmem:[#allocation4 + $0x38] sm:$0xff]   ;;  %v3059_v10 = vld [vmem:[%s4415_s4] ss:$0 sm:$0xff] }
 0x17d   : > { %3461 = vmatpush3.bf16.msra.mxu1 %v3690_v38  ;;  %v1108_v56 = vpack.c.bf16 %v1067_v48, %v4335_v25  ;;  %v1009_v37 = vpop.f32.mrb[44].mxu0  ;;  %v3723_v45 = vld [vmem:[%s4418_s7] sm:$0xff]  }
 0x17e   : > { %2429 = vmatmul.mubr.bf16.gmra.mrb[80].mxu0 %v1117_v12  ;;  %3462 = vmatprep.subr.bf16.mxu1 %v3693_v24  ;;  %v1010_v4 = vadd.f32 %v1009_v37, %v4258_v3  ;;  %v1011_v41 = vpop.f32.mrb[45].mxu0 }
 0x17f   : > { %3429 = vmatpush3.bf16.msra.mxu0 %v3692_v46  ;;  %2524 = vmatprep.mubr.bf16.mxu0 %v1090_v15  ;;  %v1013_v39 = vpop.f32.mrb[46].mxu0  ;;  %v1070_v17 = vpop.f32.mrb[44].mxu1  ;;  %v3704_v15 = vld [vmem:[#allocation2 + $0x338] sm:$0xff]   ;;  %v1012_v30 = vadd.f32 %v1011_v41, %v4263_v52  ;;  %v3708_v52 = vld [vmem:[#allocation4] sm:$0xff]  }
 0x180   : > { %2485 = vmatmul.mubr.bf16.gmra.mrb[80].mxu1 %v1119_v53  ;;  %3430 = vmatprep.subr.bf16.mxu0 %v3695_v22  ;;  %v1071_v60 = vadd.f32 %v1070_v17, %v4268_v50  ;;  %v1014_v11 = vpop.f32.mrb[47].mxu0  ;;  %v1072_v19 = vpop.f32.mrb[45].mxu1  ;;  %v3706_v50 = vld [vmem:[#allocation2 + $0x3b8] sm:$0xff]  }
 0x181   : > { %3463 = vmatpush3.bf16.msra.mxu1 %v3694_v33  ;;  %2580 = vmatprep.mubr.bf16.mxu1 %v1092_v18  ;;  %v1074_v34 = vpop.f32.mrb[46].mxu1  ;;  %v1073_v8 = vadd.f32 %v1072_v19, %v4273_v26  ;;  %v1122_v13 = vpack.c.bf16 %v1012_v30, %v1012_v30  ;;  %v1121_v18 = vpack.c.bf16 %v1010_v4, %v1010_v4  ;;  %v3712_v26 = vld [vmem:[#allocation4 + $0x10] sm:$0xff]  }
 0x182   : > { %3464 = vmatprep.subr.bf16.mxu1 %v3697_v58  ;;  %v1075_v3 = vpop.f32.mrb[47].mxu1  ;;  %v1123_v20 = vpack.c.bf16 %v1071_v60, %v1071_v60 }
 0x183   : > { %3431 = vmatpush3.bf16.msra.mxu0 %v3696_v63  ;;  %v1124_v14 = vpack.c.bf16 %v1073_v8, %v1073_v8  ;;  %v3725_v63 = vld [vmem:[%s4418_s7 + $0x10] sm:$0xff]   ;;  %v3727_v8 = vld [vmem:[%s4418_s7 + $0x20] sm:$0xff]  }
 0x184   : > { %3432 = vmatprep.subr.bf16.mxu0 %v3699_v59 }
 0x185   : > { %3465 = vmatpush3.bf16.msra.mxu1 %v3698_v61 }
 0x186   : > { %3466 = vmatprep.subr.bf16.mxu1 %v3701_v43 }
 0x187   : > { %3433 = vmatpush3.bf16.msra.mxu0 %v3700_v51  ;;  %v3726_v51 = vld [vmem:[%s4418_s7 + $0x18] sm:$0xff]  }
 0x188   : > { %3434 = vmatprep.subr.bf16.mxu0 %v3703_v5 }
 0x189   : > { %3467 = vmatpush3.bf16.msra.mxu1 %v3702_v6 }
 0x18a   : > { %3468 = vmatprep.subr.bf16.mxu1 %v3705_v7 }
 0x18b   : > { %3435 = vmatpush3.bf16.msra.mxu0 %v3704_v15 }
 0x18c   : > { %3488 = vmatprep.subr.bf16.mxu0 %v3707_v55 }
 0x18d   : > { %3469 = vmatpush3.bf16.msra.mxu1 %v3706_v50 }
 0x18e   : > { %2525 = vmatmul.mubr.bf16.vlgmr.msra.gmra.mrb[84].mxu0 %v1089_v62  ;;  %v3711_v62 = vld [vmem:[#allocation4 + $0x50] sm:$0xff]  }
 0x18f   : > { %2532 = vmatprep.mubr.bf16.mxu0 %v1106_v47  ;;  %3489 = vmatpush3.bf16.msra.mxu0 %v3708_v52  ;;  %v3809_v47 = vmov 0.0  }
 0x190   : > { %2581 = vmatmul.mubr.bf16.vlgmr.msra.gmra.mrb[84].mxu1 %v1091_v9  ;;  %3490 = vmatprep.subr.bf16.mxu0 %v3709_v27  ;;  %v3714_v9 = vld [vmem:[#allocation4 + $0x18] sm:$0xff]  }
 0x191   : > { %2588 = vmatprep.mubr.bf16.mxu1 %v1108_v56  ;;  %3519 = vmatprep.subr.bf16.mxu1 %v3809_v47 }
 0x192   : > { %3520 = vmatpush3.bf16.msra.mxu1 %v3723_v45 }
 0x193   : > { %3491 = vmatpush3.bf16.msra.mxu0 %v3710_v42  ;;  %3521 = vmatprep.subr.bf16.mxu1 %v3809_v47  ;;  %v3728_v42 = vld [vmem:[%s4418_s7 + $0x28] sm:$0xff]  }
 0x194   : > { %3492 = vmatprep.subr.bf16.mxu0 %v3711_v62 }
 0x196   : > { %2533 = vmatmul.mubr.bf16.gmra.mrb[88].mxu0 %v1105_v49 }
 0x197   : > { %2540 = vmatprep.mubr.bf16.mxu0 %v1122_v13  ;;  %3493 = vmatpush3.bf16.msra.mxu0 %v3712_v26 }
 0x198   : > { %2589 = vmatmul.mubr.bf16.gmra.mrb[88].mxu1 %v1107_v54  ;;  %3494 = vmatprep.subr.bf16.mxu0 %v3713_v2  ;;  %v3724_v54 = vld [vmem:[%s4418_s7 + $0x8] sm:$0xff]  }
 0x199   : > { %2596 = vmatprep.mubr.bf16.mxu1 %v1124_v14  ;;  %3522 = vmatpush3.bf16.msra.mxu1 %v3724_v54 }
 0x19a   : > { %3523 = vmatprep.subr.bf16.mxu1 %v3809_v47 }
 0x19b   : > { %3495 = vmatpush3.bf16.msra.mxu0 %v3714_v9 }
 0x19c   : > { %3496 = vmatprep.subr.bf16.mxu0 %v3715_v16 }
 0x19d   : > { %3524 = vmatpush3.bf16.msra.mxu1 %v3725_v63 }
 0x19e   : > { %2541 = vmatmul.mubr.bf16.gmra.mrb[92].mxu0 %v1121_v18  ;;  %3525 = vmatprep.subr.bf16.mxu1 %v3809_v47 }
 0x19f   : > { %3497 = vmatpush3.bf16.msra.mxu0 %v3716_v21 }
 0x1a0   : > { %2597 = vmatmul.mubr.bf16.gmra.mrb[92].mxu1 %v1123_v20  ;;  %3498 = vmatprep.subr.bf16.mxu0 %v3717_v28 }
 0x1a1   : > { %3526 = vmatpush3.bf16.msra.mxu1 %v3726_v51  ;;  %3535 = vmatprep.mubr.msk.bf16.mxu1 %vm3810_vm4, %v3809_v47 }
 0x1a2   : > { %3527 = vmatprep.subr.bf16.mxu1 %v3809_v47 }
 0x1a3   : > { %3499 = vmatpush3.bf16.msra.mxu0 %v3718_v29 }
 0x1a4   : > { %3500 = vmatprep.subr.bf16.mxu0 %v3719_v31 }
 0x1a5   : > { %3528 = vmatpush3.bf16.msra.mxu1 %v3727_v8 }
 0x1a6   : > { %3529 = vmatprep.subr.bf16.mxu1 %v3809_v47 }
 0x1a7   : > { %3501 = vmatpush3.bf16.msra.mxu0 %v3720_v32 }
 0x1a8   : > { %3502 = vmatprep.subr.bf16.mxu0 %v3721_v35 }
 0x1a9   : > { %3530 = vmatpush3.bf16.msra.mxu1 %v3728_v42 }
 0x1aa   : > { %3531 = vmatprep.subr.bf16.mxu1 %v3809_v47 }
 0x1ab   : > { %3503 = vmatpush3.bf16.msra.mxu0 %v3722_v57 }
 0x201   : > { %v3232_v0 = vpop.f32.mrb[48].mxu0  ;;  %v3266_v40 = vpop.f32.mrb[48].mxu1 }
 0x202   : > { %v3233_v36 = vpop.f32.mrb[49].mxu0  ;;  %v3267_v1 = vpop.f32.mrb[49].mxu1 }
 0x203   : > { %v3234_v23 = vadd.f32 %v3233_v36, %v3232_v0  ;;  %v3235_v38 = vpop.f32.mrb[50].mxu0  ;;  %v3268_v49 = vadd.f32 %v3267_v1, %v3266_v40  ;;  %v3269_v44 = vpop.f32.mrb[50].mxu1 }
 0x204   : > { %v3236_v25 = vpop.f32.mrb[51].mxu0  ;;  %v3270_v46 = vpop.f32.mrb[51].mxu1 }
 0x205   : > { %v2191_v12 = vadd.f32 %v3234_v23, %v3059_v10  ;;  %v3237_v24 = vadd.f32 %v3236_v25, %v3235_v38  ;;  %v3271_v22 = vadd.f32 %v3270_v46, %v3269_v44 }
 0x207   : > { %v2194_v48 = vadd.f32 %v3237_v24, %v3059_v10  ;;  %v2247_v53 = vadd.f32 %v3268_v49, %v2191_v12 }
 0x209   : > { %v2250_v33 = vadd.f32 %v3271_v22, %v2194_v48  ;;  %v3238_v56 = vpop.f32.mrb[52].mxu0  ;;  %v3272_v41 = vpop.f32.mrb[52].mxu1 }
 0x20a   : > { %v3239_v37 = vpop.f32.mrb[53].mxu0  ;;  %v3273_v17 = vpop.f32.mrb[53].mxu1 }
 0x20b   : > { %v3240_v58 = vadd.f32 %v3239_v37, %v3238_v56  ;;  %v3241_v4 = vpop.f32.mrb[54].mxu0  ;;  %v3274_v11 = vadd.f32 %v3273_v17, %v3272_v41  ;;  %v3275_v19 = vpop.f32.mrb[54].mxu1 }
 0x20c   : > { %v3242_v39 = vpop.f32.mrb[55].mxu0  ;;  %v3276_v61 = vpop.f32.mrb[55].mxu1 }
 0x20d   : > { %v2199_v59 = vadd.f32 %v3240_v58, %v3059_v10  ;;  %v3243_v60 = vadd.f32 %v3242_v39, %v3241_v4  ;;  %v3277_v3 = vadd.f32 %v3276_v61, %v3275_v19 }
 0x20f   : > { %v2202_v34 = vadd.f32 %v3243_v60, %v3059_v10  ;;  %v2255_v43 = vadd.f32 %v3274_v11, %v2199_v59 }
 0x211   : > { %v2258_v5 = vadd.f32 %v3277_v3, %v2202_v34  ;;  %v3244_v6 = vpop.f32.mrb[56].mxu0  ;;  %v3278_v30 = vpop.f32.mrb[56].mxu1 }
 0x212   : > { %v3245_v7 = vpop.f32.mrb[57].mxu0  ;;  %v3279_v14 = vpop.f32.mrb[57].mxu1 }
 0x213   : > { %v3246_v15 = vadd.f32 %v3245_v7, %v3244_v6  ;;  %v3247_v50 = vpop.f32.mrb[58].mxu0  ;;  %v3280_v20 = vadd.f32 %v3279_v14, %v3278_v30  ;;  %v3281_v55 = vpop.f32.mrb[58].mxu1 }
 0x214   : > { %v3248_v13 = vpop.f32.mrb[59].mxu0  ;;  %v3282_v52 = vpop.f32.mrb[59].mxu1 }
 0x215   : > { %v2207_v18 = vadd.f32 %v3246_v15, %v3059_v10 }
 0x217   : > { %v2263_v27 = vadd.f32 %v3280_v20, %v2207_v18 }
 0x221   : > { %v3300_v62 = vpop.f32.mrb[60].mxu0 }
 0x222   : > { %v3301_v26 = vpop.f32.mrb[61].mxu0 }
 0x223   : > { %v3302_v2 = vadd.f32 %v3301_v26, %v3300_v62  ;;  %v3303_v9 = vpop.f32.mrb[62].mxu0  ;;  %v3334_v16 = vpop.f32.mrb[60].mxu1 }
 0x224   : > { %v3304_v21 = vpop.f32.mrb[63].mxu0  ;;  %v3335_v28 = vpop.f32.mrb[61].mxu1 }
 0x225   : > { %v2303_v29 = vadd.f32 %v3302_v2, %v2247_v53  ;;  %v3305_v31 = vadd.f32 %v3304_v21, %v3303_v9  ;;  %v3336_v32 = vadd.f32 %v3335_v28, %v3334_v16  ;;  %v3337_v35 = vpop.f32.mrb[62].mxu1 }
 0x226   : > { %v3338_v57 = vpop.f32.mrb[63].mxu1 }
 0x227   : > { %v2306_v0 = vadd.f32 %v3305_v31, %v2250_v33  ;;  %v2359_v10 = vadd.f32 %v3336_v32, %v2303_v29  ;;  %v3339_v36 = vadd.f32 %v3338_v57, %v3337_v35 }
 0x229   : > { %v2362_v23 = vadd.f32 %v3339_v36, %v2306_v0  ;;  %v3306_v38 = vpop.f32.mrb[64].mxu0 }
 0x22a   : > { %v3307_v40 = vpop.f32.mrb[65].mxu0 }
 0x22b   : > { %v3308_v25 = vadd.f32 %v3307_v40, %v3306_v38  ;;  %v3309_v1 = vpop.f32.mrb[66].mxu0  ;;  %v3340_v12 = vpop.f32.mrb[64].mxu1 }
 0x22c   : > { %v3310_v24 = vpop.f32.mrb[67].mxu0  ;;  %v3341_v49 = vpop.f32.mrb[65].mxu1 }
 0x22d   : > { %v2311_v44 = vadd.f32 %v3308_v25, %v2255_v43  ;;  %v3311_v45 = vadd.f32 %v3310_v24, %v3309_v1  ;;  %v3342_v46 = vadd.f32 %v3341_v49, %v3340_v12  ;;  %v3343_v48 = vpop.f32.mrb[66].mxu1 }
 0x22e   : > { %v3344_v53 = vpop.f32.mrb[67].mxu1 }
 0x22f   : > { %v2314_v22 = vadd.f32 %v3311_v45, %v2258_v5  ;;  %v2367_v54 = vadd.f32 %v3342_v46, %v2311_v44  ;;  %v3345_v56 = vadd.f32 %v3344_v53, %v3343_v48 }
 0x231   : > { %v2370_v37 = vadd.f32 %v3345_v56, %v2314_v22  ;;  %v3312_v33 = vpop.f32.mrb[68].mxu0 }
 0x232   : > { %v3313_v58 = vpop.f32.mrb[69].mxu0 }
 0x233   : > { %v3314_v4 = vadd.f32 %v3313_v58, %v3312_v33  ;;  %v3346_v41 = vpop.f32.mrb[68].mxu1  ;;  %v3315_v63 = vpop.f32.mrb[70].mxu0 }
 0x234   : > { %v3347_v39 = vpop.f32.mrb[69].mxu1  ;;  %v3316_v17 = vpop.f32.mrb[71].mxu0 }
 0x235   : > { %v2319_v59 = vadd.f32 %v3314_v4, %v2263_v27  ;;  %v3348_v60 = vadd.f32 %v3347_v39, %v3346_v41  ;;  %v3349_v11 = vpop.f32.mrb[70].mxu1 }
 0x236   : > { %v3350_v19 = vpop.f32.mrb[71].mxu1 }
 0x237   : > { %v2375_v61 = vadd.f32 %v3348_v60, %v2319_v59 }
 0x241   : > { %v3368_v34 = vpop.f32.mrb[72].mxu0 }
 0x242   : > { %v3369_v43 = vpop.f32.mrb[73].mxu0 }
 0x243   : > { %v3370_v3 = vadd.f32 %v3369_v43, %v3368_v34  ;;  %v3371_v51 = vpop.f32.mrb[74].mxu0  ;;  %v3402_v5 = vpop.f32.mrb[72].mxu1 }
 0x244   : > { %v3372_v6 = vpop.f32.mrb[75].mxu0  ;;  %v3403_v7 = vpop.f32.mrb[73].mxu1 }
 0x245   : > { %v2415_v15 = vadd.f32 %v3370_v3, %v2359_v10  ;;  %v3373_v50 = vadd.f32 %v3372_v6, %v3371_v51  ;;  %v3404_v30 = vadd.f32 %v3403_v7, %v3402_v5  ;;  %v3405_v8 = vpop.f32.mrb[74].mxu1 }
 0x246   : > { %v3406_v13 = vpop.f32.mrb[75].mxu1 }
 0x247   : > { %v2418_v14 = vadd.f32 %v3373_v50, %v2362_v23  ;;  %v2471_v18 = vadd.f32 %v3404_v30, %v2415_v15  ;;  %v3407_v20 = vadd.f32 %v3406_v13, %v3405_v8 }
 0x249   : > { %v2474_v55 = vadd.f32 %v3407_v20, %v2418_v14  ;;  %v3374_v52 = vpop.f32.mrb[76].mxu0 }
 0x24a   : > { %v3375_v27 = vpop.f32.mrb[77].mxu0 }
 0x24b   : > { %v3376_v42 = vadd.f32 %v3375_v27, %v3374_v52  ;;  %v3377_v62 = vpop.f32.mrb[78].mxu0  ;;  %v3408_v26 = vpop.f32.mrb[76].mxu1 }
 0x24c   : > { %v3378_v2 = vpop.f32.mrb[79].mxu0  ;;  %v3409_v9 = vpop.f32.mrb[77].mxu1 }
 0x24d   : > { %v2423_v16 = vadd.f32 %v3376_v42, %v2367_v54  ;;  %v3379_v21 = vadd.f32 %v3378_v2, %v3377_v62  ;;  %v3410_v28 = vadd.f32 %v3409_v9, %v3408_v26  ;;  %v3411_v29 = vpop.f32.mrb[78].mxu1 }
 0x24e   : > { %v3412_v31 = vpop.f32.mrb[79].mxu1 }
 0x24f   : > { %v2426_v32 = vadd.f32 %v3379_v21, %v2370_v37  ;;  %v2479_v35 = vadd.f32 %v3410_v28, %v2423_v16  ;;  %v3413_v57 = vadd.f32 %v3412_v31, %v3411_v29 }
 0x251   : > { %v2482_v0 = vadd.f32 %v3413_v57, %v2426_v32  ;;  %v3380_v10 = vpop.f32.mrb[80].mxu0 }
 0x252   : > { %v3381_v36 = vpop.f32.mrb[81].mxu0 }
 0x253   : > { %v3382_v23 = vadd.f32 %v3381_v36, %v3380_v10  ;;  %v3414_v38 = vpop.f32.mrb[80].mxu1  ;;  %v3383_v40 = vpop.f32.mrb[82].mxu0 }
 0x254   : > { %v3415_v25 = vpop.f32.mrb[81].mxu1  ;;  %v3384_v1 = vpop.f32.mrb[83].mxu0 }
 0x255   : > { %v2431_v12 = vadd.f32 %v3382_v23, %v2375_v61  ;;  %v3416_v24 = vadd.f32 %v3415_v25, %v3414_v38  ;;  %v3417_v49 = vpop.f32.mrb[82].mxu1 }
 0x256   : > { %v3418_v44 = vpop.f32.mrb[83].mxu1 }
 0x257   : > { %v2487_v45 = vadd.f32 %v3416_v24, %v2431_v12 }
 0x261   : > { %v3436_v46 = vpop.f32.mrb[84].mxu0 }
 0x262   : > { %v3437_v48 = vpop.f32.mrb[85].mxu0 }
 0x263   : > { %v3438_v53 = vadd.f32 %v3437_v48, %v3436_v46  ;;  %v3439_v22 = vpop.f32.mrb[86].mxu0  ;;  %v3470_v54 = vpop.f32.mrb[84].mxu1 }
 0x264   : > { %v3440_v56 = vpop.f32.mrb[87].mxu0  ;;  %v3471_v37 = vpop.f32.mrb[85].mxu1 }
 0x265   : > { %v2527_v33 = vadd.f32 %v3438_v53, %v2471_v18  ;;  %v3441_v58 = vadd.f32 %v3440_v56, %v3439_v22  ;;  %v3472_v4 = vadd.f32 %v3471_v37, %v3470_v54  ;;  %v3473_v41 = vpop.f32.mrb[86].mxu1 }
 0x266   : > { %v3474_v63 = vpop.f32.mrb[87].mxu1 }
 0x267   : > { %v2530_v39 = vadd.f32 %v3441_v58, %v2474_v55  ;;  %v2583_v17 = vadd.f32 %v3472_v4, %v2527_v33  ;;  %v3475_v59 = vadd.f32 %v3474_v63, %v3473_v41  ;;  %v3730_v63 = vld [vmem:[%s4418_s7 + $0x38] sm:$0xff]  }
 0x269   : > { %v2605_v60 = vrot.slane %v2583_v17, 3  ;;  %v2586_v11 = vadd.f32 %v3475_v59, %v2530_v39  ;;  %v3442_v19 = vpop.f32.mrb[88].mxu0  ;;  %v2613_v43 = vrot.slane %v2583_v17, 6 }
 0x26a   : > { %v3443_v61 = vpop.f32.mrb[89].mxu0 }
 0x26b   : > { %v2607_v34 = vmax.f32 %v2583_v17, %v2605_v60  ;;  %v2614_v3 = vrot.slane %v2586_v11, 6  ;;  %v3445_v51 = vpop.f32.mrb[90].mxu0  ;;  %v3476_v5 = vpop.f32.mrb[88].mxu1  ;;  %v3444_v6 = vadd.f32 %v3443_v61, %v3442_v19  ;;  %v2622_v18 = vrot.slane %v2586_v11, 1  ;;  %v3188_v17 = vld [vmem:[%s4417_s6] ss:$0 sm:$0xff] }
 0x26c   : > { %v3446_v7 = vpop.f32.mrb[91].mxu0  ;;  %v3477_v15 = vpop.f32.mrb[89].mxu1  ;;  %v2628_v62 = vrot.slane %v2586_v11, 4  ;;  %v2639_v21 = vrot.slane %v2586_v11, 7 }
 0x26d   : > { %v2615_v50 = vsel %vm540_vm0, %v2613_v43, %v2614_v3  ;;  %v3447_v30 = vadd.f32 %v3446_v7, %v3445_v51  ;;  %v3478_v8 = vadd.f32 %v3477_v15, %v3476_v5  ;;  %v3479_v13 = vpop.f32.mrb[90].mxu1  ;;  %v2535_v20 = vadd.f32 %v3444_v6, %v2479_v35  ;;  %v3205_v3 = vld [vmem:[%s4419_s8] ss:$0 sm:$0xff] }
 0x26e   : > { %v2617_v14 = vmax.f32 %v2607_v34, %v2615_v50  ;;  %v3480_v55 = vpop.f32.mrb[91].mxu1 }
 0x26f   : > { %v2538_v52 = vadd.f32 %v3447_v30, %v2482_v0  ;;  %v3481_v27 = vadd.f32 %v3480_v55, %v3479_v13  ;;  %v2591_v26 = vadd.f32 %v3478_v8, %v2535_v20 }
 0x270   : > { %v2624_v42 = vmax.f32 %v2617_v14, %v2622_v18 }
 0x271   : > { %v2594_v2 = vadd.f32 %v3481_v27, %v2538_v52  ;;  %v3448_v9 = vpop.f32.mrb[92].mxu0  ;;  %v2609_v28 = vrot.slane %v2591_v26, 3  ;;  %v2640_v29 = vrot.slane %v2591_v26, 7 }
 0x272   : > { %v2630_v16 = vmax.f32 %v2624_v42, %v2628_v62  ;;  %v3449_v31 = vpop.f32.mrb[93].mxu0 }
 0x273   : > { %v2619_v32 = vrot.slane %v2594_v2, 6  ;;  %v3450_v57 = vadd.f32 %v3449_v31, %v3448_v9  ;;  %v3451_v10 = vpop.f32.mrb[94].mxu0  ;;  %v3482_v36 = vpop.f32.mrb[92].mxu1  ;;  %v2611_v23 = vmax.f32 %v2591_v26, %v2609_v28  ;;  %v2641_v35 = vsel %vm2638_vm2, %v2639_v21, %v2640_v29 }
 0x274   : > { %v3452_v38 = vpop.f32.mrb[95].mxu0  ;;  %v3483_v0 = vpop.f32.mrb[93].mxu1  ;;  %v2643_v12 = vmax.f32 %v2630_v16, %v2641_v35  ;;  %v2625_v49 = vrot.slane %v2594_v2, 1  ;;  %v2633_v53 = vrot.slane %v2594_v2, 4 }
 0x275   : > { %v2543_v40 = vadd.f32 %v3450_v57, %v2487_v45  ;;  %v3484_v25 = vadd.f32 %v3483_v0, %v3482_v36  ;;  %v3485_v1 = vpop.f32.mrb[94].mxu1  ;;  %v2621_v24 = vmax.f32 %v2611_v23, %v2619_v32  ;;  %v3729_v45 = vld [vmem:[%s4418_s7 + $0x30] sm:$0xff]  }
 0x276   : > { %v3486_v44 = vpop.f32.mrb[95].mxu1  ;;  %v2650_v41 = vpack.c.bf16 %v2643_v12, %v2643_v12  ;;  %3532 = vmatpush3.bf16.msra.mxu1 %v3729_v45 }
 0x277   : > { %v2599_v46 = vadd.f32 %v3484_v25, %v2543_v40  ;;  %v2627_v48 = vmax.f32 %v2621_v24, %v2625_v49  ;;  %3533 = vmatprep.subr.bf16.mxu1 %v3809_v47 }
 0x279   : > { %v2634_v22 = vrot.slane %v2599_v46, 4  ;;  %v2644_v56 = vrot.slane %v2599_v46, 7 }
 0x27a   : > { %3534 = vmatpush3.bf16.msra.mxu1 %v3730_v63 }
 0x27b   : > { %v2635_v54 = vsel %vm2632_vm3, %v2633_v53, %v2634_v22 }
 0x27c   : > { %v2637_v37 = vmax.f32 %v2627_v48, %v2635_v54 }
 0x27e   : > { %v2646_v33 = vmax.f32 %v2637_v37, %v2644_v56 }
 0x280   : > { %v2648_v58 = vrot.slane %v2646_v33, 2 }
 0x282   : > { %v2651_v4 = vpack.c.bf16 %v2648_v58, %v2648_v58 }
 0x284   : > { %2819 = vmatprep.mubr.bf16.mxu0 %v2651_v4 }
 0x285   : > { %2820 = vmatmul.mubr.bf16.vlgmr.msra.gmra.mrb[96].mxu0 %v2650_v41 }
 0x358   : > { %v3504_v39 = vpop.f32.mrb[96].mxu0 }
 0x359   : > { %v3505_v59 = vpop.f32.mrb[97].mxu0 }
 0x35a   : > { %v3506_v60 = vadd.f32 %v3505_v59, %v3504_v39  ;;  %v3507_v11 = vpop.f32.mrb[98].mxu0 }
 0x35b   : > { %v3508_v19 = vpop.f32.mrb[99].mxu0 }
 0x35c   : > { %v2822_v61 = vadd.f32 %v3506_v60, %v3188_v17 }
 0x35e   : > { %v2827_v34 = vmax.f32 %v2822_v61, 0.0 }
 0x360   : > { %v2828_v43 = vpack.c.bf16 %v2827_v34, %v2827_v34 }
 0x362   : > { %3536 = vmatmul.mubr.bf16.vlgmr.msra.gmra.mrb[96].mxu1 %v2828_v43 }
 0x435   : > { %v2934_v47 = vpop.f32.mrb[96].mxu1 }
 0x436   : > { %v2935_v51 = vadd.f32 %v3205_v3, %v2934_v47  ;;  %v3537_v5 = vpop.f32.mrb[97].mxu1 }
 0x437   : > { %v2937_v6 = vpop.f32.mrb[98].mxu1 }
 0x438   : > { %2940 = vst [vmem:[%s360_s23] sm:$0x7] %v2935_v51  ;;  %v3538_v7 = vpop.f32.mrb[99].mxu1 }
 0x439 PF: > { %s21_s30 = sadd.s32 1, %s3801_s30  }
 0x43a   : > { %p18_p9 = scmp.ge.s32.totalorder %s21_s30, 4  }
 0x43c   :  { %20 = sbr.rel (!%p18_p9) target bundleno = 2 (0x2), region = 95 }
 0x443   :  { %2960 = vsyncpa [#allocation3], 1 }
 0x444   :  { %2962 = vsyncpa [#allocation3 + $0x1], 1 }
 0x445   :  { %2963 = vsyncpa [#allocation5], 1 }

</bundles_post_ra>
